<compile_context>
chip_gen: v7x
topology: tpu7x:2x2x1
jax: 0.10.0
libtpu: 0.0.40
codegen_flags: <defaults>
</compile_context>

<pallas_src>
import functools

import jax
import jax.numpy as jnp
from jax import lax
from jax.experimental import pallas as pl
from jax.experimental.pallas import tpu as pltpu


def _round_up(x, m):
    return ((x + m - 1) // m) * m


def _sigmoid(x):
    return 1.0 / (1.0 + jnp.exp(-x))


def _softplus(x):
    # matches torch.nn.functional.softplus (threshold=20), without overflowing exp
    return jnp.where(x > 20.0, x, jnp.log1p(jnp.exp(jnp.minimum(x, 20.0))))


# --------------------------------------------------------------------------------------
# Stride-1 conv kernel (shared by Conv1d and ConvTranspose1d paths)
#   y[b, l, :] = relu?( (sum_j xp[b, l + j, :] @ W[j]) * scale + shift )
# --------------------------------------------------------------------------------------

def _conv_s1_kernel(xp_ref, w_ref, scale_ref, shift_ref, o_ref, *, taps, relu, tile_l):
    lt = pl.program_id(1)
    base = pl.multiple_of(lt * tile_l, 8)
    cout = o_ref.shape[-1]

    def tap_body(j, acc):
        xs = xp_ref[pl.ds(base + j, tile_l), :].astype(jnp.bfloat16)
        return acc + jnp.dot(xs, w_ref[j], preferred_element_type=jnp.float32)

    acc = lax.fori_loop(0, taps, tap_body,
                        jnp.zeros((tile_l, cout), jnp.float32), unroll=True)
    y = acc * scale_ref[...] + shift_ref[...]
    if relu:
        y = jnp.maximum(y, 0.0)
    o_ref[...] = y


def _conv_s1_pallas(xp, w, scale, shift, lout, relu):
    """xp: (B, Lpad, C) f32, w: (taps, C, Cout) -> (B, lout, Cout) f32."""
    B, Lpad, C = xp.shape
    taps, _, Cout = w.shape
    tile_l = 256 if lout >= 256 else _round_up(lout, 8)
    n_lt = -(-lout // tile_l)
    lout_pad = n_lt * tile_l
    need = lout_pad + taps - 1
    if need > Lpad:
        xp = jnp.pad(xp, ((0, 0), (0, need - Lpad), (0, 0)))
        Lpad = need

    xp = xp.astype(jnp.float32)
    wb = w.astype(jnp.bfloat16)
    scale2 = scale.reshape(1, Cout).astype(jnp.float32)
    shift2 = shift.reshape(1, Cout).astype(jnp.float32)

    out = pl.pallas_call(
        functools.partial(_conv_s1_kernel, taps=taps, relu=relu, tile_l=tile_l),
        grid=(B, n_lt),
        in_specs=[
            pl.BlockSpec((None, Lpad, C), lambda b, lt: (b, 0, 0)),     # full L per batch
            pl.BlockSpec((taps, C, Cout), lambda b, lt: (0, 0, 0)),
            pl.BlockSpec((1, Cout), lambda b, lt: (0, 0)),
            pl.BlockSpec((1, Cout), lambda b, lt: (0, 0)),
        ],
        out_specs=pl.BlockSpec((None, tile_l, Cout), lambda b, lt: (b, lt, 0)),
        out_shape=jax.ShapeDtypeStruct((B, lout_pad, Cout), jnp.float32),
        compiler_params=pltpu.CompilerParams(
            dimension_semantics=("parallel", "parallel")),
    )(xp, wb, scale2, shift2)
    return out[:, :lout, :]


def conv1d_s2_bn_act(x, w, scale, shift, relu):
    """PyTorch Conv1d(stride=2, padding=(K-2)//2) + BN affine + optional ReLU.
    x: (B, Lin, Cin) channels-last, w: (Cout, Cin, K).  Stride-2 handled via
    depth-to-space (2 consecutive samples folded into channels -> stride-1, K/2 taps)."""
    B, Lin, Cin = x.shape
    Cout, _, K = w.shape
    P = (K - 2) // 2
    Lout = (Lin + 2 * P - K) // 2 + 1
    xp = jnp.pad(x, ((0, 0), (P, P), (0, 0)))                       # (B, Lin+2P, Cin)
    x2 = xp.reshape(B, (Lin + 2 * P) // 2, 2 * Cin)                 # depth-to-space
    wt = jnp.transpose(w, (2, 1, 0)).reshape(K // 2, 2 * Cin, Cout)  # W'[j, r*Cin+ci, co]
    return _conv_s1_pallas(x2, wt, scale, shift, Lout, relu)


def convtr1d_s2_bn_act(x, w, scale, shift, relu):
    """PyTorch ConvTranspose1d(stride=2, padding=(K-2)//2) + BN affine + optional ReLU.
    x: (B, Lin, Cin) channels-last, w: (Cin, Cout, K).  Implemented as zero-upsampling
    followed by a stride-1 correlation with the flipped kernel."""
    B, Lin, Cin = x.shape
    _, Cout, K = w.shape
    P = (K - 2) // 2
    Lout = 2 * Lin
    xu = jnp.stack([x, jnp.zeros_like(x)], axis=2).reshape(B, 2 * Lin, Cin)[:, :2 * Lin - 1, :]
    xpad = jnp.pad(xu, ((0, 0), (K - 1 - P, P + 1), (0, 0)))
    wt = jnp.transpose(w[:, :, ::-1], (2, 0, 1))                    # (K, Cin, Cout)
    return _conv_s1_pallas(xpad, wt, scale, shift, Lout, relu)


# --------------------------------------------------------------------------------------
# Fused Mamba block kernel (both directions, grid axis = direction)
# --------------------------------------------------------------------------------------

def _mamba_kernel(xin_ref, normw_ref, wxi_ref, wzi_ref, cw0_ref, cw1_ref, cb_ref,
                  wdtc_ref, wB_ref, wC_ref, dtb_ref, At_ref, Dv_ref, wout_ref,
                  o_ref, u_s, z_s, dl_s, bm_s, cm_s, y_s, *, eps):
    Bb, L, Dm = xin_ref.shape
    Din = u_s.shape[-1]
    N = bm_s.shape[-1]

    # ---- RMSNorm ----
    h = xin_ref[...]
    hs = h * lax.rsqrt(jnp.mean(h * h, axis=-1, keepdims=True) + eps) * normw_ref[...]
    hs2 = hs.reshape(Bb * L, Dm)

    # ---- in_proj (x / z halves, no bias) ----
    xpart = jnp.dot(hs2, wxi_ref[...], preferred_element_type=jnp.float32).reshape(Bb, L, Din)
    z_s[...] = jnp.dot(hs2, wzi_ref[...], preferred_element_type=jnp.float32).reshape(Bb, L, Din)

    # ---- causal depthwise conv (d_conv=2) + SiLU ----
    # build x[t-1] with static ref slicing (y_s reused as a temporary, fully
    # overwritten by the scan below before it is read again).
    y_s[:, 0:1, :] = jnp.zeros((Bb, 1, Din), jnp.float32)
    y_s[:, 1:L, :] = xpart[:, 0:L - 1, :]
    xprev = y_s[...]
    xc = xprev * cw0_ref[...] + xpart * cw1_ref[...] + cb_ref[...]
    xc = xc * _sigmoid(xc)
    u_s[...] = xc
    xc2 = xc.reshape(Bb * L, Din)

    # ---- x_proj -> (dt, B, C); dt_proj folded into wdtc; softplus(. + dt_bias) ----
    dl_s[...] = _softplus(
        jnp.dot(xc2, wdtc_ref[...], preferred_element_type=jnp.float32).reshape(Bb, L, Din)
        + dtb_ref[...])
    bm_s[...] = jnp.dot(xc2, wB_ref[...], preferred_element_type=jnp.float32).reshape(Bb, L, N)
    cm_s[...] = jnp.dot(xc2, wC_ref[...], preferred_element_type=jnp.float32).reshape(Bb, L, N)

    # ---- selective scan: state (B, N, Din), no (B,L,D,N) materialization ----
    At = At_ref[...]                                                 # (N, Din), = -exp(A_log).T

    def step(t, state):
        d_t = dl_s[:, pl.ds(t, 1), :]                                # (B, 1, Din)
        u_t = u_s[:, pl.ds(t, 1), :]                                 # (B, 1, Din)
        b_t = bm_s[:, pl.ds(t, 1), :]                                # (B, 1, N)
        c_t = cm_s[:, pl.ds(t, 1), :]                                # (B, 1, N)
        dA = jnp.exp(d_t * At)                                       # (B, N, Din)
        dBu = jnp.einsum('bxn,bxd->bnd', b_t, d_t * u_t,
                         preferred_element_type=jnp.float32)         # (B, N, Din)
        state = dA * state + dBu
        y_t = jnp.einsum('bxn,bnd->bxd', c_t, state,
                         preferred_element_type=jnp.float32)         # (B, 1, Din)
        y_s[:, pl.ds(t, 1), :] = y_t
        return state

    lax.fori_loop(0, L, step, jnp.zeros((Bb, N, Din), jnp.float32))

    # ---- D-skip, z-gate, out_proj ----
    y = y_s[...] + u_s[...] * Dv_ref[...]
    z = z_s[...]
    y = y * (z * _sigmoid(z))
    out = jnp.dot(y.reshape(Bb * L, Din), wout_ref[...], preferred_element_type=jnp.float32)
    o_ref[...] = out.reshape(Bb, L, Dm)


def _stack_mamba_params(pf, pb, dim):
    """Stack forward / backward Mamba parameters along a leading direction axis,
    already transposed into matmul-friendly (in, out) layouts."""
    d_inner = pf["D"].shape[0]
    R = pf["dt_proj_w"].shape[1]
    N = pf["A_log"].shape[1]

    def st(fn):
        return jnp.stack([fn(pf), fn(pb)], axis=0).astype(jnp.float32)

    return dict(
        normw=st(lambda p: p["norm_w"].reshape(1, 1, dim)),
        wxi=st(lambda p: p["in_proj_w"][:d_inner, :].T),                 # (Dm, Din)
        wzi=st(lambda p: p["in_proj_w"][d_inner:, :].T),                 # (Dm, Din)
        cw0=st(lambda p: p["conv_w0"].reshape(1, 1, d_inner)),
        cw1=st(lambda p: p["conv_w1"].reshape(1, 1, d_inner)),
        cb=st(lambda p: p["conv_b"].reshape(1, 1, d_inner)),
        # dt path has no nonlinearity between x_proj and dt_proj -> fold the weights.
        wdtc=st(lambda p: p["x_proj_w"][:R, :].T @ p["dt_proj_w"].T),    # (Din, Din)
        wB=st(lambda p: p["x_proj_w"][R:R + N, :].T),                    # (Din, N)
        wC=st(lambda p: p["x_proj_w"][R + N:, :].T),                     # (Din, N)
        dtb=st(lambda p: p["dt_proj_b"].reshape(1, 1, d_inner)),
        At=st(lambda p: (-jnp.exp(p["A_log"])).T),                       # (N, Din)
        Dv=st(lambda p: p["D"].reshape(1, 1, d_inner)),
        wout=st(lambda p: p["out_proj_w"].T),                            # (Din, Dm)
    )


def fused_mamba(xin_s, mp):
    """xin_s: (2, B, L, Dm) -- direction 0 = forward input, 1 = time-reversed input.
    Returns (2, B, L, Dm) mixer outputs (in each direction's own time order)."""
    two, B, L, Dm = xin_s.shape
    Din = mp["Dv"].shape[-1]
    N = mp["At"].shape[1]

    def sp(a):
        return pl.BlockSpec((None,) + tuple(a.shape[1:]),
                            lambda d, _n=a.ndim - 1: (d,) + (0,) * _n)

    args = [xin_s.astype(jnp.float32), mp["normw"], mp["wxi"], mp["wzi"],
            mp["cw0"], mp["cw1"], mp["cb"], mp["wdtc"], mp["wB"], mp["wC"],
            mp["dtb"], mp["At"], mp["Dv"], mp["wout"]]

    return pl.pallas_call(
        functools.partial(_mamba_kernel, eps=1e-5),
        grid=(2,),
        in_specs=[sp(a) for a in args],
        out_specs=pl.BlockSpec((None, B, L, Dm), lambda d: (d, 0, 0, 0)),
        out_shape=jax.ShapeDtypeStruct((2, B, L, Dm), jnp.float32),
        scratch_shapes=[
            pltpu.VMEM((B, L, Din), jnp.float32),   # u (post conv+SiLU)
            pltpu.VMEM((B, L, Din), jnp.float32),   # z
            pltpu.VMEM((B, L, Din), jnp.float32),   # delta (post softplus)
            pltpu.VMEM((B, L, N), jnp.float32),     # B
            pltpu.VMEM((B, L, N), jnp.float32),     # C
            pltpu.VMEM((B, L, Din), jnp.float32),   # y accumulator
        ],
        compiler_params=pltpu.CompilerParams(dimension_semantics=("parallel",)),
    )(*args)


# --------------------------------------------------------------------------------------
# SnakeNet forward (channels-last throughout)
# --------------------------------------------------------------------------------------

def snakenet_forward(x, params, dim=8):
    eps = 1e-5

    def bn_fold(p):
        s = p["bn_gamma"] * lax.rsqrt(p["bn_var"] + eps)
        return s, (p["conv_b"] - p["bn_mean"]) * s + p["bn_beta"]

    B, T = x.shape
    xin = (x + 1.0)[:, :, None]                                          # (B, T, 1)

    s1, sh1 = bn_fold(params["enc1"])
    x1 = conv1d_s2_bn_act(xin, params["enc1"]["conv_w"], s1, sh1, relu=True)   # (B, T/2, 2*dim)
    s2, sh2 = bn_fold(params["enc2"])
    x2 = conv1d_s2_bn_act(x1, params["enc2"]["conv_w"], s2, sh2, relu=True)    # (B, T/4, dim)

    # Both Mamba directions in one fused Pallas call.
    mp = _stack_mamba_params(params["snake"], params["bsnake"], dim)
    xin_s = jnp.stack([x2, x2[:, ::-1, :]], axis=0)                       # (2, B, L, dim)
    mix = fused_mamba(xin_s, mp)                                          # (2, B, L, dim)
    res_f = mix[0] + x2
    res_b = mix[1][:, ::-1, :] + x2
    d1 = jnp.concatenate([res_f, res_b, x2], axis=-1)                     # (B, L, 3*dim)

    sd2, shd2 = bn_fold(params["dec2"])
    d2 = convtr1d_s2_bn_act(d1, params["dec2"]["conv_w"], sd2, shd2, relu=True)   # (B, 2L, 2*dim)
    d2 = jnp.concatenate([d2, x1], axis=-1)                               # (B, 2L, 4*dim)
    out = convtr1d_s2_bn_act(d2, params["dec3"]["conv_w"],
                             jnp.ones((1,), jnp.float32), params["dec3"]["conv_b"],
                             relu=False)                                  # (B, T, 1)
    return out[:, :, 0] - 1.0


# --------------------------------------------------------------------------------------
# Deterministic parameter init (shapes per SnakeNet.__init__: dim, stride=2, ks=[16,32,64])
# --------------------------------------------------------------------------------------

def init_params(key, dim=8, kernel_sizes=(16, 32, 64), d_state=8, expand=4):
    d_inner = expand * dim
    dt_rank = -(-dim // 16)  # ceil(dim / 16)
    keys = iter(jax.random.split(key, 64))
    nrm = lambda shape, s=0.1: (s * jax.random.normal(next(keys), shape)).astype(jnp.float32)

    def conv_bn(cin, cout, k):
        return dict(conv_w=nrm((cout, cin, k)), conv_b=nrm((cout,)),
                    bn_gamma=jnp.ones((cout,), jnp.float32), bn_beta=jnp.zeros((cout,), jnp.float32),
                    bn_mean=jnp.zeros((cout,), jnp.float32), bn_var=jnp.ones((cout,), jnp.float32))

    def mamba_p():
        return dict(
            norm_w=jnp.ones((dim,), jnp.float32),
            in_proj_w=nrm((2 * d_inner, dim)),
            conv_w0=nrm((d_inner,)), conv_w1=nrm((d_inner,)), conv_b=nrm((d_inner,)),
            x_proj_w=nrm((dt_rank + 2 * d_state, d_inner)),
            dt_proj_w=nrm((d_inner, dt_rank)),
            dt_proj_b=nrm((d_inner,)),
            A_log=jnp.log(jnp.tile(jnp.arange(1, d_state + 1, dtype=jnp.float32)[None, :],
                                   (d_inner, 1))),
            D=jnp.ones((d_inner,), jnp.float32),
            out_proj_w=nrm((dim, d_inner)),
        )

    k0, k1 = kernel_sizes[0], kernel_sizes[1]
    return dict(
        enc1=conv_bn(1, 2 * dim, k0),
        enc2=conv_bn(2 * dim, dim, k1),
        dec2=dict(conv_w=nrm((3 * dim, 2 * dim, k1)), conv_b=nrm((2 * dim,)),
                  bn_gamma=jnp.ones((2 * dim,), jnp.float32), bn_beta=jnp.zeros((2 * dim,), jnp.float32),
                  bn_mean=jnp.zeros((2 * dim,), jnp.float32), bn_var=jnp.ones((2 * dim,), jnp.float32)),
        dec3=dict(conv_w=nrm((4 * dim, 1, k0)), conv_b=nrm((1,))),
        snake=mamba_p(),
        bsnake=mamba_p(),
    )


if __name__ == "__main__":
    key = jax.random.PRNGKey(0)
    kp, kx = jax.random.split(key)
    dim = 8
    B, T = 2, 64  # T must be divisible by 4 (two stride-2 encoders)
    params = init_params(kp, dim=dim)
    x = jax.random.normal(kx, (B, T), dtype=jnp.float32)

    fwd = jax.jit(functools.partial(snakenet_forward, dim=dim))
    out = fwd(x, params)
    jax.block_until_ready(out)
    assert out.shape == (B, T), out.shape
    assert bool(jnp.all(jnp.isfinite(out)))
    print("KERNEL_OK")
</pallas_src>

<mosaic_0001>
module attributes {stable_mosaic.version = 11 : i64} {
  func.func @_conv_s1_kernel(%arg0: i32, %arg1: i32, %arg2: memref<1x39x2xf32, #tpu.memory_space<vmem>>, %arg3: memref<8x2x16xbf16, #tpu.memory_space<vmem>>, %arg4: memref<1x16xf32, #tpu.memory_space<vmem>>, %arg5: memref<1x16xf32, #tpu.memory_space<vmem>>, %arg6: memref<1x32x16xf32, #tpu.memory_space<vmem>>) attributes {dimension_semantics = [#tpu.dimension_semantics<parallel>, #tpu.dimension_semantics<parallel>], iteration_bounds = array<i64: 2, 1>, scalar_prefetch = 0 : i64, scratch_operands = 0 : i64, tpu.core_type = #tpu.core_type<tc>, window_params = [{transform_indices = @transform_0, window_bounds = array<i64: 1, 39, 2>}, {pipeline_mode = #tpu.pipeline_mode<synchronous>, transform_indices = @transform_1, window_bounds = array<i64: 8, 2, 16>}, {pipeline_mode = #tpu.pipeline_mode<synchronous>, transform_indices = @transform_2, window_bounds = array<i64: 1, 16>}, {pipeline_mode = #tpu.pipeline_mode<synchronous>, transform_indices = @transform_3, window_bounds = array<i64: 1, 16>}, {transform_indices = @transform_4, window_bounds = array<i64: 1, 32, 16>}]} {
    %c32_i32 = arith.constant 32 : i32
    %0 = arith.muli %arg1, %c32_i32 : i32
    %1 = tpu.assume_multiple %0, 8 : i32
    %cst = arith.constant 0.000000e+00 : f32
    %2 = vector.broadcast %cst : f32 to vector<32x16xf32>
    %c0_i32 = arith.constant 0 : i32
    %3 = arith.addi %1, %c0_i32 : i32
    %c0 = arith.constant 0 : index
    %4 = arith.index_cast %3 : i32 to index
    %c0_0 = arith.constant 0 : index
    %5 = vector.load %arg2[%c0, %4, %c0_0] : memref<1x39x2xf32, #tpu.memory_space<vmem>>, vector<1x32x2xf32>
    %6 = vector.shape_cast %5 : vector<1x32x2xf32> to vector<32x2xf32>
    %7 = arith.truncf %6 : vector<32x2xf32> to vector<32x2xbf16>
    %8 = arith.index_cast %c0_i32 : i32 to index
    %c0_1 = arith.constant 0 : index
    %c0_2 = arith.constant 0 : index
    %9 = vector.load %arg3[%8, %c0_1, %c0_2] : memref<8x2x16xbf16, #tpu.memory_space<vmem>>, vector<1x2x16xbf16>
    %10 = vector.shape_cast %9 : vector<1x2x16xbf16> to vector<2x16xbf16>
    %cst_3 = arith.constant dense<0.000000e+00> : vector<32x16xf32>
    %11 = tpu.matmul %7, %10, %cst_3 {dimension_numbers = #tpu.dot_dimension_numbers<[1], [0], [0], [1], [0, 0, 1, 1], [], []>} : vector<32x2xbf16>, vector<2x16xbf16>, vector<32x16xf32> -> vector<32x16xf32>
    %12 = arith.addf %2, %11 : vector<32x16xf32>
    %c1_i32 = arith.constant 1 : i32
    %13 = arith.addi %1, %c1_i32 : i32
    %c0_4 = arith.constant 0 : index
    %14 = arith.index_cast %13 : i32 to index
    %c0_5 = arith.constant 0 : index
    %15 = vector.load %arg2[%c0_4, %14, %c0_5] : memref<1x39x2xf32, #tpu.memory_space<vmem>>, vector<1x32x2xf32>
    %16 = vector.shape_cast %15 : vector<1x32x2xf32> to vector<32x2xf32>
    %17 = arith.truncf %16 : vector<32x2xf32> to vector<32x2xbf16>
    %18 = arith.index_cast %c1_i32 : i32 to index
    %c0_6 = arith.constant 0 : index
    %c0_7 = arith.constant 0 : index
    %19 = vector.load %arg3[%18, %c0_6, %c0_7] : memref<8x2x16xbf16, #tpu.memory_space<vmem>>, vector<1x2x16xbf16>
    %20 = vector.shape_cast %19 : vector<1x2x16xbf16> to vector<2x16xbf16>
    %cst_8 = arith.constant dense<0.000000e+00> : vector<32x16xf32>
    %21 = tpu.matmul %17, %20, %cst_8 {dimension_numbers = #tpu.dot_dimension_numbers<[1], [0], [0], [1], [0, 0, 1, 1], [], []>} : vector<32x2xbf16>, vector<2x16xbf16>, vector<32x16xf32> -> vector<32x16xf32>
    %22 = arith.addf %12, %21 : vector<32x16xf32>
    %c2_i32 = arith.constant 2 : i32
    %23 = arith.addi %1, %c2_i32 : i32
    %c0_9 = arith.constant 0 : index
    %24 = arith.index_cast %23 : i32 to index
    %c0_10 = arith.constant 0 : index
    %25 = vector.load %arg2[%c0_9, %24, %c0_10] : memref<1x39x2xf32, #tpu.memory_space<vmem>>, vector<1x32x2xf32>
    %26 = vector.shape_cast %25 : vector<1x32x2xf32> to vector<32x2xf32>
    %27 = arith.truncf %26 : vector<32x2xf32> to vector<32x2xbf16>
    %28 = arith.index_cast %c2_i32 : i32 to index
    %c0_11 = arith.constant 0 : index
    %c0_12 = arith.constant 0 : index
    %29 = vector.load %arg3[%28, %c0_11, %c0_12] : memref<8x2x16xbf16, #tpu.memory_space<vmem>>, vector<1x2x16xbf16>
    %30 = vector.shape_cast %29 : vector<1x2x16xbf16> to vector<2x16xbf16>
    %cst_13 = arith.constant dense<0.000000e+00> : vector<32x16xf32>
    %31 = tpu.matmul %27, %30, %cst_13 {dimension_numbers = #tpu.dot_dimension_numbers<[1], [0], [0], [1], [0, 0, 1, 1], [], []>} : vector<32x2xbf16>, vector<2x16xbf16>, vector<32x16xf32> -> vector<32x16xf32>
    %32 = arith.addf %22, %31 : vector<32x16xf32>
    %c3_i32 = arith.constant 3 : i32
    %33 = arith.addi %1, %c3_i32 : i32
    %c0_14 = arith.constant 0 : index
    %34 = arith.index_cast %33 : i32 to index
    %c0_15 = arith.constant 0 : index
    %35 = vector.load %arg2[%c0_14, %34, %c0_15] : memref<1x39x2xf32, #tpu.memory_space<vmem>>, vector<1x32x2xf32>
    %36 = vector.shape_cast %35 : vector<1x32x2xf32> to vector<32x2xf32>
    %37 = arith.truncf %36 : vector<32x2xf32> to vector<32x2xbf16>
    %38 = arith.index_cast %c3_i32 : i32 to index
    %c0_16 = arith.constant 0 : index
    %c0_17 = arith.constant 0 : index
    %39 = vector.load %arg3[%38, %c0_16, %c0_17] : memref<8x2x16xbf16, #tpu.memory_space<vmem>>, vector<1x2x16xbf16>
    %40 = vector.shape_cast %39 : vector<1x2x16xbf16> to vector<2x16xbf16>
    %cst_18 = arith.constant dense<0.000000e+00> : vector<32x16xf32>
    %41 = tpu.matmul %37, %40, %cst_18 {dimension_numbers = #tpu.dot_dimension_numbers<[1], [0], [0], [1], [0, 0, 1, 1], [], []>} : vector<32x2xbf16>, vector<2x16xbf16>, vector<32x16xf32> -> vector<32x16xf32>
    %42 = arith.addf %32, %41 : vector<32x16xf32>
    %c4_i32 = arith.constant 4 : i32
    %43 = arith.addi %1, %c4_i32 : i32
    %c0_19 = arith.constant 0 : index
    %44 = arith.index_cast %43 : i32 to index
    %c0_20 = arith.constant 0 : index
    %45 = vector.load %arg2[%c0_19, %44, %c0_20] : memref<1x39x2xf32, #tpu.memory_space<vmem>>, vector<1x32x2xf32>
    %46 = vector.shape_cast %45 : vector<1x32x2xf32> to vector<32x2xf32>
    %47 = arith.truncf %46 : vector<32x2xf32> to vector<32x2xbf16>
    %48 = arith.index_cast %c4_i32 : i32 to index
    %c0_21 = arith.constant 0 : index
    %c0_22 = arith.constant 0 : index
    %49 = vector.load %arg3[%48, %c0_21, %c0_22] : memref<8x2x16xbf16, #tpu.memory_space<vmem>>, vector<1x2x16xbf16>
    %50 = vector.shape_cast %49 : vector<1x2x16xbf16> to vector<2x16xbf16>
    %cst_23 = arith.constant dense<0.000000e+00> : vector<32x16xf32>
    %51 = tpu.matmul %47, %50, %cst_23 {dimension_numbers = #tpu.dot_dimension_numbers<[1], [0], [0], [1], [0, 0, 1, 1], [], []>} : vector<32x2xbf16>, vector<2x16xbf16>, vector<32x16xf32> -> vector<32x16xf32>
    %52 = arith.addf %42, %51 : vector<32x16xf32>
    %c5_i32 = arith.constant 5 : i32
    %53 = arith.addi %1, %c5_i32 : i32
    %c0_24 = arith.constant 0 : index
    %54 = arith.index_cast %53 : i32 to index
    %c0_25 = arith.constant 0 : index
    %55 = vector.load %arg2[%c0_24, %54, %c0_25] : memref<1x39x2xf32, #tpu.memory_space<vmem>>, vector<1x32x2xf32>
    %56 = vector.shape_cast %55 : vector<1x32x2xf32> to vector<32x2xf32>
    %57 = arith.truncf %56 : vector<32x2xf32> to vector<32x2xbf16>
    %58 = arith.index_cast %c5_i32 : i32 to index
    %c0_26 = arith.constant 0 : index
    %c0_27 = arith.constant 0 : index
    %59 = vector.load %arg3[%58, %c0_26, %c0_27] : memref<8x2x16xbf16, #tpu.memory_space<vmem>>, vector<1x2x16xbf16>
    %60 = vector.shape_cast %59 : vector<1x2x16xbf16> to vector<2x16xbf16>
    %cst_28 = arith.constant dense<0.000000e+00> : vector<32x16xf32>
    %61 = tpu.matmul %57, %60, %cst_28 {dimension_numbers = #tpu.dot_dimension_numbers<[1], [0], [0], [1], [0, 0, 1, 1], [], []>} : vector<32x2xbf16>, vector<2x16xbf16>, vector<32x16xf32> -> vector<32x16xf32>
    %62 = arith.addf %52, %61 : vector<32x16xf32>
    %c6_i32 = arith.constant 6 : i32
    %63 = arith.addi %1, %c6_i32 : i32
    %c0_29 = arith.constant 0 : index
    %64 = arith.index_cast %63 : i32 to index
    %c0_30 = arith.constant 0 : index
    %65 = vector.load %arg2[%c0_29, %64, %c0_30] : memref<1x39x2xf32, #tpu.memory_space<vmem>>, vector<1x32x2xf32>
    %66 = vector.shape_cast %65 : vector<1x32x2xf32> to vector<32x2xf32>
    %67 = arith.truncf %66 : vector<32x2xf32> to vector<32x2xbf16>
    %68 = arith.index_cast %c6_i32 : i32 to index
    %c0_31 = arith.constant 0 : index
    %c0_32 = arith.constant 0 : index
    %69 = vector.load %arg3[%68, %c0_31, %c0_32] : memref<8x2x16xbf16, #tpu.memory_space<vmem>>, vector<1x2x16xbf16>
    %70 = vector.shape_cast %69 : vector<1x2x16xbf16> to vector<2x16xbf16>
    %cst_33 = arith.constant dense<0.000000e+00> : vector<32x16xf32>
    %71 = tpu.matmul %67, %70, %cst_33 {dimension_numbers = #tpu.dot_dimension_numbers<[1], [0], [0], [1], [0, 0, 1, 1], [], []>} : vector<32x2xbf16>, vector<2x16xbf16>, vector<32x16xf32> -> vector<32x16xf32>
    %72 = arith.addf %62, %71 : vector<32x16xf32>
    %c7_i32 = arith.constant 7 : i32
    %73 = arith.addi %1, %c7_i32 : i32
    %c0_34 = arith.constant 0 : index
    %74 = arith.index_cast %73 : i32 to index
    %c0_35 = arith.constant 0 : index
    %75 = vector.load %arg2[%c0_34, %74, %c0_35] : memref<1x39x2xf32, #tpu.memory_space<vmem>>, vector<1x32x2xf32>
    %76 = vector.shape_cast %75 : vector<1x32x2xf32> to vector<32x2xf32>
    %77 = arith.truncf %76 : vector<32x2xf32> to vector<32x2xbf16>
    %78 = arith.index_cast %c7_i32 : i32 to index
    %c0_36 = arith.constant 0 : index
    %c0_37 = arith.constant 0 : index
    %79 = vector.load %arg3[%78, %c0_36, %c0_37] : memref<8x2x16xbf16, #tpu.memory_space<vmem>>, vector<1x2x16xbf16>
    %80 = vector.shape_cast %79 : vector<1x2x16xbf16> to vector<2x16xbf16>
    %cst_38 = arith.constant dense<0.000000e+00> : vector<32x16xf32>
    %81 = tpu.matmul %77, %80, %cst_38 {dimension_numbers = #tpu.dot_dimension_numbers<[1], [0], [0], [1], [0, 0, 1, 1], [], []>} : vector<32x2xbf16>, vector<2x16xbf16>, vector<32x16xf32> -> vector<32x16xf32>
    %82 = arith.addf %72, %81 : vector<32x16xf32>
    %c8_i32 = arith.constant 8 : i32
    %c0_39 = arith.constant 0 : index
    %c0_40 = arith.constant 0 : index
    %83 = vector.load %arg4[%c0_39, %c0_40] : memref<1x16xf32, #tpu.memory_space<vmem>>, vector<1x16xf32>
    %84 = vector.broadcast %83 : vector<1x16xf32> to vector<32x16xf32>
    %85 = arith.mulf %82, %84 : vector<32x16xf32>
    %c0_41 = arith.constant 0 : index
    %c0_42 = arith.constant 0 : index
    %86 = vector.load %arg5[%c0_41, %c0_42] : memref<1x16xf32, #tpu.memory_space<vmem>>, vector<1x16xf32>
    %87 = vector.broadcast %86 : vector<1x16xf32> to vector<32x16xf32>
    %88 = arith.addf %85, %87 : vector<32x16xf32>
    %cst_43 = arith.constant 0.000000e+00 : f32
    %89 = vector.broadcast %cst_43 : f32 to vector<32x16xf32>
    %90 = arith.maximumf %88, %89 : vector<32x16xf32>
    %c0_44 = arith.constant 0 : index
    %c0_45 = arith.constant 0 : index
    %c0_46 = arith.constant 0 : index
    %91 = vector.load %arg6[%c0_44, %c0_45, %c0_46] : memref<1x32x16xf32, #tpu.memory_space<vmem>>, vector<1x32x16xf32>
    %92 = vector.shape_cast %91 : vector<1x32x16xf32> to vector<32x16xf32>
    %93 = vector.shape_cast %90 : vector<32x16xf32> to vector<1x32x16xf32>
    tpu.vector_store %arg6[%c0_44, %c0_45, %c0_46], %93 {strides = array<i32>} : memref<1x32x16xf32, #tpu.memory_space<vmem>>, vector<1x32x16xf32>,
    return
  }
  func.func @transform_0(%arg0: i32, %arg1: i32) -> (i32, i32, i32) {
    %c0_i32 = arith.constant 0 : i32
    %c0_i32_0 = arith.constant 0 : i32
    %c0_i32_1 = arith.constant 0 : i32
    return %arg0, %c0_i32, %c0_i32_0 : i32, i32, i32
  }
  func.func @transform_1(%arg0: i32, %arg1: i32) -> (i32, i32, i32) {
    %c0_i32 = arith.constant 0 : i32
    %c0_i32_0 = arith.constant 0 : i32
    %c0_i32_1 = arith.constant 0 : i32
    %c0_i32_2 = arith.constant 0 : i32
    return %c0_i32, %c0_i32_0, %c0_i32_1 : i32, i32, i32
  }
  func.func @transform_2(%arg0: i32, %arg1: i32) -> (i32, i32) {
    %c0_i32 = arith.constant 0 : i32
    %c0_i32_0 = arith.constant 0 : i32
    %c0_i32_1 = arith.constant 0 : i32
    return %c0_i32, %c0_i32_0 : i32, i32
  }
  func.func @transform_3(%arg0: i32, %arg1: i32) -> (i32, i32) {
    %c0_i32 = arith.constant 0 : i32
    %c0_i32_0 = arith.constant 0 : i32
    %c0_i32_1 = arith.constant 0 : i32
    return %c0_i32, %c0_i32_0 : i32, i32
  }
  func.func @transform_4(%arg0: i32, %arg1: i32) -> (i32, i32, i32) {
    %c0_i32 = arith.constant 0 : i32
    %c0_i32_0 = arith.constant 0 : i32
    return %arg0, %arg1, %c0_i32 : i32, i32, i32
  }
}

module attributes {stable_mosaic.version = 11 : i64} {
  func.func @_conv_s1_kernel(%arg0: i32, %arg1: i32, %arg2: memref<1x31x32xf32, #tpu.memory_space<vmem>>, %arg3: memref<16x32x8xbf16, #tpu.memory_space<vmem>>, %arg4: memref<1x8xf32, #tpu.memory_space<vmem>>, %arg5: memref<1x8xf32, #tpu.memory_space<vmem>>, %arg6: memref<1x16x8xf32, #tpu.memory_space<vmem>>) attributes {dimension_semantics = [#tpu.dimension_semantics<parallel>, #tpu.dimension_semantics<parallel>], iteration_bounds = array<i64: 2, 1>, scalar_prefetch = 0 : i64, scratch_operands = 0 : i64, tpu.core_type = #tpu.core_type<tc>, window_params = [{transform_indices = @transform_0, window_bounds = array<i64: 1, 31, 32>}, {pipeline_mode = #tpu.pipeline_mode<synchronous>, transform_indices = @transform_1, window_bounds = array<i64: 16, 32, 8>}, {pipeline_mode = #tpu.pipeline_mode<synchronous>, transform_indices = @transform_2, window_bounds = array<i64: 1, 8>}, {pipeline_mode = #tpu.pipeline_mode<synchronous>, transform_indices = @transform_3, window_bounds = array<i64: 1, 8>}, {transform_indices = @transform_4, window_bounds = array<i64: 1, 16, 8>}]} {
    %c16_i32 = arith.constant 16 : i32
    %0 = arith.muli %arg1, %c16_i32 : i32
    %1 = tpu.assume_multiple %0, 8 : i32
    %cst = arith.constant 0.000000e+00 : f32
    %2 = vector.broadcast %cst : f32 to vector<16x8xf32>
    %c0_i32 = arith.constant 0 : i32
    %3 = arith.addi %1, %c0_i32 : i32
    %c0 = arith.constant 0 : index
    %4 = arith.index_cast %3 : i32 to index
    %c0_0 = arith.constant 0 : index
    %5 = vector.load %arg2[%c0, %4, %c0_0] : memref<1x31x32xf32, #tpu.memory_space<vmem>>, vector<1x16x32xf32>
    %6 = vector.shape_cast %5 : vector<1x16x32xf32> to vector<16x32xf32>
    %7 = arith.truncf %6 : vector<16x32xf32> to vector<16x32xbf16>
    %8 = arith.index_cast %c0_i32 : i32 to index
    %c0_1 = arith.constant 0 : index
    %c0_2 = arith.constant 0 : index
    %9 = vector.load %arg3[%8, %c0_1, %c0_2] : memref<16x32x8xbf16, #tpu.memory_space<vmem>>, vector<1x32x8xbf16>
    %10 = vector.shape_cast %9 : vector<1x32x8xbf16> to vector<32x8xbf16>
    %cst_3 = arith.constant dense<0.000000e+00> : vector<16x8xf32>
    %11 = tpu.matmul %7, %10, %cst_3 {dimension_numbers = #tpu.dot_dimension_numbers<[1], [0], [0], [1], [0, 0, 1, 1], [], []>} : vector<16x32xbf16>, vector<32x8xbf16>, vector<16x8xf32> -> vector<16x8xf32>
    %12 = arith.addf %2, %11 : vector<16x8xf32>
    %c1_i32 = arith.constant 1 : i32
    %13 = arith.addi %1, %c1_i32 : i32
    %c0_4 = arith.constant 0 : index
    %14 = arith.index_cast %13 : i32 to index
    %c0_5 = arith.constant 0 : index
    %15 = vector.load %arg2[%c0_4, %14, %c0_5] : memref<1x31x32xf32, #tpu.memory_space<vmem>>, vector<1x16x32xf32>
    %16 = vector.shape_cast %15 : vector<1x16x32xf32> to vector<16x32xf32>
    %17 = arith.truncf %16 : vector<16x32xf32> to vector<16x32xbf16>
    %18 = arith.index_cast %c1_i32 : i32 to index
    %c0_6 = arith.constant 0 : index
    %c0_7 = arith.constant 0 : index
    %19 = vector.load %arg3[%18, %c0_6, %c0_7] : memref<16x32x8xbf16, #tpu.memory_space<vmem>>, vector<1x32x8xbf16>
    %20 = vector.shape_cast %19 : vector<1x32x8xbf16> to vector<32x8xbf16>
    %cst_8 = arith.constant dense<0.000000e+00> : vector<16x8xf32>
    %21 = tpu.matmul %17, %20, %cst_8 {dimension_numbers = #tpu.dot_dimension_numbers<[1], [0], [0], [1], [0, 0, 1, 1], [], []>} : vector<16x32xbf16>, vector<32x8xbf16>, vector<16x8xf32> -> vector<16x8xf32>
    %22 = arith.addf %12, %21 : vector<16x8xf32>
    %c2_i32 = arith.constant 2 : i32
    %23 = arith.addi %1, %c2_i32 : i32
    %c0_9 = arith.constant 0 : index
    %24 = arith.index_cast %23 : i32 to index
    %c0_10 = arith.constant 0 : index
    %25 = vector.load %arg2[%c0_9, %24, %c0_10] : memref<1x31x32xf32, #tpu.memory_space<vmem>>, vector<1x16x32xf32>
    %26 = vector.shape_cast %25 : vector<1x16x32xf32> to vector<16x32xf32>
    %27 = arith.truncf %26 : vector<16x32xf32> to vector<16x32xbf16>
    %28 = arith.index_cast %c2_i32 : i32 to index
    %c0_11 = arith.constant 0 : index
    %c0_12 = arith.constant 0 : index
    %29 = vector.load %arg3[%28, %c0_11, %c0_12] : memref<16x32x8xbf16, #tpu.memory_space<vmem>>, vector<1x32x8xbf16>
    %30 = vector.shape_cast %29 : vector<1x32x8xbf16> to vector<32x8xbf16>
    %cst_13 = arith.constant dense<0.000000e+00> : vector<16x8xf32>
    %31 = tpu.matmul %27, %30, %cst_13 {dimension_numbers = #tpu.dot_dimension_numbers<[1], [0], [0], [1], [0, 0, 1, 1], [], []>} : vector<16x32xbf16>, vector<32x8xbf16>, vector<16x8xf32> -> vector<16x8xf32>
    %32 = arith.addf %22, %31 : vector<16x8xf32>
    %c3_i32 = arith.constant 3 : i32
    %33 = arith.addi %1, %c3_i32 : i32
    %c0_14 = arith.constant 0 : index
    %34 = arith.index_cast %33 : i32 to index
    %c0_15 = arith.constant 0 : index
    %35 = vector.load %arg2[%c0_14, %34, %c0_15] : memref<1x31x32xf32, #tpu.memory_space<vmem>>, vector<1x16x32xf32>
    %36 = vector.shape_cast %35 : vector<1x16x32xf32> to vector<16x32xf32>
    %37 = arith.truncf %36 : vector<16x32xf32> to vector<16x32xbf16>
    %38 = arith.index_cast %c3_i32 : i32 to index
    %c0_16 = arith.constant 0 : index
    %c0_17 = arith.constant 0 : index
    %39 = vector.load %arg3[%38, %c0_16, %c0_17] : memref<16x32x8xbf16, #tpu.memory_space<vmem>>, vector<1x32x8xbf16>
    %40 = vector.shape_cast %39 : vector<1x32x8xbf16> to vector<32x8xbf16>
    %cst_18 = arith.constant dense<0.000000e+00> : vector<16x8xf32>
    %41 = tpu.matmul %37, %40, %cst_18 {dimension_numbers = #tpu.dot_dimension_numbers<[1], [0], [0], [1], [0, 0, 1, 1], [], []>} : vector<16x32xbf16>, vector<32x8xbf16>, vector<16x8xf32> -> vector<16x8xf32>
    %42 = arith.addf %32, %41 : vector<16x8xf32>
    %c4_i32 = arith.constant 4 : i32
    %43 = arith.addi %1, %c4_i32 : i32
    %c0_19 = arith.constant 0 : index
    %44 = arith.index_cast %43 : i32 to index
    %c0_20 = arith.constant 0 : index
    %45 = vector.load %arg2[%c0_19, %44, %c0_20] : memref<1x31x32xf32, #tpu.memory_space<vmem>>, vector<1x16x32xf32>
    %46 = vector.shape_cast %45 : vector<1x16x32xf32> to vector<16x32xf32>
    %47 = arith.truncf %46 : vector<16x32xf32> to vector<16x32xbf16>
    %48 = arith.index_cast %c4_i32 : i32 to index
    %c0_21 = arith.constant 0 : index
    %c0_22 = arith.constant 0 : index
    %49 = vector.load %arg3[%48, %c0_21, %c0_22] : memref<16x32x8xbf16, #tpu.memory_space<vmem>>, vector<1x32x8xbf16>
    %50 = vector.shape_cast %49 : vector<1x32x8xbf16> to vector<32x8xbf16>
    %cst_23 = arith.constant dense<0.000000e+00> : vector<16x8xf32>
    %51 = tpu.matmul %47, %50, %cst_23 {dimension_numbers = #tpu.dot_dimension_numbers<[1], [0], [0], [1], [0, 0, 1, 1], [], []>} : vector<16x32xbf16>, vector<32x8xbf16>, vector<16x8xf32> -> vector<16x8xf32>
    %52 = arith.addf %42, %51 : vector<16x8xf32>
    %c5_i32 = arith.constant 5 : i32
    %53 = arith.addi %1, %c5_i32 : i32
    %c0_24 = arith.constant 0 : index
    %54 = arith.index_cast %53 : i32 to index
    %c0_25 = arith.constant 0 : index
    %55 = vector.load %arg2[%c0_24, %54, %c0_25] : memref<1x31x32xf32, #tpu.memory_space<vmem>>, vector<1x16x32xf32>
    %56 = vector.shape_cast %55 : vector<1x16x32xf32> to vector<16x32xf32>
    %57 = arith.truncf %56 : vector<16x32xf32> to vector<16x32xbf16>
    %58 = arith.index_cast %c5_i32 : i32 to index
    %c0_26 = arith.constant 0 : index
    %c0_27 = arith.constant 0 : index
    %59 = vector.load %arg3[%58, %c0_26, %c0_27] : memref<16x32x8xbf16, #tpu.memory_space<vmem>>, vector<1x32x8xbf16>
    %60 = vector.shape_cast %59 : vector<1x32x8xbf16> to vector<32x8xbf16>
    %cst_28 = arith.constant dense<0.000000e+00> : vector<16x8xf32>
    %61 = tpu.matmul %57, %60, %cst_28 {dimension_numbers = #tpu.dot_dimension_numbers<[1], [0], [0], [1], [0, 0, 1, 1], [], []>} : vector<16x32xbf16>, vector<32x8xbf16>, vector<16x8xf32> -> vector<16x8xf32>
    %62 = arith.addf %52, %61 : vector<16x8xf32>
    %c6_i32 = arith.constant 6 : i32
    %63 = arith.addi %1, %c6_i32 : i32
    %c0_29 = arith.constant 0 : index
    %64 = arith.index_cast %63 : i32 to index
    %c0_30 = arith.constant 0 : index
    %65 = vector.load %arg2[%c0_29, %64, %c0_30] : memref<1x31x32xf32, #tpu.memory_space<vmem>>, vector<1x16x32xf32>
    %66 = vector.shape_cast %65 : vector<1x16x32xf32> to vector<16x32xf32>
    %67 = arith.truncf %66 : vector<16x32xf32> to vector<16x32xbf16>
    %68 = arith.index_cast %c6_i32 : i32 to index
    %c0_31 = arith.constant 0 : index
    %c0_32 = arith.constant 0 : index
    %69 = vector.load %arg3[%68, %c0_31, %c0_32] : memref<16x32x8xbf16, #tpu.memory_space<vmem>>, vector<1x32x8xbf16>
    %70 = vector.shape_cast %69 : vector<1x32x8xbf16> to vector<32x8xbf16>
    %cst_33 = arith.constant dense<0.000000e+00> : vector<16x8xf32>
    %71 = tpu.matmul %67, %70, %cst_33 {dimension_numbers = #tpu.dot_dimension_numbers<[1], [0], [0], [1], [0, 0, 1, 1], [], []>} : vector<16x32xbf16>, vector<32x8xbf16>, vector<16x8xf32> -> vector<16x8xf32>
    %72 = arith.addf %62, %71 : vector<16x8xf32>
    %c7_i32 = arith.constant 7 : i32
    %73 = arith.addi %1, %c7_i32 : i32
    %c0_34 = arith.constant 0 : index
    %74 = arith.index_cast %73 : i32 to index
    %c0_35 = arith.constant 0 : index
    %75 = vector.load %arg2[%c0_34, %74, %c0_35] : memref<1x31x32xf32, #tpu.memory_space<vmem>>, vector<1x16x32xf32>
    %76 = vector.shape_cast %75 : vector<1x16x32xf32> to vector<16x32xf32>
    %77 = arith.truncf %76 : vector<16x32xf32> to vector<16x32xbf16>
    %78 = arith.index_cast %c7_i32 : i32 to index
    %c0_36 = arith.constant 0 : index
    %c0_37 = arith.constant 0 : index
    %79 = vector.load %arg3[%78, %c0_36, %c0_37] : memref<16x32x8xbf16, #tpu.memory_space<vmem>>, vector<1x32x8xbf16>
    %80 = vector.shape_cast %79 : vector<1x32x8xbf16> to vector<32x8xbf16>
    %cst_38 = arith.constant dense<0.000000e+00> : vector<16x8xf32>
    %81 = tpu.matmul %77, %80, %cst_38 {dimension_numbers = #tpu.dot_dimension_numbers<[1], [0], [0], [1], [0, 0, 1, 1], [], []>} : vector<16x32xbf16>, vector<32x8xbf16>, vector<16x8xf32> -> vector<16x8xf32>
    %82 = arith.addf %72, %81 : vector<16x8xf32>
    %c8_i32 = arith.constant 8 : i32
    %83 = arith.addi %1, %c8_i32 : i32
    %c0_39 = arith.constant 0 : index
    %84 = arith.index_cast %83 : i32 to index
    %c0_40 = arith.constant 0 : index
    %85 = vector.load %arg2[%c0_39, %84, %c0_40] : memref<1x31x32xf32, #tpu.memory_space<vmem>>, vector<1x16x32xf32>
    %86 = vector.shape_cast %85 : vector<1x16x32xf32> to vector<16x32xf32>
    %87 = arith.truncf %86 : vector<16x32xf32> to vector<16x32xbf16>
    %88 = arith.index_cast %c8_i32 : i32 to index
    %c0_41 = arith.constant 0 : index
    %c0_42 = arith.constant 0 : index
    %89 = vector.load %arg3[%88, %c0_41, %c0_42] : memref<16x32x8xbf16, #tpu.memory_space<vmem>>, vector<1x32x8xbf16>
    %90 = vector.shape_cast %89 : vector<1x32x8xbf16> to vector<32x8xbf16>
    %cst_43 = arith.constant dense<0.000000e+00> : vector<16x8xf32>
    %91 = tpu.matmul %87, %90, %cst_43 {dimension_numbers = #tpu.dot_dimension_numbers<[1], [0], [0], [1], [0, 0, 1, 1], [], []>} : vector<16x32xbf16>, vector<32x8xbf16>, vector<16x8xf32> -> vector<16x8xf32>
    %92 = arith.addf %82, %91 : vector<16x8xf32>
    %c9_i32 = arith.constant 9 : i32
    %93 = arith.addi %1, %c9_i32 : i32
    %c0_44 = arith.constant 0 : index
    %94 = arith.index_cast %93 : i32 to index
    %c0_45 = arith.constant 0 : index
    %95 = vector.load %arg2[%c0_44, %94, %c0_45] : memref<1x31x32xf32, #tpu.memory_space<vmem>>, vector<1x16x32xf32>
    %96 = vector.shape_cast %95 : vector<1x16x32xf32> to vector<16x32xf32>
    %97 = arith.truncf %96 : vector<16x32xf32> to vector<16x32xbf16>
    %98 = arith.index_cast %c9_i32 : i32 to index
    %c0_46 = arith.constant 0 : index
    %c0_47 = arith.constant 0 : index
    %99 = vector.load %arg3[%98, %c0_46, %c0_47] : memref<16x32x8xbf16, #tpu.memory_space<vmem>>, vector<1x32x8xbf16>
    %100 = vector.shape_cast %99 : vector<1x32x8xbf16> to vector<32x8xbf16>
    %cst_48 = arith.constant dense<0.000000e+00> : vector<16x8xf32>
    %101 = tpu.matmul %97, %100, %cst_48 {dimension_numbers = #tpu.dot_dimension_numbers<[1], [0], [0], [1], [0, 0, 1, 1], [], []>} : vector<16x32xbf16>, vector<32x8xbf16>, vector<16x8xf32> -> vector<16x8xf32>
    %102 = arith.addf %92, %101 : vector<16x8xf32>
    %c10_i32 = arith.constant 10 : i32
    %103 = arith.addi %1, %c10_i32 : i32
    %c0_49 = arith.constant 0 : index
    %104 = arith.index_cast %103 : i32 to index
    %c0_50 = arith.constant 0 : index
    %105 = vector.load %arg2[%c0_49, %104, %c0_50] : memref<1x31x32xf32, #tpu.memory_space<vmem>>, vector<1x16x32xf32>
    %106 = vector.shape_cast %105 : vector<1x16x32xf32> to vector<16x32xf32>
    %107 = arith.truncf %106 : vector<16x32xf32> to vector<16x32xbf16>
    %108 = arith.index_cast %c10_i32 : i32 to index
    %c0_51 = arith.constant 0 : index
    %c0_52 = arith.constant 0 : index
    %109 = vector.load %arg3[%108, %c0_51, %c0_52] : memref<16x32x8xbf16, #tpu.memory_space<vmem>>, vector<1x32x8xbf16>
    %110 = vector.shape_cast %109 : vector<1x32x8xbf16> to vector<32x8xbf16>
    %cst_53 = arith.constant dense<0.000000e+00> : vector<16x8xf32>
    %111 = tpu.matmul %107, %110, %cst_53 {dimension_numbers = #tpu.dot_dimension_numbers<[1], [0], [0], [1], [0, 0, 1, 1], [], []>} : vector<16x32xbf16>, vector<32x8xbf16>, vector<16x8xf32> -> vector<16x8xf32>
    %112 = arith.addf %102, %111 : vector<16x8xf32>
    %c11_i32 = arith.constant 11 : i32
    %113 = arith.addi %1, %c11_i32 : i32
    %c0_54 = arith.constant 0 : index
    %114 = arith.index_cast %113 : i32 to index
    %c0_55 = arith.constant 0 : index
    %115 = vector.load %arg2[%c0_54, %114, %c0_55] : memref<1x31x32xf32, #tpu.memory_space<vmem>>, vector<1x16x32xf32>
    %116 = vector.shape_cast %115 : vector<1x16x32xf32> to vector<16x32xf32>
    %117 = arith.truncf %116 : vector<16x32xf32> to vector<16x32xbf16>
    %118 = arith.index_cast %c11_i32 : i32 to index
    %c0_56 = arith.constant 0 : index
    %c0_57 = arith.constant 0 : index
    %119 = vector.load %arg3[%118, %c0_56, %c0_57] : memref<16x32x8xbf16, #tpu.memory_space<vmem>>, vector<1x32x8xbf16>
    %120 = vector.shape_cast %119 : vector<1x32x8xbf16> to vector<32x8xbf16>
    %cst_58 = arith.constant dense<0.000000e+00> : vector<16x8xf32>
    %121 = tpu.matmul %117, %120, %cst_58 {dimension_numbers = #tpu.dot_dimension_numbers<[1], [0], [0], [1], [0, 0, 1, 1], [], []>} : vector<16x32xbf16>, vector<32x8xbf16>, vector<16x8xf32> -> vector<16x8xf32>
    %122 = arith.addf %112, %121 : vector<16x8xf32>
    %c12_i32 = arith.constant 12 : i32
    %123 = arith.addi %1, %c12_i32 : i32
    %c0_59 = arith.constant 0 : index
    %124 = arith.index_cast %123 : i32 to index
    %c0_60 = arith.constant 0 : index
    %125 = vector.load %arg2[%c0_59, %124, %c0_60] : memref<1x31x32xf32, #tpu.memory_space<vmem>>, vector<1x16x32xf32>
    %126 = vector.shape_cast %125 : vector<1x16x32xf32> to vector<16x32xf32>
    %127 = arith.truncf %126 : vector<16x32xf32> to vector<16x32xbf16>
    %128 = arith.index_cast %c12_i32 : i32 to index
    %c0_61 = arith.constant 0 : index
    %c0_62 = arith.constant 0 : index
    %129 = vector.load %arg3[%128, %c0_61, %c0_62] : memref<16x32x8xbf16, #tpu.memory_space<vmem>>, vector<1x32x8xbf16>
    %130 = vector.shape_cast %129 : vector<1x32x8xbf16> to vector<32x8xbf16>
    %cst_63 = arith.constant dense<0.000000e+00> : vector<16x8xf32>
    %131 = tpu.matmul %127, %130, %cst_63 {dimension_numbers = #tpu.dot_dimension_numbers<[1], [0], [0], [1], [0, 0, 1, 1], [], []>} : vector<16x32xbf16>, vector<32x8xbf16>, vector<16x8xf32> -> vector<16x8xf32>
    %132 = arith.addf %122, %131 : vector<16x8xf32>
    %c13_i32 = arith.constant 13 : i32
    %133 = arith.addi %1, %c13_i32 : i32
    %c0_64 = arith.constant 0 : index
    %134 = arith.index_cast %133 : i32 to index
    %c0_65 = arith.constant 0 : index
    %135 = vector.load %arg2[%c0_64, %134, %c0_65] : memref<1x31x32xf32, #tpu.memory_space<vmem>>, vector<1x16x32xf32>
    %136 = vector.shape_cast %135 : vector<1x16x32xf32> to vector<16x32xf32>
    %137 = arith.truncf %136 : vector<16x32xf32> to vector<16x32xbf16>
    %138 = arith.index_cast %c13_i32 : i32 to index
    %c0_66 = arith.constant 0 : index
    %c0_67 = arith.constant 0 : index
    %139 = vector.load %arg3[%138, %c0_66, %c0_67] : memref<16x32x8xbf16, #tpu.memory_space<vmem>>, vector<1x32x8xbf16>
    %140 = vector.shape_cast %139 : vector<1x32x8xbf16> to vector<32x8xbf16>
    %cst_68 = arith.constant dense<0.000000e+00> : vector<16x8xf32>
    %141 = tpu.matmul %137, %140, %cst_68 {dimension_numbers = #tpu.dot_dimension_numbers<[1], [0], [0], [1], [0, 0, 1, 1], [], []>} : vector<16x32xbf16>, vector<32x8xbf16>, vector<16x8xf32> -> vector<16x8xf32>
    %142 = arith.addf %132, %141 : vector<16x8xf32>
    %c14_i32 = arith.constant 14 : i32
    %143 = arith.addi %1, %c14_i32 : i32
    %c0_69 = arith.constant 0 : index
    %144 = arith.index_cast %143 : i32 to index
    %c0_70 = arith.constant 0 : index
    %145 = vector.load %arg2[%c0_69, %144, %c0_70] : memref<1x31x32xf32, #tpu.memory_space<vmem>>, vector<1x16x32xf32>
    %146 = vector.shape_cast %145 : vector<1x16x32xf32> to vector<16x32xf32>
    %147 = arith.truncf %146 : vector<16x32xf32> to vector<16x32xbf16>
    %148 = arith.index_cast %c14_i32 : i32 to index
    %c0_71 = arith.constant 0 : index
    %c0_72 = arith.constant 0 : index
    %149 = vector.load %arg3[%148, %c0_71, %c0_72] : memref<16x32x8xbf16, #tpu.memory_space<vmem>>, vector<1x32x8xbf16>
    %150 = vector.shape_cast %149 : vector<1x32x8xbf16> to vector<32x8xbf16>
    %cst_73 = arith.constant dense<0.000000e+00> : vector<16x8xf32>
    %151 = tpu.matmul %147, %150, %cst_73 {dimension_numbers = #tpu.dot_dimension_numbers<[1], [0], [0], [1], [0, 0, 1, 1], [], []>} : vector<16x32xbf16>, vector<32x8xbf16>, vector<16x8xf32> -> vector<16x8xf32>
    %152 = arith.addf %142, %151 : vector<16x8xf32>
    %c15_i32 = arith.constant 15 : i32
    %153 = arith.addi %1, %c15_i32 : i32
    %c0_74 = arith.constant 0 : index
    %154 = arith.index_cast %153 : i32 to index
    %c0_75 = arith.constant 0 : index
    %155 = vector.load %arg2[%c0_74, %154, %c0_75] : memref<1x31x32xf32, #tpu.memory_space<vmem>>, vector<1x16x32xf32>
    %156 = vector.shape_cast %155 : vector<1x16x32xf32> to vector<16x32xf32>
    %157 = arith.truncf %156 : vector<16x32xf32> to vector<16x32xbf16>
    %158 = arith.index_cast %c15_i32 : i32 to index
    %c0_76 = arith.constant 0 : index
    %c0_77 = arith.constant 0 : index
    %159 = vector.load %arg3[%158, %c0_76, %c0_77] : memref<16x32x8xbf16, #tpu.memory_space<vmem>>, vector<1x32x8xbf16>
    %160 = vector.shape_cast %159 : vector<1x32x8xbf16> to vector<32x8xbf16>
    %cst_78 = arith.constant dense<0.000000e+00> : vector<16x8xf32>
    %161 = tpu.matmul %157, %160, %cst_78 {dimension_numbers = #tpu.dot_dimension_numbers<[1], [0], [0], [1], [0, 0, 1, 1], [], []>} : vector<16x32xbf16>, vector<32x8xbf16>, vector<16x8xf32> -> vector<16x8xf32>
    %162 = arith.addf %152, %161 : vector<16x8xf32>
    %c16_i32_79 = arith.constant 16 : i32
    %c0_80 = arith.constant 0 : index
    %c0_81 = arith.constant 0 : index
    %163 = vector.load %arg4[%c0_80, %c0_81] : memref<1x8xf32, #tpu.memory_space<vmem>>, vector<1x8xf32>
    %164 = vector.broadcast %163 : vector<1x8xf32> to vector<16x8xf32>
    %165 = arith.mulf %162, %164 : vector<16x8xf32>
    %c0_82 = arith.constant 0 : index
    %c0_83 = arith.constant 0 : index
    %166 = vector.load %arg5[%c0_82, %c0_83] : memref<1x8xf32, #tpu.memory_space<vmem>>, vector<1x8xf32>
    %167 = vector.broadcast %166 : vector<1x8xf32> to vector<16x8xf32>
    %168 = arith.addf %165, %167 : vector<16x8xf32>
    %cst_84 = arith.constant 0.000000e+00 : f32
    %169 = vector.broadcast %cst_84 : f32 to vector<16x8xf32>
    %170 = arith.maximumf %168, %169 : vector<16x8xf32>
    %c0_85 = arith.constant 0 : index
    %c0_86 = arith.constant 0 : index
    %c0_87 = arith.constant 0 : index
    %171 = vector.load %arg6[%c0_85, %c0_86, %c0_87] : memref<1x16x8xf32, #tpu.memory_space<vmem>>, vector<1x16x8xf32>
    %172 = vector.shape_cast %171 : vector<1x16x8xf32> to vector<16x8xf32>
    %173 = vector.shape_cast %170 : vector<16x8xf32> to vector<1x16x8xf32>
    tpu.vector_store %arg6[%c0_85, %c0_86, %c0_87], %173 {strides = array<i32>} : memref<1x16x8xf32, #tpu.memory_space<vmem>>, vector<1x16x8xf32>,
    return
  }
  func.func @transform_0(%arg0: i32, %arg1: i32) -> (i32, i32, i32) {
    %c0_i32 = arith.constant 0 : i32
    %c0_i32_0 = arith.constant 0 : i32
    %c0_i32_1 = arith.constant 0 : i32
    return %arg0, %c0_i32, %c0_i32_0 : i32, i32, i32
  }
  func.func @transform_1(%arg0: i32, %arg1: i32) -> (i32, i32, i32) {
    %c0_i32 = arith.constant 0 : i32
    %c0_i32_0 = arith.constant 0 : i32
    %c0_i32_1 = arith.constant 0 : i32
    %c0_i32_2 = arith.constant 0 : i32
    return %c0_i32, %c0_i32_0, %c0_i32_1 : i32, i32, i32
  }
  func.func @transform_2(%arg0: i32, %arg1: i32) -> (i32, i32) {
    %c0_i32 = arith.constant 0 : i32
    %c0_i32_0 = arith.constant 0 : i32
    %c0_i32_1 = arith.constant 0 : i32
    return %c0_i32, %c0_i32_0 : i32, i32
  }
  func.func @transform_3(%arg0: i32, %arg1: i32) -> (i32, i32) {
    %c0_i32 = arith.constant 0 : i32
    %c0_i32_0 = arith.constant 0 : i32
    %c0_i32_1 = arith.constant 0 : i32
    return %c0_i32, %c0_i32_0 : i32, i32
  }
  func.func @transform_4(%arg0: i32, %arg1: i32) -> (i32, i32, i32) {
    %c0_i32 = arith.constant 0 : i32
    %c0_i32_0 = arith.constant 0 : i32
    return %arg0, %arg1, %c0_i32 : i32, i32, i32
  }
}

module attributes {stable_mosaic.version = 11 : i64} {
  func.func @_mamba_kernel(%arg0: i32, %arg1: memref<1x2x16x8xf32, #tpu.memory_space<vmem>>, %arg2: memref<1x1x1x8xf32, #tpu.memory_space<vmem>>, %arg3: memref<1x8x32xf32, #tpu.memory_space<vmem>>, %arg4: memref<1x8x32xf32, #tpu.memory_space<vmem>>, %arg5: memref<1x1x1x32xf32, #tpu.memory_space<vmem>>, %arg6: memref<1x1x1x32xf32, #tpu.memory_space<vmem>>, %arg7: memref<1x1x1x32xf32, #tpu.memory_space<vmem>>, %arg8: memref<1x32x32xf32, #tpu.memory_space<vmem>>, %arg9: memref<1x32x8xf32, #tpu.memory_space<vmem>>, %arg10: memref<1x32x8xf32, #tpu.memory_space<vmem>>, %arg11: memref<1x1x1x32xf32, #tpu.memory_space<vmem>>, %arg12: memref<1x8x32xf32, #tpu.memory_space<vmem>>, %arg13: memref<1x1x1x32xf32, #tpu.memory_space<vmem>>, %arg14: memref<1x32x8xf32, #tpu.memory_space<vmem>>, %arg15: memref<1x2x16x8xf32, #tpu.memory_space<vmem>>, %arg16: memref<2x16x32xf32, #tpu.memory_space<vmem>>, %arg17: memref<2x16x32xf32, #tpu.memory_space<vmem>>, %arg18: memref<2x16x32xf32, #tpu.memory_space<vmem>>, %arg19: memref<2x16x8xf32, #tpu.memory_space<vmem>>, %arg20: memref<2x16x8xf32, #tpu.memory_space<vmem>>, %arg21: memref<2x16x32xf32, #tpu.memory_space<vmem>>) attributes {dimension_semantics = [#tpu.dimension_semantics<parallel>], iteration_bounds = array<i64: 2>, scalar_prefetch = 0 : i64, scratch_operands = 6 : i64, tpu.core_type = #tpu.core_type<tc>, window_params = [{transform_indices = @transform_0, window_bounds = array<i64: 1, 2, 16, 8>}, {transform_indices = @transform_1, window_bounds = array<i64: 1, 1, 1, 8>}, {transform_indices = @transform_2, window_bounds = array<i64: 1, 8, 32>}, {transform_indices = @transform_3, window_bounds = array<i64: 1, 8, 32>}, {transform_indices = @transform_4, window_bounds = array<i64: 1, 1, 1, 32>}, {transform_indices = @transform_5, window_bounds = array<i64: 1, 1, 1, 32>}, {transform_indices = @transform_6, window_bounds = array<i64: 1, 1, 1, 32>}, {transform_indices = @transform_7, window_bounds = array<i64: 1, 32, 32>}, {transform_indices = @transform_8, window_bounds = array<i64: 1, 32, 8>}, {transform_indices = @transform_9, window_bounds = array<i64: 1, 32, 8>}, {transform_indices = @transform_10, window_bounds = array<i64: 1, 1, 1, 32>}, {transform_indices = @transform_11, window_bounds = array<i64: 1, 8, 32>}, {transform_indices = @transform_12, window_bounds = array<i64: 1, 1, 1, 32>}, {transform_indices = @transform_13, window_bounds = array<i64: 1, 32, 8>}, {transform_indices = @transform_14, window_bounds = array<i64: 1, 2, 16, 8>}]} {
    %c0 = arith.constant 0 : index
    %c0_0 = arith.constant 0 : index
    %c0_1 = arith.constant 0 : index
    %c0_2 = arith.constant 0 : index
    %0 = vector.load %arg1[%c0, %c0_0, %c0_1, %c0_2] : memref<1x2x16x8xf32, #tpu.memory_space<vmem>>, vector<1x2x16x8xf32>
    %1 = vector.shape_cast %0 : vector<1x2x16x8xf32> to vector<2x16x8xf32>
    %2 = arith.mulf %1, %1 : vector<2x16x8xf32>
    %cst = arith.constant dense<0.000000e+00> : vector<2x16xf32>
    %3 = vector.multi_reduction <add>, %2, %cst [2] : vector<2x16x8xf32> to vector<2x16xf32>
    %4 = vector.shape_cast %3 : vector<2x16xf32> to vector<2x16x1xf32>
    %cst_3 = arith.constant 8.000000e+00 : f32
    %5 = vector.broadcast %cst_3 : f32 to vector<2x16x1xf32>
    %6 = arith.divf %4, %5 : vector<2x16x1xf32>
    %cst_4 = arith.constant 9.99999974E-6 : f32
    %7 = vector.broadcast %cst_4 : f32 to vector<2x16x1xf32>
    %8 = arith.addf %6, %7 : vector<2x16x1xf32>
    %9 = math.rsqrt %8 : vector<2x16x1xf32>
    %10 = vector.broadcast %9 : vector<2x16x1xf32> to vector<2x16x8xf32>
    %11 = arith.mulf %1, %10 : vector<2x16x8xf32>
    %c0_5 = arith.constant 0 : index
    %c0_6 = arith.constant 0 : index
    %c0_7 = arith.constant 0 : index
    %c0_8 = arith.constant 0 : index
    %12 = vector.load %arg2[%c0_5, %c0_6, %c0_7, %c0_8] : memref<1x1x1x8xf32, #tpu.memory_space<vmem>>, vector<1x1x1x8xf32>
    %13 = vector.shape_cast %12 : vector<1x1x1x8xf32> to vector<1x1x8xf32>
    %14 = vector.broadcast %13 : vector<1x1x8xf32> to vector<2x16x8xf32>
    %15 = arith.mulf %11, %14 : vector<2x16x8xf32>
    %16 = vector.shape_cast %15 : vector<2x16x8xf32> to vector<32x8xf32>
    %c0_9 = arith.constant 0 : index
    %c0_10 = arith.constant 0 : index
    %c0_11 = arith.constant 0 : index
    %17 = vector.load %arg3[%c0_9, %c0_10, %c0_11] : memref<1x8x32xf32, #tpu.memory_space<vmem>>, vector<1x8x32xf32>
    %18 = vector.shape_cast %17 : vector<1x8x32xf32> to vector<8x32xf32>
    %cst_12 = arith.constant dense<0.000000e+00> : vector<32x32xf32>
    %19 = tpu.matmul %16, %18, %cst_12 {dimension_numbers = #tpu.dot_dimension_numbers<[1], [0], [0], [1], [0, 0, 1, 1], [], []>} : vector<32x8xf32>, vector<8x32xf32>, vector<32x32xf32> -> vector<32x32xf32>
    %20 = vector.shape_cast %19 : vector<32x32xf32> to vector<2x16x32xf32>
    %c0_13 = arith.constant 0 : index
    %c0_14 = arith.constant 0 : index
    %c0_15 = arith.constant 0 : index
    %21 = vector.load %arg4[%c0_13, %c0_14, %c0_15] : memref<1x8x32xf32, #tpu.memory_space<vmem>>, vector<1x8x32xf32>
    %22 = vector.shape_cast %21 : vector<1x8x32xf32> to vector<8x32xf32>
    %cst_16 = arith.constant dense<0.000000e+00> : vector<32x32xf32>
    %23 = tpu.matmul %16, %22, %cst_16 {dimension_numbers = #tpu.dot_dimension_numbers<[1], [0], [0], [1], [0, 0, 1, 1], [], []>} : vector<32x8xf32>, vector<8x32xf32>, vector<32x32xf32> -> vector<32x32xf32>
    %24 = vector.shape_cast %23 : vector<32x32xf32> to vector<2x16x32xf32>
    %c0_17 = arith.constant 0 : index
    %c0_18 = arith.constant 0 : index
    %c0_19 = arith.constant 0 : index
    %25 = vector.load %arg17[%c0_17, %c0_18, %c0_19] : memref<2x16x32xf32, #tpu.memory_space<vmem>>, vector<2x16x32xf32>
    tpu.vector_store %arg17[%c0_17, %c0_18, %c0_19], %24 {strides = array<i32>} : memref<2x16x32xf32, #tpu.memory_space<vmem>>, vector<2x16x32xf32>,
    %cst_20 = arith.constant 0.000000e+00 : f32
    %26 = vector.broadcast %cst_20 : f32 to vector<2x1x32xf32>
    %c0_21 = arith.constant 0 : index
    %c0_22 = arith.constant 0 : index
    %c0_23 = arith.constant 0 : index
    %27 = vector.load %arg21[%c0_21, %c0_22, %c0_23] : memref<2x16x32xf32, #tpu.memory_space<vmem>>, vector<2x1x32xf32>
    tpu.vector_store %arg21[%c0_21, %c0_22, %c0_23], %26 {strides = array<i32>} : memref<2x16x32xf32, #tpu.memory_space<vmem>>, vector<2x1x32xf32>,
    %28 = vector.extract_strided_slice %20 {offsets = [0, 0, 0], sizes = [2, 15, 32], strides = [1, 1, 1]} : vector<2x16x32xf32> to vector<2x15x32xf32>
    %c0_24 = arith.constant 0 : index
    %c1 = arith.constant 1 : index
    %c0_25 = arith.constant 0 : index
    %29 = vector.load %arg21[%c0_24, %c1, %c0_25] : memref<2x16x32xf32, #tpu.memory_space<vmem>>, vector<2x15x32xf32>
    tpu.vector_store %arg21[%c0_24, %c1, %c0_25], %28 {strides = array<i32>} : memref<2x16x32xf32, #tpu.memory_space<vmem>>, vector<2x15x32xf32>,
    %c0_26 = arith.constant 0 : index
    %c0_27 = arith.constant 0 : index
    %c0_28 = arith.constant 0 : index
    %30 = vector.load %arg21[%c0_26, %c0_27, %c0_28] : memref<2x16x32xf32, #tpu.memory_space<vmem>>, vector<2x16x32xf32>
    %c0_29 = arith.constant 0 : index
    %c0_30 = arith.constant 0 : index
    %c0_31 = arith.constant 0 : index
    %c0_32 = arith.constant 0 : index
    %31 = vector.load %arg5[%c0_29, %c0_30, %c0_31, %c0_32] : memref<1x1x1x32xf32, #tpu.memory_space<vmem>>, vector<1x1x1x32xf32>
    %32 = vector.shape_cast %31 : vector<1x1x1x32xf32> to vector<1x1x32xf32>
    %33 = vector.broadcast %32 : vector<1x1x32xf32> to vector<2x16x32xf32>
    %34 = arith.mulf %30, %33 : vector<2x16x32xf32>
    %c0_33 = arith.constant 0 : index
    %c0_34 = arith.constant 0 : index
    %c0_35 = arith.constant 0 : index
    %c0_36 = arith.constant 0 : index
    %35 = vector.load %arg6[%c0_33, %c0_34, %c0_35, %c0_36] : memref<1x1x1x32xf32, #tpu.memory_space<vmem>>, vector<1x1x1x32xf32>
    %36 = vector.shape_cast %35 : vector<1x1x1x32xf32> to vector<1x1x32xf32>
    %37 = vector.broadcast %36 : vector<1x1x32xf32> to vector<2x16x32xf32>
    %38 = arith.mulf %20, %37 : vector<2x16x32xf32>
    %39 = arith.addf %34, %38 : vector<2x16x32xf32>
    %c0_37 = arith.constant 0 : index
    %c0_38 = arith.constant 0 : index
    %c0_39 = arith.constant 0 : index
    %c0_40 = arith.constant 0 : index
    %40 = vector.load %arg7[%c0_37, %c0_38, %c0_39, %c0_40] : memref<1x1x1x32xf32, #tpu.memory_space<vmem>>, vector<1x1x1x32xf32>
    %41 = vector.shape_cast %40 : vector<1x1x1x32xf32> to vector<1x1x32xf32>
    %42 = vector.broadcast %41 : vector<1x1x32xf32> to vector<2x16x32xf32>
    %43 = arith.addf %39, %42 : vector<2x16x32xf32>
    %cst_41 = arith.constant 0.000000e+00 : f32
    %44 = vector.broadcast %cst_41 : f32 to vector<2x16x32xf32>
    %45 = arith.subf %44, %43 : vector<2x16x32xf32>
    %46 = math.exp %45 : vector<2x16x32xf32>
    %cst_42 = arith.constant 1.000000e+00 : f32
    %47 = vector.broadcast %cst_42 : f32 to vector<2x16x32xf32>
    %48 = arith.addf %47, %46 : vector<2x16x32xf32>
    %cst_43 = arith.constant 1.000000e+00 : f32
    %49 = vector.broadcast %cst_43 : f32 to vector<2x16x32xf32>
    %50 = arith.divf %49, %48 : vector<2x16x32xf32>
    %51 = arith.mulf %43, %50 : vector<2x16x32xf32>
    %c0_44 = arith.constant 0 : index
    %c0_45 = arith.constant 0 : index
    %c0_46 = arith.constant 0 : index
    %52 = vector.load %arg16[%c0_44, %c0_45, %c0_46] : memref<2x16x32xf32, #tpu.memory_space<vmem>>, vector<2x16x32xf32>
    tpu.vector_store %arg16[%c0_44, %c0_45, %c0_46], %51 {strides = array<i32>} : memref<2x16x32xf32, #tpu.memory_space<vmem>>, vector<2x16x32xf32>,
    %53 = vector.shape_cast %51 : vector<2x16x32xf32> to vector<32x32xf32>
    %c0_47 = arith.constant 0 : index
    %c0_48 = arith.constant 0 : index
    %c0_49 = arith.constant 0 : index
    %54 = vector.load %arg8[%c0_47, %c0_48, %c0_49] : memref<1x32x32xf32, #tpu.memory_space<vmem>>, vector<1x32x32xf32>
    %55 = vector.shape_cast %54 : vector<1x32x32xf32> to vector<32x32xf32>
    %cst_50 = arith.constant dense<0.000000e+00> : vector<32x32xf32>
    %56 = tpu.matmul %53, %55, %cst_50 {dimension_numbers = #tpu.dot_dimension_numbers<[1], [0], [0], [1], [0, 0, 1, 1], [], []>} : vector<32x32xf32>, vector<32x32xf32>, vector<32x32xf32> -> vector<32x32xf32>
    %57 = vector.shape_cast %56 : vector<32x32xf32> to vector<2x16x32xf32>
    %c0_51 = arith.constant 0 : index
    %c0_52 = arith.constant 0 : index
    %c0_53 = arith.constant 0 : index
    %c0_54 = arith.constant 0 : index
    %58 = vector.load %arg11[%c0_51, %c0_52, %c0_53, %c0_54] : memref<1x1x1x32xf32, #tpu.memory_space<vmem>>, vector<1x1x1x32xf32>
    %59 = vector.shape_cast %58 : vector<1x1x1x32xf32> to vector<1x1x32xf32>
    %60 = vector.broadcast %59 : vector<1x1x32xf32> to vector<2x16x32xf32>
    %61 = arith.addf %57, %60 : vector<2x16x32xf32>
    %cst_55 = arith.constant 2.000000e+01 : f32
    %62 = vector.broadcast %cst_55 : f32 to vector<2x16x32xf32>
    %63 = arith.cmpf ogt, %61, %62 : vector<2x16x32xf32>
    %cst_56 = arith.constant 2.000000e+01 : f32
    %64 = vector.broadcast %cst_56 : f32 to vector<2x16x32xf32>
    %65 = arith.minimumf %61, %64 : vector<2x16x32xf32>
    %66 = math.exp %65 : vector<2x16x32xf32>
    %67 = math.log1p %66 : vector<2x16x32xf32>
    %68 = arith.select %63, %61, %67 : vector<2x16x32xi1>, vector<2x16x32xf32>
    %c0_57 = arith.constant 0 : index
    %c0_58 = arith.constant 0 : index
    %c0_59 = arith.constant 0 : index
    %69 = vector.load %arg18[%c0_57, %c0_58, %c0_59] : memref<2x16x32xf32, #tpu.memory_space<vmem>>, vector<2x16x32xf32>
    tpu.vector_store %arg18[%c0_57, %c0_58, %c0_59], %68 {strides = array<i32>} : memref<2x16x32xf32, #tpu.memory_space<vmem>>, vector<2x16x32xf32>,
    %c0_60 = arith.constant 0 : index
    %c0_61 = arith.constant 0 : index
    %c0_62 = arith.constant 0 : index
    %70 = vector.load %arg9[%c0_60, %c0_61, %c0_62] : memref<1x32x8xf32, #tpu.memory_space<vmem>>, vector<1x32x8xf32>
    %71 = vector.shape_cast %70 : vector<1x32x8xf32> to vector<32x8xf32>
    %cst_63 = arith.constant dense<0.000000e+00> : vector<32x8xf32>
    %72 = tpu.matmul %53, %71, %cst_63 {dimension_numbers = #tpu.dot_dimension_numbers<[1], [0], [0], [1], [0, 0, 1, 1], [], []>} : vector<32x32xf32>, vector<32x8xf32>, vector<32x8xf32> -> vector<32x8xf32>
    %73 = vector.shape_cast %72 : vector<32x8xf32> to vector<2x16x8xf32>
    %c0_64 = arith.constant 0 : index
    %c0_65 = arith.constant 0 : index
    %c0_66 = arith.constant 0 : index
    %74 = vector.load %arg19[%c0_64, %c0_65, %c0_66] : memref<2x16x8xf32, #tpu.memory_space<vmem>>, vector<2x16x8xf32>
    tpu.vector_store %arg19[%c0_64, %c0_65, %c0_66], %73 {strides = array<i32>} : memref<2x16x8xf32, #tpu.memory_space<vmem>>, vector<2x16x8xf32>,
    %c0_67 = arith.constant 0 : index
    %c0_68 = arith.constant 0 : index
    %c0_69 = arith.constant 0 : index
    %75 = vector.load %arg10[%c0_67, %c0_68, %c0_69] : memref<1x32x8xf32, #tpu.memory_space<vmem>>, vector<1x32x8xf32>
    %76 = vector.shape_cast %75 : vector<1x32x8xf32> to vector<32x8xf32>
    %cst_70 = arith.constant dense<0.000000e+00> : vector<32x8xf32>
    %77 = tpu.matmul %53, %76, %cst_70 {dimension_numbers = #tpu.dot_dimension_numbers<[1], [0], [0], [1], [0, 0, 1, 1], [], []>} : vector<32x32xf32>, vector<32x8xf32>, vector<32x8xf32> -> vector<32x8xf32>
    %78 = vector.shape_cast %77 : vector<32x8xf32> to vector<2x16x8xf32>
    %c0_71 = arith.constant 0 : index
    %c0_72 = arith.constant 0 : index
    %c0_73 = arith.constant 0 : index
    %79 = vector.load %arg20[%c0_71, %c0_72, %c0_73] : memref<2x16x8xf32, #tpu.memory_space<vmem>>, vector<2x16x8xf32>
    tpu.vector_store %arg20[%c0_71, %c0_72, %c0_73], %78 {strides = array<i32>} : memref<2x16x8xf32, #tpu.memory_space<vmem>>, vector<2x16x8xf32>,
    %c0_74 = arith.constant 0 : index
    %c0_75 = arith.constant 0 : index
    %c0_76 = arith.constant 0 : index
    %80 = vector.load %arg12[%c0_74, %c0_75, %c0_76] : memref<1x8x32xf32, #tpu.memory_space<vmem>>, vector<1x8x32xf32>
    %81 = vector.shape_cast %80 : vector<1x8x32xf32> to vector<8x32xf32>
    %cst_77 = arith.constant 0.000000e+00 : f32
    %82 = vector.broadcast %cst_77 : f32 to vector<2x8x32xf32>
    %c0_i32 = arith.constant 0 : i32
    %c16_i32 = arith.constant 16 : i32
    %83 = arith.addi %c0_i32, %c16_i32 : i32
    %c1_i32 = arith.constant 1 : i32
    %84 = scf.for %arg22 = %c0_i32 to %83 step %c1_i32 iter_args(%arg23 = %82) -> (vector<2x8x32xf32>)  : i32 {
      %c0_103 = arith.constant 0 : index
      %110 = arith.index_cast %arg22 : i32 to index
      %c0_104 = arith.constant 0 : index
      %111 = vector.load %arg18[%c0_103, %110, %c0_104] : memref<2x16x32xf32, #tpu.memory_space<vmem>>, vector<2x1x32xf32>
      %c0_105 = arith.constant 0 : index
      %112 = arith.index_cast %arg22 : i32 to index
      %c0_106 = arith.constant 0 : index
      %113 = vector.load %arg16[%c0_105, %112, %c0_106] : memref<2x16x32xf32, #tpu.memory_space<vmem>>, vector<2x1x32xf32>
      %c0_107 = arith.constant 0 : index
      %114 = arith.index_cast %arg22 : i32 to index
      %c0_108 = arith.constant 0 : index
      %115 = vector.load %arg19[%c0_107, %114, %c0_108] : memref<2x16x8xf32, #tpu.memory_space<vmem>>, vector<2x1x8xf32>
      %c0_109 = arith.constant 0 : index
      %116 = arith.index_cast %arg22 : i32 to index
      %c0_110 = arith.constant 0 : index
      %117 = vector.load %arg20[%c0_109, %116, %c0_110] : memref<2x16x8xf32, #tpu.memory_space<vmem>>, vector<2x1x8xf32>
      %118 = vector.shape_cast %81 : vector<8x32xf32> to vector<1x8x32xf32>
      %119 = vector.broadcast %111 : vector<2x1x32xf32> to vector<2x8x32xf32>
      %120 = vector.broadcast %118 : vector<1x8x32xf32> to vector<2x8x32xf32>
      %121 = arith.mulf %119, %120 : vector<2x8x32xf32>
      %122 = math.exp %121 : vector<2x8x32xf32>
      %123 = arith.mulf %111, %113 : vector<2x1x32xf32>
      "tpu.trace_start"() <{level = 10 : i32, message = "bxn,bxd->bnd"}> : () -> ()
      %cst_111 = arith.constant dense<0.000000e+00> : vector<2x8x32xf32>
      %124 = tpu.matmul %115, %123, %cst_111 {dimension_numbers = #tpu.dot_dimension_numbers<[1], [1], [2], [2], [0, 0, 0, 2, 1, 2], [0], [0]>} : vector<2x1x8xf32>, vector<2x1x32xf32>, vector<2x8x32xf32> -> vector<2x8x32xf32>
      "tpu.trace_stop"() : () -> ()
      %125 = arith.mulf %122, %arg23 : vector<2x8x32xf32>
      %126 = arith.addf %125, %124 : vector<2x8x32xf32>
      "tpu.trace_start"() <{level = 10 : i32, message = "bxn,bnd->bxd"}> : () -> ()
      %cst_112 = arith.constant dense<0.000000e+00> : vector<2x1x32xf32>
      %127 = tpu.matmul %117, %126, %cst_112 {dimension_numbers = #tpu.dot_dimension_numbers<[2], [1], [1], [2], [0, 0, 0, 1, 1, 2], [0], [0]>} : vector<2x1x8xf32>, vector<2x8x32xf32>, vector<2x1x32xf32> -> vector<2x1x32xf32>
      "tpu.trace_stop"() : () -> ()
      %c0_113 = arith.constant 0 : index
      %128 = arith.index_cast %arg22 : i32 to index
      %c0_114 = arith.constant 0 : index
      %129 = vector.load %arg21[%c0_113, %128, %c0_114] : memref<2x16x32xf32, #tpu.memory_space<vmem>>, vector<2x1x32xf32>
      tpu.vector_store %arg21[%c0_113, %128, %c0_114], %127 {strides = array<i32>} : memref<2x16x32xf32, #tpu.memory_space<vmem>>, vector<2x1x32xf32>,
      scf.yield %126 : vector<2x8x32xf32>
    }
    %c16_i32_78 = arith.constant 16 : i32
    %c0_79 = arith.constant 0 : index
    %c0_80 = arith.constant 0 : index
    %c0_81 = arith.constant 0 : index
    %85 = vector.load %arg21[%c0_79, %c0_80, %c0_81] : memref<2x16x32xf32, #tpu.memory_space<vmem>>, vector<2x16x32xf32>
    %c0_82 = arith.constant 0 : index
    %c0_83 = arith.constant 0 : index
    %c0_84 = arith.constant 0 : index
    %86 = vector.load %arg16[%c0_82, %c0_83, %c0_84] : memref<2x16x32xf32, #tpu.memory_space<vmem>>, vector<2x16x32xf32>
    %c0_85 = arith.constant 0 : index
    %c0_86 = arith.constant 0 : index
    %c0_87 = arith.constant 0 : index
    %c0_88 = arith.constant 0 : index
    %87 = vector.load %arg13[%c0_85, %c0_86, %c0_87, %c0_88] : memref<1x1x1x32xf32, #tpu.memory_space<vmem>>, vector<1x1x1x32xf32>
    %88 = vector.shape_cast %87 : vector<1x1x1x32xf32> to vector<1x1x32xf32>
    %89 = vector.broadcast %88 : vector<1x1x32xf32> to vector<2x16x32xf32>
    %90 = arith.mulf %86, %89 : vector<2x16x32xf32>
    %91 = arith.addf %85, %90 : vector<2x16x32xf32>
    %c0_89 = arith.constant 0 : index
    %c0_90 = arith.constant 0 : index
    %c0_91 = arith.constant 0 : index
    %92 = vector.load %arg17[%c0_89, %c0_90, %c0_91] : memref<2x16x32xf32, #tpu.memory_space<vmem>>, vector<2x16x32xf32>
    %cst_92 = arith.constant 0.000000e+00 : f32
    %93 = vector.broadcast %cst_92 : f32 to vector<2x16x32xf32>
    %94 = arith.subf %93, %92 : vector<2x16x32xf32>
    %95 = math.exp %94 : vector<2x16x32xf32>
    %cst_93 = arith.constant 1.000000e+00 : f32
    %96 = vector.broadcast %cst_93 : f32 to vector<2x16x32xf32>
    %97 = arith.addf %96, %95 : vector<2x16x32xf32>
    %cst_94 = arith.constant 1.000000e+00 : f32
    %98 = vector.broadcast %cst_94 : f32 to vector<2x16x32xf32>
    %99 = arith.divf %98, %97 : vector<2x16x32xf32>
    %100 = arith.mulf %92, %99 : vector<2x16x32xf32>
    %101 = arith.mulf %91, %100 : vector<2x16x32xf32>
    %102 = vector.shape_cast %101 : vector<2x16x32xf32> to vector<32x32xf32>
    %c0_95 = arith.constant 0 : index
    %c0_96 = arith.constant 0 : index
    %c0_97 = arith.constant 0 : index
    %103 = vector.load %arg14[%c0_95, %c0_96, %c0_97] : memref<1x32x8xf32, #tpu.memory_space<vmem>>, vector<1x32x8xf32>
    %104 = vector.shape_cast %103 : vector<1x32x8xf32> to vector<32x8xf32>
    %cst_98 = arith.constant dense<0.000000e+00> : vector<32x8xf32>
    %105 = tpu.matmul %102, %104, %cst_98 {dimension_numbers = #tpu.dot_dimension_numbers<[1], [0], [0], [1], [0, 0, 1, 1], [], []>} : vector<32x32xf32>, vector<32x8xf32>, vector<32x8xf32> -> vector<32x8xf32>
    %106 = vector.shape_cast %105 : vector<32x8xf32> to vector<2x16x8xf32>
    %c0_99 = arith.constant 0 : index
    %c0_100 = arith.constant 0 : index
    %c0_101 = arith.constant 0 : index
    %c0_102 = arith.constant 0 : index
    %107 = vector.load %arg15[%c0_99, %c0_100, %c0_101, %c0_102] : memref<1x2x16x8xf32, #tpu.memory_space<vmem>>, vector<1x2x16x8xf32>
    %108 = vector.shape_cast %107 : vector<1x2x16x8xf32> to vector<2x16x8xf32>
    %109 = vector.shape_cast %106 : vector<2x16x8xf32> to vector<1x2x16x8xf32>
    tpu.vector_store %arg15[%c0_99, %c0_100, %c0_101, %c0_102], %109 {strides = array<i32>} : memref<1x2x16x8xf32, #tpu.memory_space<vmem>>, vector<1x2x16x8xf32>,
    return
  }
  func.func @transform_0(%arg0: i32) -> (i32, i32, i32, i32) {
    %c0_i32 = arith.constant 0 : i32
    %c0_i32_0 = arith.constant 0 : i32
    %c0_i32_1 = arith.constant 0 : i32
    %c0_i32_2 = arith.constant 0 : i32
    return %arg0, %c0_i32, %c0_i32_0, %c0_i32_1 : i32, i32, i32, i32
  }
  func.func @transform_1(%arg0: i32) -> (i32, i32, i32, i32) {
    %c0_i32 = arith.constant 0 : i32
    %c0_i32_0 = arith.constant 0 : i32
    %c0_i32_1 = arith.constant 0 : i32
    %c0_i32_2 = arith.constant 0 : i32
    return %arg0, %c0_i32, %c0_i32_0, %c0_i32_1 : i32, i32, i32, i32
  }
  func.func @transform_2(%arg0: i32) -> (i32, i32, i32) {
    %c0_i32 = arith.constant 0 : i32
    %c0_i32_0 = arith.constant 0 : i32
    %c0_i32_1 = arith.constant 0 : i32
    return %arg0, %c0_i32, %c0_i32_0 : i32, i32, i32
  }
  func.func @transform_3(%arg0: i32) -> (i32, i32, i32) {
    %c0_i32 = arith.constant 0 : i32
    %c0_i32_0 = arith.constant 0 : i32
    %c0_i32_1 = arith.constant 0 : i32
    return %arg0, %c0_i32, %c0_i32_0 : i32, i32, i32
  }
  func.func @transform_4(%arg0: i32) -> (i32, i32, i32, i32) {
    %c0_i32 = arith.constant 0 : i32
    %c0_i32_0 = arith.constant 0 : i32
    %c0_i32_1 = arith.constant 0 : i32
    %c0_i32_2 = arith.constant 0 : i32
    return %arg0, %c0_i32, %c0_i32_0, %c0_i32_1 : i32, i32, i32, i32
  }
  func.func @transform_5(%arg0: i32) -> (i32, i32, i32, i32) {
    %c0_i32 = arith.constant 0 : i32
    %c0_i32_0 = arith.constant 0 : i32
    %c0_i32_1 = arith.constant 0 : i32
    %c0_i32_2 = arith.constant 0 : i32
    return %arg0, %c0_i32, %c0_i32_0, %c0_i32_1 : i32, i32, i32, i32
  }
  func.func @transform_6(%arg0: i32) -> (i32, i32, i32, i32) {
    %c0_i32 = arith.constant 0 : i32
    %c0_i32_0 = arith.constant 0 : i32
    %c0_i32_1 = arith.constant 0 : i32
    %c0_i32_2 = arith.constant 0 : i32
    return %arg0, %c0_i32, %c0_i32_0, %c0_i32_1 : i32, i32, i32, i32
  }
  func.func @transform_7(%arg0: i32) -> (i32, i32, i32) {
    %c0_i32 = arith.constant 0 : i32
    %c0_i32_0 = arith.constant 0 : i32
    %c0_i32_1 = arith.constant 0 : i32
    return %arg0, %c0_i32, %c0_i32_0 : i32, i32, i32
  }
  func.func @transform_8(%arg0: i32) -> (i32, i32, i32) {
    %c0_i32 = arith.constant 0 : i32
    %c0_i32_0 = arith.constant 0 : i32
    %c0_i32_1 = arith.constant 0 : i32
    return %arg0, %c0_i32, %c0_i32_0 : i32, i32, i32
  }
  func.func @transform_9(%arg0: i32) -> (i32, i32, i32) {
    %c0_i32 = arith.constant 0 : i32
    %c0_i32_0 = arith.constant 0 : i32
    %c0_i32_1 = arith.constant 0 : i32
    return %arg0, %c0_i32, %c0_i32_0 : i32, i32, i32
  }
  func.func @transform_10(%arg0: i32) -> (i32, i32, i32, i32) {
    %c0_i32 = arith.constant 0 : i32
    %c0_i32_0 = arith.constant 0 : i32
    %c0_i32_1 = arith.constant 0 : i32
    %c0_i32_2 = arith.constant 0 : i32
    return %arg0, %c0_i32, %c0_i32_0, %c0_i32_1 : i32, i32, i32, i32
  }
  func.func @transform_11(%arg0: i32) -> (i32, i32, i32) {
    %c0_i32 = arith.constant 0 : i32
    %c0_i32_0 = arith.constant 0 : i32
    %c0_i32_1 = arith.constant 0 : i32
    return %arg0, %c0_i32, %c0_i32_0 : i32, i32, i32
  }
  func.func @transform_12(%arg0: i32) -> (i32, i32, i32, i32) {
    %c0_i32 = arith.constant 0 : i32
    %c0_i32_0 = arith.constant 0 : i32
    %c0_i32_1 = arith.constant 0 : i32
    %c0_i32_2 = arith.constant 0 : i32
    return %arg0, %c0_i32, %c0_i32_0, %c0_i32_1 : i32, i32, i32, i32
  }
  func.func @transform_13(%arg0: i32) -> (i32, i32, i32) {
    %c0_i32 = arith.constant 0 : i32
    %c0_i32_0 = arith.constant 0 : i32
    %c0_i32_1 = arith.constant 0 : i32
    return %arg0, %c0_i32, %c0_i32_0 : i32, i32, i32
  }
  func.func @transform_14(%arg0: i32) -> (i32, i32, i32, i32) {
    %c0_i32 = arith.constant 0 : i32
    %c0_i32_0 = arith.constant 0 : i32
    %c0_i32_1 = arith.constant 0 : i32
    %c0_i32_2 = arith.constant 0 : i32
    return %arg0, %c0_i32, %c0_i32_0, %c0_i32_1 : i32, i32, i32, i32
  }
}

module attributes {stable_mosaic.version = 11 : i64} {
  func.func @_conv_s1_kernel(%arg0: i32, %arg1: i32, %arg2: memref<1x63x24xf32, #tpu.memory_space<vmem>>, %arg3: memref<32x24x16xbf16, #tpu.memory_space<vmem>>, %arg4: memref<1x16xf32, #tpu.memory_space<vmem>>, %arg5: memref<1x16xf32, #tpu.memory_space<vmem>>, %arg6: memref<1x32x16xf32, #tpu.memory_space<vmem>>) attributes {dimension_semantics = [#tpu.dimension_semantics<parallel>, #tpu.dimension_semantics<parallel>], iteration_bounds = array<i64: 2, 1>, scalar_prefetch = 0 : i64, scratch_operands = 0 : i64, tpu.core_type = #tpu.core_type<tc>, window_params = [{transform_indices = @transform_0, window_bounds = array<i64: 1, 63, 24>}, {pipeline_mode = #tpu.pipeline_mode<synchronous>, transform_indices = @transform_1, window_bounds = array<i64: 32, 24, 16>}, {pipeline_mode = #tpu.pipeline_mode<synchronous>, transform_indices = @transform_2, window_bounds = array<i64: 1, 16>}, {pipeline_mode = #tpu.pipeline_mode<synchronous>, transform_indices = @transform_3, window_bounds = array<i64: 1, 16>}, {transform_indices = @transform_4, window_bounds = array<i64: 1, 32, 16>}]} {
    %c32_i32 = arith.constant 32 : i32
    %0 = arith.muli %arg1, %c32_i32 : i32
    %1 = tpu.assume_multiple %0, 8 : i32
    %cst = arith.constant 0.000000e+00 : f32
    %2 = vector.broadcast %cst : f32 to vector<32x16xf32>
    %c0_i32 = arith.constant 0 : i32
    %3 = arith.addi %1, %c0_i32 : i32
    %c0 = arith.constant 0 : index
    %4 = arith.index_cast %3 : i32 to index
    %c0_0 = arith.constant 0 : index
    %5 = vector.load %arg2[%c0, %4, %c0_0] : memref<1x63x24xf32, #tpu.memory_space<vmem>>, vector<1x32x24xf32>
    %6 = vector.shape_cast %5 : vector<1x32x24xf32> to vector<32x24xf32>
    %7 = arith.truncf %6 : vector<32x24xf32> to vector<32x24xbf16>
    %8 = arith.index_cast %c0_i32 : i32 to index
    %c0_1 = arith.constant 0 : index
    %c0_2 = arith.constant 0 : index
    %9 = vector.load %arg3[%8, %c0_1, %c0_2] : memref<32x24x16xbf16, #tpu.memory_space<vmem>>, vector<1x24x16xbf16>
    %10 = vector.shape_cast %9 : vector<1x24x16xbf16> to vector<24x16xbf16>
    %cst_3 = arith.constant dense<0.000000e+00> : vector<32x16xf32>
    %11 = tpu.matmul %7, %10, %cst_3 {dimension_numbers = #tpu.dot_dimension_numbers<[1], [0], [0], [1], [0, 0, 1, 1], [], []>} : vector<32x24xbf16>, vector<24x16xbf16>, vector<32x16xf32> -> vector<32x16xf32>
    %12 = arith.addf %2, %11 : vector<32x16xf32>
    %c1_i32 = arith.constant 1 : i32
    %13 = arith.addi %1, %c1_i32 : i32
    %c0_4 = arith.constant 0 : index
    %14 = arith.index_cast %13 : i32 to index
    %c0_5 = arith.constant 0 : index
    %15 = vector.load %arg2[%c0_4, %14, %c0_5] : memref<1x63x24xf32, #tpu.memory_space<vmem>>, vector<1x32x24xf32>
    %16 = vector.shape_cast %15 : vector<1x32x24xf32> to vector<32x24xf32>
    %17 = arith.truncf %16 : vector<32x24xf32> to vector<32x24xbf16>
    %18 = arith.index_cast %c1_i32 : i32 to index
    %c0_6 = arith.constant 0 : index
    %c0_7 = arith.constant 0 : index
    %19 = vector.load %arg3[%18, %c0_6, %c0_7] : memref<32x24x16xbf16, #tpu.memory_space<vmem>>, vector<1x24x16xbf16>
    %20 = vector.shape_cast %19 : vector<1x24x16xbf16> to vector<24x16xbf16>
    %cst_8 = arith.constant dense<0.000000e+00> : vector<32x16xf32>
    %21 = tpu.matmul %17, %20, %cst_8 {dimension_numbers = #tpu.dot_dimension_numbers<[1], [0], [0], [1], [0, 0, 1, 1], [], []>} : vector<32x24xbf16>, vector<24x16xbf16>, vector<32x16xf32> -> vector<32x16xf32>
    %22 = arith.addf %12, %21 : vector<32x16xf32>
    %c2_i32 = arith.constant 2 : i32
    %23 = arith.addi %1, %c2_i32 : i32
    %c0_9 = arith.constant 0 : index
    %24 = arith.index_cast %23 : i32 to index
    %c0_10 = arith.constant 0 : index
    %25 = vector.load %arg2[%c0_9, %24, %c0_10] : memref<1x63x24xf32, #tpu.memory_space<vmem>>, vector<1x32x24xf32>
    %26 = vector.shape_cast %25 : vector<1x32x24xf32> to vector<32x24xf32>
    %27 = arith.truncf %26 : vector<32x24xf32> to vector<32x24xbf16>
    %28 = arith.index_cast %c2_i32 : i32 to index
    %c0_11 = arith.constant 0 : index
    %c0_12 = arith.constant 0 : index
    %29 = vector.load %arg3[%28, %c0_11, %c0_12] : memref<32x24x16xbf16, #tpu.memory_space<vmem>>, vector<1x24x16xbf16>
    %30 = vector.shape_cast %29 : vector<1x24x16xbf16> to vector<24x16xbf16>
    %cst_13 = arith.constant dense<0.000000e+00> : vector<32x16xf32>
    %31 = tpu.matmul %27, %30, %cst_13 {dimension_numbers = #tpu.dot_dimension_numbers<[1], [0], [0], [1], [0, 0, 1, 1], [], []>} : vector<32x24xbf16>, vector<24x16xbf16>, vector<32x16xf32> -> vector<32x16xf32>
    %32 = arith.addf %22, %31 : vector<32x16xf32>
    %c3_i32 = arith.constant 3 : i32
    %33 = arith.addi %1, %c3_i32 : i32
    %c0_14 = arith.constant 0 : index
    %34 = arith.index_cast %33 : i32 to index
    %c0_15 = arith.constant 0 : index
    %35 = vector.load %arg2[%c0_14, %34, %c0_15] : memref<1x63x24xf32, #tpu.memory_space<vmem>>, vector<1x32x24xf32>
    %36 = vector.shape_cast %35 : vector<1x32x24xf32> to vector<32x24xf32>
    %37 = arith.truncf %36 : vector<32x24xf32> to vector<32x24xbf16>
    %38 = arith.index_cast %c3_i32 : i32 to index
    %c0_16 = arith.constant 0 : index
    %c0_17 = arith.constant 0 : index
    %39 = vector.load %arg3[%38, %c0_16, %c0_17] : memref<32x24x16xbf16, #tpu.memory_space<vmem>>, vector<1x24x16xbf16>
    %40 = vector.shape_cast %39 : vector<1x24x16xbf16> to vector<24x16xbf16>
    %cst_18 = arith.constant dense<0.000000e+00> : vector<32x16xf32>
    %41 = tpu.matmul %37, %40, %cst_18 {dimension_numbers = #tpu.dot_dimension_numbers<[1], [0], [0], [1], [0, 0, 1, 1], [], []>} : vector<32x24xbf16>, vector<24x16xbf16>, vector<32x16xf32> -> vector<32x16xf32>
    %42 = arith.addf %32, %41 : vector<32x16xf32>
    %c4_i32 = arith.constant 4 : i32
    %43 = arith.addi %1, %c4_i32 : i32
    %c0_19 = arith.constant 0 : index
    %44 = arith.index_cast %43 : i32 to index
    %c0_20 = arith.constant 0 : index
    %45 = vector.load %arg2[%c0_19, %44, %c0_20] : memref<1x63x24xf32, #tpu.memory_space<vmem>>, vector<1x32x24xf32>
    %46 = vector.shape_cast %45 : vector<1x32x24xf32> to vector<32x24xf32>
    %47 = arith.truncf %46 : vector<32x24xf32> to vector<32x24xbf16>
    %48 = arith.index_cast %c4_i32 : i32 to index
    %c0_21 = arith.constant 0 : index
    %c0_22 = arith.constant 0 : index
    %49 = vector.load %arg3[%48, %c0_21, %c0_22] : memref<32x24x16xbf16, #tpu.memory_space<vmem>>, vector<1x24x16xbf16>
    %50 = vector.shape_cast %49 : vector<1x24x16xbf16> to vector<24x16xbf16>
    %cst_23 = arith.constant dense<0.000000e+00> : vector<32x16xf32>
    %51 = tpu.matmul %47, %50, %cst_23 {dimension_numbers = #tpu.dot_dimension_numbers<[1], [0], [0], [1], [0, 0, 1, 1], [], []>} : vector<32x24xbf16>, vector<24x16xbf16>, vector<32x16xf32> -> vector<32x16xf32>
    %52 = arith.addf %42, %51 : vector<32x16xf32>
    %c5_i32 = arith.constant 5 : i32
    %53 = arith.addi %1, %c5_i32 : i32
    %c0_24 = arith.constant 0 : index
    %54 = arith.index_cast %53 : i32 to index
    %c0_25 = arith.constant 0 : index
    %55 = vector.load %arg2[%c0_24, %54, %c0_25] : memref<1x63x24xf32, #tpu.memory_space<vmem>>, vector<1x32x24xf32>
    %56 = vector.shape_cast %55 : vector<1x32x24xf32> to vector<32x24xf32>
    %57 = arith.truncf %56 : vector<32x24xf32> to vector<32x24xbf16>
    %58 = arith.index_cast %c5_i32 : i32 to index
    %c0_26 = arith.constant 0 : index
    %c0_27 = arith.constant 0 : index
    %59 = vector.load %arg3[%58, %c0_26, %c0_27] : memref<32x24x16xbf16, #tpu.memory_space<vmem>>, vector<1x24x16xbf16>
    %60 = vector.shape_cast %59 : vector<1x24x16xbf16> to vector<24x16xbf16>
    %cst_28 = arith.constant dense<0.000000e+00> : vector<32x16xf32>
    %61 = tpu.matmul %57, %60, %cst_28 {dimension_numbers = #tpu.dot_dimension_numbers<[1], [0], [0], [1], [0, 0, 1, 1], [], []>} : vector<32x24xbf16>, vector<24x16xbf16>, vector<32x16xf32> -> vector<32x16xf32>
    %62 = arith.addf %52, %61 : vector<32x16xf32>
    %c6_i32 = arith.constant 6 : i32
    %63 = arith.addi %1, %c6_i32 : i32
    %c0_29 = arith.constant 0 : index
    %64 = arith.index_cast %63 : i32 to index
    %c0_30 = arith.constant 0 : index
    %65 = vector.load %arg2[%c0_29, %64, %c0_30] : memref<1x63x24xf32, #tpu.memory_space<vmem>>, vector<1x32x24xf32>
    %66 = vector.shape_cast %65 : vector<1x32x24xf32> to vector<32x24xf32>
    %67 = arith.truncf %66 : vector<32x24xf32> to vector<32x24xbf16>
    %68 = arith.index_cast %c6_i32 : i32 to index
    %c0_31 = arith.constant 0 : index
    %c0_32 = arith.constant 0 : index
    %69 = vector.load %arg3[%68, %c0_31, %c0_32] : memref<32x24x16xbf16, #tpu.memory_space<vmem>>, vector<1x24x16xbf16>
    %70 = vector.shape_cast %69 : vector<1x24x16xbf16> to vector<24x16xbf16>
    %cst_33 = arith.constant dense<0.000000e+00> : vector<32x16xf32>
    %71 = tpu.matmul %67, %70, %cst_33 {dimension_numbers = #tpu.dot_dimension_numbers<[1], [0], [0], [1], [0, 0, 1, 1], [], []>} : vector<32x24xbf16>, vector<24x16xbf16>, vector<32x16xf32> -> vector<32x16xf32>
    %72 = arith.addf %62, %71 : vector<32x16xf32>
    %c7_i32 = arith.constant 7 : i32
    %73 = arith.addi %1, %c7_i32 : i32
    %c0_34 = arith.constant 0 : index
    %74 = arith.index_cast %73 : i32 to index
    %c0_35 = arith.constant 0 : index
    %75 = vector.load %arg2[%c0_34, %74, %c0_35] : memref<1x63x24xf32, #tpu.memory_space<vmem>>, vector<1x32x24xf32>
    %76 = vector.shape_cast %75 : vector<1x32x24xf32> to vector<32x24xf32>
    %77 = arith.truncf %76 : vector<32x24xf32> to vector<32x24xbf16>
    %78 = arith.index_cast %c7_i32 : i32 to index
    %c0_36 = arith.constant 0 : index
    %c0_37 = arith.constant 0 : index
    %79 = vector.load %arg3[%78, %c0_36, %c0_37] : memref<32x24x16xbf16, #tpu.memory_space<vmem>>, vector<1x24x16xbf16>
    %80 = vector.shape_cast %79 : vector<1x24x16xbf16> to vector<24x16xbf16>
    %cst_38 = arith.constant dense<0.000000e+00> : vector<32x16xf32>
    %81 = tpu.matmul %77, %80, %cst_38 {dimension_numbers = #tpu.dot_dimension_numbers<[1], [0], [0], [1], [0, 0, 1, 1], [], []>} : vector<32x24xbf16>, vector<24x16xbf16>, vector<32x16xf32> -> vector<32x16xf32>
    %82 = arith.addf %72, %81 : vector<32x16xf32>
    %c8_i32 = arith.constant 8 : i32
    %83 = arith.addi %1, %c8_i32 : i32
    %c0_39 = arith.constant 0 : index
    %84 = arith.index_cast %83 : i32 to index
    %c0_40 = arith.constant 0 : index
    %85 = vector.load %arg2[%c0_39, %84, %c0_40] : memref<1x63x24xf32, #tpu.memory_space<vmem>>, vector<1x32x24xf32>
    %86 = vector.shape_cast %85 : vector<1x32x24xf32> to vector<32x24xf32>
    %87 = arith.truncf %86 : vector<32x24xf32> to vector<32x24xbf16>
    %88 = arith.index_cast %c8_i32 : i32 to index
    %c0_41 = arith.constant 0 : index
    %c0_42 = arith.constant 0 : index
    %89 = vector.load %arg3[%88, %c0_41, %c0_42] : memref<32x24x16xbf16, #tpu.memory_space<vmem>>, vector<1x24x16xbf16>
    %90 = vector.shape_cast %89 : vector<1x24x16xbf16> to vector<24x16xbf16>
    %cst_43 = arith.constant dense<0.000000e+00> : vector<32x16xf32>
    %91 = tpu.matmul %87, %90, %cst_43 {dimension_numbers = #tpu.dot_dimension_numbers<[1], [0], [0], [1], [0, 0, 1, 1], [], []>} : vector<32x24xbf16>, vector<24x16xbf16>, vector<32x16xf32> -> vector<32x16xf32>
    %92 = arith.addf %82, %91 : vector<32x16xf32>
    %c9_i32 = arith.constant 9 : i32
    %93 = arith.addi %1, %c9_i32 : i32
    %c0_44 = arith.constant 0 : index
    %94 = arith.index_cast %93 : i32 to index
    %c0_45 = arith.constant 0 : index
    %95 = vector.load %arg2[%c0_44, %94, %c0_45] : memref<1x63x24xf32, #tpu.memory_space<vmem>>, vector<1x32x24xf32>
    %96 = vector.shape_cast %95 : vector<1x32x24xf32> to vector<32x24xf32>
    %97 = arith.truncf %96 : vector<32x24xf32> to vector<32x24xbf16>
    %98 = arith.index_cast %c9_i32 : i32 to index
    %c0_46 = arith.constant 0 : index
    %c0_47 = arith.constant 0 : index
    %99 = vector.load %arg3[%98, %c0_46, %c0_47] : memref<32x24x16xbf16, #tpu.memory_space<vmem>>, vector<1x24x16xbf16>
    %100 = vector.shape_cast %99 : vector<1x24x16xbf16> to vector<24x16xbf16>
    %cst_48 = arith.constant dense<0.000000e+00> : vector<32x16xf32>
    %101 = tpu.matmul %97, %100, %cst_48 {dimension_numbers = #tpu.dot_dimension_numbers<[1], [0], [0], [1], [0, 0, 1, 1], [], []>} : vector<32x24xbf16>, vector<24x16xbf16>, vector<32x16xf32> -> vector<32x16xf32>
    %102 = arith.addf %92, %101 : vector<32x16xf32>
    %c10_i32 = arith.constant 10 : i32
    %103 = arith.addi %1, %c10_i32 : i32
    %c0_49 = arith.constant 0 : index
    %104 = arith.index_cast %103 : i32 to index
    %c0_50 = arith.constant 0 : index
    %105 = vector.load %arg2[%c0_49, %104, %c0_50] : memref<1x63x24xf32, #tpu.memory_space<vmem>>, vector<1x32x24xf32>
    %106 = vector.shape_cast %105 : vector<1x32x24xf32> to vector<32x24xf32>
    %107 = arith.truncf %106 : vector<32x24xf32> to vector<32x24xbf16>
    %108 = arith.index_cast %c10_i32 : i32 to index
    %c0_51 = arith.constant 0 : index
    %c0_52 = arith.constant 0 : index
    %109 = vector.load %arg3[%108, %c0_51, %c0_52] : memref<32x24x16xbf16, #tpu.memory_space<vmem>>, vector<1x24x16xbf16>
    %110 = vector.shape_cast %109 : vector<1x24x16xbf16> to vector<24x16xbf16>
    %cst_53 = arith.constant dense<0.000000e+00> : vector<32x16xf32>
    %111 = tpu.matmul %107, %110, %cst_53 {dimension_numbers = #tpu.dot_dimension_numbers<[1], [0], [0], [1], [0, 0, 1, 1], [], []>} : vector<32x24xbf16>, vector<24x16xbf16>, vector<32x16xf32> -> vector<32x16xf32>
    %112 = arith.addf %102, %111 : vector<32x16xf32>
    %c11_i32 = arith.constant 11 : i32
    %113 = arith.addi %1, %c11_i32 : i32
    %c0_54 = arith.constant 0 : index
    %114 = arith.index_cast %113 : i32 to index
    %c0_55 = arith.constant 0 : index
    %115 = vector.load %arg2[%c0_54, %114, %c0_55] : memref<1x63x24xf32, #tpu.memory_space<vmem>>, vector<1x32x24xf32>
    %116 = vector.shape_cast %115 : vector<1x32x24xf32> to vector<32x24xf32>
    %117 = arith.truncf %116 : vector<32x24xf32> to vector<32x24xbf16>
    %118 = arith.index_cast %c11_i32 : i32 to index
    %c0_56 = arith.constant 0 : index
    %c0_57 = arith.constant 0 : index
    %119 = vector.load %arg3[%118, %c0_56, %c0_57] : memref<32x24x16xbf16, #tpu.memory_space<vmem>>, vector<1x24x16xbf16>
    %120 = vector.shape_cast %119 : vector<1x24x16xbf16> to vector<24x16xbf16>
    %cst_58 = arith.constant dense<0.000000e+00> : vector<32x16xf32>
    %121 = tpu.matmul %117, %120, %cst_58 {dimension_numbers = #tpu.dot_dimension_numbers<[1], [0], [0], [1], [0, 0, 1, 1], [], []>} : vector<32x24xbf16>, vector<24x16xbf16>, vector<32x16xf32> -> vector<32x16xf32>
    %122 = arith.addf %112, %121 : vector<32x16xf32>
    %c12_i32 = arith.constant 12 : i32
    %123 = arith.addi %1, %c12_i32 : i32
    %c0_59 = arith.constant 0 : index
    %124 = arith.index_cast %123 : i32 to index
    %c0_60 = arith.constant 0 : index
    %125 = vector.load %arg2[%c0_59, %124, %c0_60] : memref<1x63x24xf32, #tpu.memory_space<vmem>>, vector<1x32x24xf32>
    %126 = vector.shape_cast %125 : vector<1x32x24xf32> to vector<32x24xf32>
    %127 = arith.truncf %126 : vector<32x24xf32> to vector<32x24xbf16>
    %128 = arith.index_cast %c12_i32 : i32 to index
    %c0_61 = arith.constant 0 : index
    %c0_62 = arith.constant 0 : index
    %129 = vector.load %arg3[%128, %c0_61, %c0_62] : memref<32x24x16xbf16, #tpu.memory_space<vmem>>, vector<1x24x16xbf16>
    %130 = vector.shape_cast %129 : vector<1x24x16xbf16> to vector<24x16xbf16>
    %cst_63 = arith.constant dense<0.000000e+00> : vector<32x16xf32>
    %131 = tpu.matmul %127, %130, %cst_63 {dimension_numbers = #tpu.dot_dimension_numbers<[1], [0], [0], [1], [0, 0, 1, 1], [], []>} : vector<32x24xbf16>, vector<24x16xbf16>, vector<32x16xf32> -> vector<32x16xf32>
    %132 = arith.addf %122, %131 : vector<32x16xf32>
    %c13_i32 = arith.constant 13 : i32
    %133 = arith.addi %1, %c13_i32 : i32
    %c0_64 = arith.constant 0 : index
    %134 = arith.index_cast %133 : i32 to index
    %c0_65 = arith.constant 0 : index
    %135 = vector.load %arg2[%c0_64, %134, %c0_65] : memref<1x63x24xf32, #tpu.memory_space<vmem>>, vector<1x32x24xf32>
    %136 = vector.shape_cast %135 : vector<1x32x24xf32> to vector<32x24xf32>
    %137 = arith.truncf %136 : vector<32x24xf32> to vector<32x24xbf16>
    %138 = arith.index_cast %c13_i32 : i32 to index
    %c0_66 = arith.constant 0 : index
    %c0_67 = arith.constant 0 : index
    %139 = vector.load %arg3[%138, %c0_66, %c0_67] : memref<32x24x16xbf16, #tpu.memory_space<vmem>>, vector<1x24x16xbf16>
    %140 = vector.shape_cast %139 : vector<1x24x16xbf16> to vector<24x16xbf16>
    %cst_68 = arith.constant dense<0.000000e+00> : vector<32x16xf32>
    %141 = tpu.matmul %137, %140, %cst_68 {dimension_numbers = #tpu.dot_dimension_numbers<[1], [0], [0], [1], [0, 0, 1, 1], [], []>} : vector<32x24xbf16>, vector<24x16xbf16>, vector<32x16xf32> -> vector<32x16xf32>
    %142 = arith.addf %132, %141 : vector<32x16xf32>
    %c14_i32 = arith.constant 14 : i32
    %143 = arith.addi %1, %c14_i32 : i32
    %c0_69 = arith.constant 0 : index
    %144 = arith.index_cast %143 : i32 to index
    %c0_70 = arith.constant 0 : index
    %145 = vector.load %arg2[%c0_69, %144, %c0_70] : memref<1x63x24xf32, #tpu.memory_space<vmem>>, vector<1x32x24xf32>
    %146 = vector.shape_cast %145 : vector<1x32x24xf32> to vector<32x24xf32>
    %147 = arith.truncf %146 : vector<32x24xf32> to vector<32x24xbf16>
    %148 = arith.index_cast %c14_i32 : i32 to index
    %c0_71 = arith.constant 0 : index
    %c0_72 = arith.constant 0 : index
    %149 = vector.load %arg3[%148, %c0_71, %c0_72] : memref<32x24x16xbf16, #tpu.memory_space<vmem>>, vector<1x24x16xbf16>
    %150 = vector.shape_cast %149 : vector<1x24x16xbf16> to vector<24x16xbf16>
    %cst_73 = arith.constant dense<0.000000e+00> : vector<32x16xf32>
    %151 = tpu.matmul %147, %150, %cst_73 {dimension_numbers = #tpu.dot_dimension_numbers<[1], [0], [0], [1], [0, 0, 1, 1], [], []>} : vector<32x24xbf16>, vector<24x16xbf16>, vector<32x16xf32> -> vector<32x16xf32>
    %152 = arith.addf %142, %151 : vector<32x16xf32>
    %c15_i32 = arith.constant 15 : i32
    %153 = arith.addi %1, %c15_i32 : i32
    %c0_74 = arith.constant 0 : index
    %154 = arith.index_cast %153 : i32 to index
    %c0_75 = arith.constant 0 : index
    %155 = vector.load %arg2[%c0_74, %154, %c0_75] : memref<1x63x24xf32, #tpu.memory_space<vmem>>, vector<1x32x24xf32>
    %156 = vector.shape_cast %155 : vector<1x32x24xf32> to vector<32x24xf32>
    %157 = arith.truncf %156 : vector<32x24xf32> to vector<32x24xbf16>
    %158 = arith.index_cast %c15_i32 : i32 to index
    %c0_76 = arith.constant 0 : index
    %c0_77 = arith.constant 0 : index
    %159 = vector.load %arg3[%158, %c0_76, %c0_77] : memref<32x24x16xbf16, #tpu.memory_space<vmem>>, vector<1x24x16xbf16>
    %160 = vector.shape_cast %159 : vector<1x24x16xbf16> to vector<24x16xbf16>
    %cst_78 = arith.constant dense<0.000000e+00> : vector<32x16xf32>
    %161 = tpu.matmul %157, %160, %cst_78 {dimension_numbers = #tpu.dot_dimension_numbers<[1], [0], [0], [1], [0, 0, 1, 1], [], []>} : vector<32x24xbf16>, vector<24x16xbf16>, vector<32x16xf32> -> vector<32x16xf32>
    %162 = arith.addf %152, %161 : vector<32x16xf32>
    %c16_i32 = arith.constant 16 : i32
    %163 = arith.addi %1, %c16_i32 : i32
    %c0_79 = arith.constant 0 : index
    %164 = arith.index_cast %163 : i32 to index
    %c0_80 = arith.constant 0 : index
    %165 = vector.load %arg2[%c0_79, %164, %c0_80] : memref<1x63x24xf32, #tpu.memory_space<vmem>>, vector<1x32x24xf32>
    %166 = vector.shape_cast %165 : vector<1x32x24xf32> to vector<32x24xf32>
    %167 = arith.truncf %166 : vector<32x24xf32> to vector<32x24xbf16>
    %168 = arith.index_cast %c16_i32 : i32 to index
    %c0_81 = arith.constant 0 : index
    %c0_82 = arith.constant 0 : index
    %169 = vector.load %arg3[%168, %c0_81, %c0_82] : memref<32x24x16xbf16, #tpu.memory_space<vmem>>, vector<1x24x16xbf16>
    %170 = vector.shape_cast %169 : vector<1x24x16xbf16> to vector<24x16xbf16>
    %cst_83 = arith.constant dense<0.000000e+00> : vector<32x16xf32>
    %171 = tpu.matmul %167, %170, %cst_83 {dimension_numbers = #tpu.dot_dimension_numbers<[1], [0], [0], [1], [0, 0, 1, 1], [], []>} : vector<32x24xbf16>, vector<24x16xbf16>, vector<32x16xf32> -> vector<32x16xf32>
    %172 = arith.addf %162, %171 : vector<32x16xf32>
    %c17_i32 = arith.constant 17 : i32
    %173 = arith.addi %1, %c17_i32 : i32
    %c0_84 = arith.constant 0 : index
    %174 = arith.index_cast %173 : i32 to index
    %c0_85 = arith.constant 0 : index
    %175 = vector.load %arg2[%c0_84, %174, %c0_85] : memref<1x63x24xf32, #tpu.memory_space<vmem>>, vector<1x32x24xf32>
    %176 = vector.shape_cast %175 : vector<1x32x24xf32> to vector<32x24xf32>
    %177 = arith.truncf %176 : vector<32x24xf32> to vector<32x24xbf16>
    %178 = arith.index_cast %c17_i32 : i32 to index
    %c0_86 = arith.constant 0 : index
    %c0_87 = arith.constant 0 : index
    %179 = vector.load %arg3[%178, %c0_86, %c0_87] : memref<32x24x16xbf16, #tpu.memory_space<vmem>>, vector<1x24x16xbf16>
    %180 = vector.shape_cast %179 : vector<1x24x16xbf16> to vector<24x16xbf16>
    %cst_88 = arith.constant dense<0.000000e+00> : vector<32x16xf32>
    %181 = tpu.matmul %177, %180, %cst_88 {dimension_numbers = #tpu.dot_dimension_numbers<[1], [0], [0], [1], [0, 0, 1, 1], [], []>} : vector<32x24xbf16>, vector<24x16xbf16>, vector<32x16xf32> -> vector<32x16xf32>
    %182 = arith.addf %172, %181 : vector<32x16xf32>
    %c18_i32 = arith.constant 18 : i32
    %183 = arith.addi %1, %c18_i32 : i32
    %c0_89 = arith.constant 0 : index
    %184 = arith.index_cast %183 : i32 to index
    %c0_90 = arith.constant 0 : index
    %185 = vector.load %arg2[%c0_89, %184, %c0_90] : memref<1x63x24xf32, #tpu.memory_space<vmem>>, vector<1x32x24xf32>
    %186 = vector.shape_cast %185 : vector<1x32x24xf32> to vector<32x24xf32>
    %187 = arith.truncf %186 : vector<32x24xf32> to vector<32x24xbf16>
    %188 = arith.index_cast %c18_i32 : i32 to index
    %c0_91 = arith.constant 0 : index
    %c0_92 = arith.constant 0 : index
    %189 = vector.load %arg3[%188, %c0_91, %c0_92] : memref<32x24x16xbf16, #tpu.memory_space<vmem>>, vector<1x24x16xbf16>
    %190 = vector.shape_cast %189 : vector<1x24x16xbf16> to vector<24x16xbf16>
    %cst_93 = arith.constant dense<0.000000e+00> : vector<32x16xf32>
    %191 = tpu.matmul %187, %190, %cst_93 {dimension_numbers = #tpu.dot_dimension_numbers<[1], [0], [0], [1], [0, 0, 1, 1], [], []>} : vector<32x24xbf16>, vector<24x16xbf16>, vector<32x16xf32> -> vector<32x16xf32>
    %192 = arith.addf %182, %191 : vector<32x16xf32>
    %c19_i32 = arith.constant 19 : i32
    %193 = arith.addi %1, %c19_i32 : i32
    %c0_94 = arith.constant 0 : index
    %194 = arith.index_cast %193 : i32 to index
    %c0_95 = arith.constant 0 : index
    %195 = vector.load %arg2[%c0_94, %194, %c0_95] : memref<1x63x24xf32, #tpu.memory_space<vmem>>, vector<1x32x24xf32>
    %196 = vector.shape_cast %195 : vector<1x32x24xf32> to vector<32x24xf32>
    %197 = arith.truncf %196 : vector<32x24xf32> to vector<32x24xbf16>
    %198 = arith.index_cast %c19_i32 : i32 to index
    %c0_96 = arith.constant 0 : index
    %c0_97 = arith.constant 0 : index
    %199 = vector.load %arg3[%198, %c0_96, %c0_97] : memref<32x24x16xbf16, #tpu.memory_space<vmem>>, vector<1x24x16xbf16>
    %200 = vector.shape_cast %199 : vector<1x24x16xbf16> to vector<24x16xbf16>
    %cst_98 = arith.constant dense<0.000000e+00> : vector<32x16xf32>
    %201 = tpu.matmul %197, %200, %cst_98 {dimension_numbers = #tpu.dot_dimension_numbers<[1], [0], [0], [1], [0, 0, 1, 1], [], []>} : vector<32x24xbf16>, vector<24x16xbf16>, vector<32x16xf32> -> vector<32x16xf32>
    %202 = arith.addf %192, %201 : vector<32x16xf32>
    %c20_i32 = arith.constant 20 : i32
    %203 = arith.addi %1, %c20_i32 : i32
    %c0_99 = arith.constant 0 : index
    %204 = arith.index_cast %203 : i32 to index
    %c0_100 = arith.constant 0 : index
    %205 = vector.load %arg2[%c0_99, %204, %c0_100] : memref<1x63x24xf32, #tpu.memory_space<vmem>>, vector<1x32x24xf32>
    %206 = vector.shape_cast %205 : vector<1x32x24xf32> to vector<32x24xf32>
    %207 = arith.truncf %206 : vector<32x24xf32> to vector<32x24xbf16>
    %208 = arith.index_cast %c20_i32 : i32 to index
    %c0_101 = arith.constant 0 : index
    %c0_102 = arith.constant 0 : index
    %209 = vector.load %arg3[%208, %c0_101, %c0_102] : memref<32x24x16xbf16, #tpu.memory_space<vmem>>, vector<1x24x16xbf16>
    %210 = vector.shape_cast %209 : vector<1x24x16xbf16> to vector<24x16xbf16>
    %cst_103 = arith.constant dense<0.000000e+00> : vector<32x16xf32>
    %211 = tpu.matmul %207, %210, %cst_103 {dimension_numbers = #tpu.dot_dimension_numbers<[1], [0], [0], [1], [0, 0, 1, 1], [], []>} : vector<32x24xbf16>, vector<24x16xbf16>, vector<32x16xf32> -> vector<32x16xf32>
    %212 = arith.addf %202, %211 : vector<32x16xf32>
    %c21_i32 = arith.constant 21 : i32
    %213 = arith.addi %1, %c21_i32 : i32
    %c0_104 = arith.constant 0 : index
    %214 = arith.index_cast %213 : i32 to index
    %c0_105 = arith.constant 0 : index
    %215 = vector.load %arg2[%c0_104, %214, %c0_105] : memref<1x63x24xf32, #tpu.memory_space<vmem>>, vector<1x32x24xf32>
    %216 = vector.shape_cast %215 : vector<1x32x24xf32> to vector<32x24xf32>
    %217 = arith.truncf %216 : vector<32x24xf32> to vector<32x24xbf16>
    %218 = arith.index_cast %c21_i32 : i32 to index
    %c0_106 = arith.constant 0 : index
    %c0_107 = arith.constant 0 : index
    %219 = vector.load %arg3[%218, %c0_106, %c0_107] : memref<32x24x16xbf16, #tpu.memory_space<vmem>>, vector<1x24x16xbf16>
    %220 = vector.shape_cast %219 : vector<1x24x16xbf16> to vector<24x16xbf16>
    %cst_108 = arith.constant dense<0.000000e+00> : vector<32x16xf32>
    %221 = tpu.matmul %217, %220, %cst_108 {dimension_numbers = #tpu.dot_dimension_numbers<[1], [0], [0], [1], [0, 0, 1, 1], [], []>} : vector<32x24xbf16>, vector<24x16xbf16>, vector<32x16xf32> -> vector<32x16xf32>
    %222 = arith.addf %212, %221 : vector<32x16xf32>
    %c22_i32 = arith.constant 22 : i32
    %223 = arith.addi %1, %c22_i32 : i32
    %c0_109 = arith.constant 0 : index
    %224 = arith.index_cast %223 : i32 to index
    %c0_110 = arith.constant 0 : index
    %225 = vector.load %arg2[%c0_109, %224, %c0_110] : memref<1x63x24xf32, #tpu.memory_space<vmem>>, vector<1x32x24xf32>
    %226 = vector.shape_cast %225 : vector<1x32x24xf32> to vector<32x24xf32>
    %227 = arith.truncf %226 : vector<32x24xf32> to vector<32x24xbf16>
    %228 = arith.index_cast %c22_i32 : i32 to index
    %c0_111 = arith.constant 0 : index
    %c0_112 = arith.constant 0 : index
    %229 = vector.load %arg3[%228, %c0_111, %c0_112] : memref<32x24x16xbf16, #tpu.memory_space<vmem>>, vector<1x24x16xbf16>
    %230 = vector.shape_cast %229 : vector<1x24x16xbf16> to vector<24x16xbf16>
    %cst_113 = arith.constant dense<0.000000e+00> : vector<32x16xf32>
    %231 = tpu.matmul %227, %230, %cst_113 {dimension_numbers = #tpu.dot_dimension_numbers<[1], [0], [0], [1], [0, 0, 1, 1], [], []>} : vector<32x24xbf16>, vector<24x16xbf16>, vector<32x16xf32> -> vector<32x16xf32>
    %232 = arith.addf %222, %231 : vector<32x16xf32>
    %c23_i32 = arith.constant 23 : i32
    %233 = arith.addi %1, %c23_i32 : i32
    %c0_114 = arith.constant 0 : index
    %234 = arith.index_cast %233 : i32 to index
    %c0_115 = arith.constant 0 : index
    %235 = vector.load %arg2[%c0_114, %234, %c0_115] : memref<1x63x24xf32, #tpu.memory_space<vmem>>, vector<1x32x24xf32>
    %236 = vector.shape_cast %235 : vector<1x32x24xf32> to vector<32x24xf32>
    %237 = arith.truncf %236 : vector<32x24xf32> to vector<32x24xbf16>
    %238 = arith.index_cast %c23_i32 : i32 to index
    %c0_116 = arith.constant 0 : index
    %c0_117 = arith.constant 0 : index
    %239 = vector.load %arg3[%238, %c0_116, %c0_117] : memref<32x24x16xbf16, #tpu.memory_space<vmem>>, vector<1x24x16xbf16>
    %240 = vector.shape_cast %239 : vector<1x24x16xbf16> to vector<24x16xbf16>
    %cst_118 = arith.constant dense<0.000000e+00> : vector<32x16xf32>
    %241 = tpu.matmul %237, %240, %cst_118 {dimension_numbers = #tpu.dot_dimension_numbers<[1], [0], [0], [1], [0, 0, 1, 1], [], []>} : vector<32x24xbf16>, vector<24x16xbf16>, vector<32x16xf32> -> vector<32x16xf32>
    %242 = arith.addf %232, %241 : vector<32x16xf32>
    %c24_i32 = arith.constant 24 : i32
    %243 = arith.addi %1, %c24_i32 : i32
    %c0_119 = arith.constant 0 : index
    %244 = arith.index_cast %243 : i32 to index
    %c0_120 = arith.constant 0 : index
    %245 = vector.load %arg2[%c0_119, %244, %c0_120] : memref<1x63x24xf32, #tpu.memory_space<vmem>>, vector<1x32x24xf32>
    %246 = vector.shape_cast %245 : vector<1x32x24xf32> to vector<32x24xf32>
    %247 = arith.truncf %246 : vector<32x24xf32> to vector<32x24xbf16>
    %248 = arith.index_cast %c24_i32 : i32 to index
    %c0_121 = arith.constant 0 : index
    %c0_122 = arith.constant 0 : index
    %249 = vector.load %arg3[%248, %c0_121, %c0_122] : memref<32x24x16xbf16, #tpu.memory_space<vmem>>, vector<1x24x16xbf16>
    %250 = vector.shape_cast %249 : vector<1x24x16xbf16> to vector<24x16xbf16>
    %cst_123 = arith.constant dense<0.000000e+00> : vector<32x16xf32>
    %251 = tpu.matmul %247, %250, %cst_123 {dimension_numbers = #tpu.dot_dimension_numbers<[1], [0], [0], [1], [0, 0, 1, 1], [], []>} : vector<32x24xbf16>, vector<24x16xbf16>, vector<32x16xf32> -> vector<32x16xf32>
    %252 = arith.addf %242, %251 : vector<32x16xf32>
    %c25_i32 = arith.constant 25 : i32
    %253 = arith.addi %1, %c25_i32 : i32
    %c0_124 = arith.constant 0 : index
    %254 = arith.index_cast %253 : i32 to index
    %c0_125 = arith.constant 0 : index
    %255 = vector.load %arg2[%c0_124, %254, %c0_125] : memref<1x63x24xf32, #tpu.memory_space<vmem>>, vector<1x32x24xf32>
    %256 = vector.shape_cast %255 : vector<1x32x24xf32> to vector<32x24xf32>
    %257 = arith.truncf %256 : vector<32x24xf32> to vector<32x24xbf16>
    %258 = arith.index_cast %c25_i32 : i32 to index
    %c0_126 = arith.constant 0 : index
    %c0_127 = arith.constant 0 : index
    %259 = vector.load %arg3[%258, %c0_126, %c0_127] : memref<32x24x16xbf16, #tpu.memory_space<vmem>>, vector<1x24x16xbf16>
    %260 = vector.shape_cast %259 : vector<1x24x16xbf16> to vector<24x16xbf16>
    %cst_128 = arith.constant dense<0.000000e+00> : vector<32x16xf32>
    %261 = tpu.matmul %257, %260, %cst_128 {dimension_numbers = #tpu.dot_dimension_numbers<[1], [0], [0], [1], [0, 0, 1, 1], [], []>} : vector<32x24xbf16>, vector<24x16xbf16>, vector<32x16xf32> -> vector<32x16xf32>
    %262 = arith.addf %252, %261 : vector<32x16xf32>
    %c26_i32 = arith.constant 26 : i32
    %263 = arith.addi %1, %c26_i32 : i32
    %c0_129 = arith.constant 0 : index
    %264 = arith.index_cast %263 : i32 to index
    %c0_130 = arith.constant 0 : index
    %265 = vector.load %arg2[%c0_129, %264, %c0_130] : memref<1x63x24xf32, #tpu.memory_space<vmem>>, vector<1x32x24xf32>
    %266 = vector.shape_cast %265 : vector<1x32x24xf32> to vector<32x24xf32>
    %267 = arith.truncf %266 : vector<32x24xf32> to vector<32x24xbf16>
    %268 = arith.index_cast %c26_i32 : i32 to index
    %c0_131 = arith.constant 0 : index
    %c0_132 = arith.constant 0 : index
    %269 = vector.load %arg3[%268, %c0_131, %c0_132] : memref<32x24x16xbf16, #tpu.memory_space<vmem>>, vector<1x24x16xbf16>
    %270 = vector.shape_cast %269 : vector<1x24x16xbf16> to vector<24x16xbf16>
    %cst_133 = arith.constant dense<0.000000e+00> : vector<32x16xf32>
    %271 = tpu.matmul %267, %270, %cst_133 {dimension_numbers = #tpu.dot_dimension_numbers<[1], [0], [0], [1], [0, 0, 1, 1], [], []>} : vector<32x24xbf16>, vector<24x16xbf16>, vector<32x16xf32> -> vector<32x16xf32>
    %272 = arith.addf %262, %271 : vector<32x16xf32>
    %c27_i32 = arith.constant 27 : i32
    %273 = arith.addi %1, %c27_i32 : i32
    %c0_134 = arith.constant 0 : index
    %274 = arith.index_cast %273 : i32 to index
    %c0_135 = arith.constant 0 : index
    %275 = vector.load %arg2[%c0_134, %274, %c0_135] : memref<1x63x24xf32, #tpu.memory_space<vmem>>, vector<1x32x24xf32>
    %276 = vector.shape_cast %275 : vector<1x32x24xf32> to vector<32x24xf32>
    %277 = arith.truncf %276 : vector<32x24xf32> to vector<32x24xbf16>
    %278 = arith.index_cast %c27_i32 : i32 to index
    %c0_136 = arith.constant 0 : index
    %c0_137 = arith.constant 0 : index
    %279 = vector.load %arg3[%278, %c0_136, %c0_137] : memref<32x24x16xbf16, #tpu.memory_space<vmem>>, vector<1x24x16xbf16>
    %280 = vector.shape_cast %279 : vector<1x24x16xbf16> to vector<24x16xbf16>
    %cst_138 = arith.constant dense<0.000000e+00> : vector<32x16xf32>
    %281 = tpu.matmul %277, %280, %cst_138 {dimension_numbers = #tpu.dot_dimension_numbers<[1], [0], [0], [1], [0, 0, 1, 1], [], []>} : vector<32x24xbf16>, vector<24x16xbf16>, vector<32x16xf32> -> vector<32x16xf32>
    %282 = arith.addf %272, %281 : vector<32x16xf32>
    %c28_i32 = arith.constant 28 : i32
    %283 = arith.addi %1, %c28_i32 : i32
    %c0_139 = arith.constant 0 : index
    %284 = arith.index_cast %283 : i32 to index
    %c0_140 = arith.constant 0 : index
    %285 = vector.load %arg2[%c0_139, %284, %c0_140] : memref<1x63x24xf32, #tpu.memory_space<vmem>>, vector<1x32x24xf32>
    %286 = vector.shape_cast %285 : vector<1x32x24xf32> to vector<32x24xf32>
    %287 = arith.truncf %286 : vector<32x24xf32> to vector<32x24xbf16>
    %288 = arith.index_cast %c28_i32 : i32 to index
    %c0_141 = arith.constant 0 : index
    %c0_142 = arith.constant 0 : index
    %289 = vector.load %arg3[%288, %c0_141, %c0_142] : memref<32x24x16xbf16, #tpu.memory_space<vmem>>, vector<1x24x16xbf16>
    %290 = vector.shape_cast %289 : vector<1x24x16xbf16> to vector<24x16xbf16>
    %cst_143 = arith.constant dense<0.000000e+00> : vector<32x16xf32>
    %291 = tpu.matmul %287, %290, %cst_143 {dimension_numbers = #tpu.dot_dimension_numbers<[1], [0], [0], [1], [0, 0, 1, 1], [], []>} : vector<32x24xbf16>, vector<24x16xbf16>, vector<32x16xf32> -> vector<32x16xf32>
    %292 = arith.addf %282, %291 : vector<32x16xf32>
    %c29_i32 = arith.constant 29 : i32
    %293 = arith.addi %1, %c29_i32 : i32
    %c0_144 = arith.constant 0 : index
    %294 = arith.index_cast %293 : i32 to index
    %c0_145 = arith.constant 0 : index
    %295 = vector.load %arg2[%c0_144, %294, %c0_145] : memref<1x63x24xf32, #tpu.memory_space<vmem>>, vector<1x32x24xf32>
    %296 = vector.shape_cast %295 : vector<1x32x24xf32> to vector<32x24xf32>
    %297 = arith.truncf %296 : vector<32x24xf32> to vector<32x24xbf16>
    %298 = arith.index_cast %c29_i32 : i32 to index
    %c0_146 = arith.constant 0 : index
    %c0_147 = arith.constant 0 : index
    %299 = vector.load %arg3[%298, %c0_146, %c0_147] : memref<32x24x16xbf16, #tpu.memory_space<vmem>>, vector<1x24x16xbf16>
    %300 = vector.shape_cast %299 : vector<1x24x16xbf16> to vector<24x16xbf16>
    %cst_148 = arith.constant dense<0.000000e+00> : vector<32x16xf32>
    %301 = tpu.matmul %297, %300, %cst_148 {dimension_numbers = #tpu.dot_dimension_numbers<[1], [0], [0], [1], [0, 0, 1, 1], [], []>} : vector<32x24xbf16>, vector<24x16xbf16>, vector<32x16xf32> -> vector<32x16xf32>
    %302 = arith.addf %292, %301 : vector<32x16xf32>
    %c30_i32 = arith.constant 30 : i32
    %303 = arith.addi %1, %c30_i32 : i32
    %c0_149 = arith.constant 0 : index
    %304 = arith.index_cast %303 : i32 to index
    %c0_150 = arith.constant 0 : index
    %305 = vector.load %arg2[%c0_149, %304, %c0_150] : memref<1x63x24xf32, #tpu.memory_space<vmem>>, vector<1x32x24xf32>
    %306 = vector.shape_cast %305 : vector<1x32x24xf32> to vector<32x24xf32>
    %307 = arith.truncf %306 : vector<32x24xf32> to vector<32x24xbf16>
    %308 = arith.index_cast %c30_i32 : i32 to index
    %c0_151 = arith.constant 0 : index
    %c0_152 = arith.constant 0 : index
    %309 = vector.load %arg3[%308, %c0_151, %c0_152] : memref<32x24x16xbf16, #tpu.memory_space<vmem>>, vector<1x24x16xbf16>
    %310 = vector.shape_cast %309 : vector<1x24x16xbf16> to vector<24x16xbf16>
    %cst_153 = arith.constant dense<0.000000e+00> : vector<32x16xf32>
    %311 = tpu.matmul %307, %310, %cst_153 {dimension_numbers = #tpu.dot_dimension_numbers<[1], [0], [0], [1], [0, 0, 1, 1], [], []>} : vector<32x24xbf16>, vector<24x16xbf16>, vector<32x16xf32> -> vector<32x16xf32>
    %312 = arith.addf %302, %311 : vector<32x16xf32>
    %c31_i32 = arith.constant 31 : i32
    %313 = arith.addi %1, %c31_i32 : i32
    %c0_154 = arith.constant 0 : index
    %314 = arith.index_cast %313 : i32 to index
    %c0_155 = arith.constant 0 : index
    %315 = vector.load %arg2[%c0_154, %314, %c0_155] : memref<1x63x24xf32, #tpu.memory_space<vmem>>, vector<1x32x24xf32>
    %316 = vector.shape_cast %315 : vector<1x32x24xf32> to vector<32x24xf32>
    %317 = arith.truncf %316 : vector<32x24xf32> to vector<32x24xbf16>
    %318 = arith.index_cast %c31_i32 : i32 to index
    %c0_156 = arith.constant 0 : index
    %c0_157 = arith.constant 0 : index
    %319 = vector.load %arg3[%318, %c0_156, %c0_157] : memref<32x24x16xbf16, #tpu.memory_space<vmem>>, vector<1x24x16xbf16>
    %320 = vector.shape_cast %319 : vector<1x24x16xbf16> to vector<24x16xbf16>
    %cst_158 = arith.constant dense<0.000000e+00> : vector<32x16xf32>
    %321 = tpu.matmul %317, %320, %cst_158 {dimension_numbers = #tpu.dot_dimension_numbers<[1], [0], [0], [1], [0, 0, 1, 1], [], []>} : vector<32x24xbf16>, vector<24x16xbf16>, vector<32x16xf32> -> vector<32x16xf32>
    %322 = arith.addf %312, %321 : vector<32x16xf32>
    %c32_i32_159 = arith.constant 32 : i32
    %c0_160 = arith.constant 0 : index
    %c0_161 = arith.constant 0 : index
    %323 = vector.load %arg4[%c0_160, %c0_161] : memref<1x16xf32, #tpu.memory_space<vmem>>, vector<1x16xf32>
    %324 = vector.broadcast %323 : vector<1x16xf32> to vector<32x16xf32>
    %325 = arith.mulf %322, %324 : vector<32x16xf32>
    %c0_162 = arith.constant 0 : index
    %c0_163 = arith.constant 0 : index
    %326 = vector.load %arg5[%c0_162, %c0_163] : memref<1x16xf32, #tpu.memory_space<vmem>>, vector<1x16xf32>
    %327 = vector.broadcast %326 : vector<1x16xf32> to vector<32x16xf32>
    %328 = arith.addf %325, %327 : vector<32x16xf32>
    %cst_164 = arith.constant 0.000000e+00 : f32
    %329 = vector.broadcast %cst_164 : f32 to vector<32x16xf32>
    %330 = arith.maximumf %328, %329 : vector<32x16xf32>
    %c0_165 = arith.constant 0 : index
    %c0_166 = arith.constant 0 : index
    %c0_167 = arith.constant 0 : index
    %331 = vector.load %arg6[%c0_165, %c0_166, %c0_167] : memref<1x32x16xf32, #tpu.memory_space<vmem>>, vector<1x32x16xf32>
    %332 = vector.shape_cast %331 : vector<1x32x16xf32> to vector<32x16xf32>
    %333 = vector.shape_cast %330 : vector<32x16xf32> to vector<1x32x16xf32>
    tpu.vector_store %arg6[%c0_165, %c0_166, %c0_167], %333 {strides = array<i32>} : memref<1x32x16xf32, #tpu.memory_space<vmem>>, vector<1x32x16xf32>,
    return
  }
  func.func @transform_0(%arg0: i32, %arg1: i32) -> (i32, i32, i32) {
    %c0_i32 = arith.constant 0 : i32
    %c0_i32_0 = arith.constant 0 : i32
    %c0_i32_1 = arith.constant 0 : i32
    return %arg0, %c0_i32, %c0_i32_0 : i32, i32, i32
  }
  func.func @transform_1(%arg0: i32, %arg1: i32) -> (i32, i32, i32) {
    %c0_i32 = arith.constant 0 : i32
    %c0_i32_0 = arith.constant 0 : i32
    %c0_i32_1 = arith.constant 0 : i32
    %c0_i32_2 = arith.constant 0 : i32
    return %c0_i32, %c0_i32_0, %c0_i32_1 : i32, i32, i32
  }
  func.func @transform_2(%arg0: i32, %arg1: i32) -> (i32, i32) {
    %c0_i32 = arith.constant 0 : i32
    %c0_i32_0 = arith.constant 0 : i32
    %c0_i32_1 = arith.constant 0 : i32
    return %c0_i32, %c0_i32_0 : i32, i32
  }
  func.func @transform_3(%arg0: i32, %arg1: i32) -> (i32, i32) {
    %c0_i32 = arith.constant 0 : i32
    %c0_i32_0 = arith.constant 0 : i32
    %c0_i32_1 = arith.constant 0 : i32
    return %c0_i32, %c0_i32_0 : i32, i32
  }
  func.func @transform_4(%arg0: i32, %arg1: i32) -> (i32, i32, i32) {
    %c0_i32 = arith.constant 0 : i32
    %c0_i32_0 = arith.constant 0 : i32
    return %arg0, %arg1, %c0_i32 : i32, i32, i32
  }
}

module attributes {stable_mosaic.version = 11 : i64} {
  func.func @_conv_s1_kernel(%arg0: i32, %arg1: i32, %arg2: memref<1x79x32xf32, #tpu.memory_space<vmem>>, %arg3: memref<16x32x1xbf16, #tpu.memory_space<vmem>>, %arg4: memref<1x1xf32, #tpu.memory_space<vmem>>, %arg5: memref<1x1xf32, #tpu.memory_space<vmem>>, %arg6: memref<1x64x1xf32, #tpu.memory_space<vmem>>) attributes {dimension_semantics = [#tpu.dimension_semantics<parallel>, #tpu.dimension_semantics<parallel>], iteration_bounds = array<i64: 2, 1>, scalar_prefetch = 0 : i64, scratch_operands = 0 : i64, tpu.core_type = #tpu.core_type<tc>, window_params = [{transform_indices = @transform_0, window_bounds = array<i64: 1, 79, 32>}, {pipeline_mode = #tpu.pipeline_mode<synchronous>, transform_indices = @transform_1, window_bounds = array<i64: 16, 32, 1>}, {pipeline_mode = #tpu.pipeline_mode<synchronous>, transform_indices = @transform_2, window_bounds = array<i64: 1, 1>}, {pipeline_mode = #tpu.pipeline_mode<synchronous>, transform_indices = @transform_3, window_bounds = array<i64: 1, 1>}, {transform_indices = @transform_4, window_bounds = array<i64: 1, 64, 1>}]} {
    %c64_i32 = arith.constant 64 : i32
    %0 = arith.muli %arg1, %c64_i32 : i32
    %1 = tpu.assume_multiple %0, 8 : i32
    %cst = arith.constant 0.000000e+00 : f32
    %2 = vector.broadcast %cst : f32 to vector<64x1xf32>
    %c0_i32 = arith.constant 0 : i32
    %3 = arith.addi %1, %c0_i32 : i32
    %c0 = arith.constant 0 : index
    %4 = arith.index_cast %3 : i32 to index
    %c0_0 = arith.constant 0 : index
    %5 = vector.load %arg2[%c0, %4, %c0_0] : memref<1x79x32xf32, #tpu.memory_space<vmem>>, vector<1x64x32xf32>
    %6 = vector.shape_cast %5 : vector<1x64x32xf32> to vector<64x32xf32>
    %7 = arith.truncf %6 : vector<64x32xf32> to vector<64x32xbf16>
    %8 = arith.index_cast %c0_i32 : i32 to index
    %c0_1 = arith.constant 0 : index
    %c0_2 = arith.constant 0 : index
    %9 = vector.load %arg3[%8, %c0_1, %c0_2] : memref<16x32x1xbf16, #tpu.memory_space<vmem>>, vector<1x32x1xbf16>
    %10 = vector.shape_cast %9 : vector<1x32x1xbf16> to vector<32x1xbf16>
    %cst_3 = arith.constant dense<0.000000e+00> : vector<64x1xf32>
    %11 = tpu.matmul %7, %10, %cst_3 {dimension_numbers = #tpu.dot_dimension_numbers<[1], [0], [0], [1], [0, 0, 1, 1], [], []>} : vector<64x32xbf16>, vector<32x1xbf16>, vector<64x1xf32> -> vector<64x1xf32>
    %12 = arith.addf %2, %11 : vector<64x1xf32>
    %c1_i32 = arith.constant 1 : i32
    %13 = arith.addi %1, %c1_i32 : i32
    %c0_4 = arith.constant 0 : index
    %14 = arith.index_cast %13 : i32 to index
    %c0_5 = arith.constant 0 : index
    %15 = vector.load %arg2[%c0_4, %14, %c0_5] : memref<1x79x32xf32, #tpu.memory_space<vmem>>, vector<1x64x32xf32>
    %16 = vector.shape_cast %15 : vector<1x64x32xf32> to vector<64x32xf32>
    %17 = arith.truncf %16 : vector<64x32xf32> to vector<64x32xbf16>
    %18 = arith.index_cast %c1_i32 : i32 to index
    %c0_6 = arith.constant 0 : index
    %c0_7 = arith.constant 0 : index
    %19 = vector.load %arg3[%18, %c0_6, %c0_7] : memref<16x32x1xbf16, #tpu.memory_space<vmem>>, vector<1x32x1xbf16>
    %20 = vector.shape_cast %19 : vector<1x32x1xbf16> to vector<32x1xbf16>
    %cst_8 = arith.constant dense<0.000000e+00> : vector<64x1xf32>
    %21 = tpu.matmul %17, %20, %cst_8 {dimension_numbers = #tpu.dot_dimension_numbers<[1], [0], [0], [1], [0, 0, 1, 1], [], []>} : vector<64x32xbf16>, vector<32x1xbf16>, vector<64x1xf32> -> vector<64x1xf32>
    %22 = arith.addf %12, %21 : vector<64x1xf32>
    %c2_i32 = arith.constant 2 : i32
    %23 = arith.addi %1, %c2_i32 : i32
    %c0_9 = arith.constant 0 : index
    %24 = arith.index_cast %23 : i32 to index
    %c0_10 = arith.constant 0 : index
    %25 = vector.load %arg2[%c0_9, %24, %c0_10] : memref<1x79x32xf32, #tpu.memory_space<vmem>>, vector<1x64x32xf32>
    %26 = vector.shape_cast %25 : vector<1x64x32xf32> to vector<64x32xf32>
    %27 = arith.truncf %26 : vector<64x32xf32> to vector<64x32xbf16>
    %28 = arith.index_cast %c2_i32 : i32 to index
    %c0_11 = arith.constant 0 : index
    %c0_12 = arith.constant 0 : index
    %29 = vector.load %arg3[%28, %c0_11, %c0_12] : memref<16x32x1xbf16, #tpu.memory_space<vmem>>, vector<1x32x1xbf16>
    %30 = vector.shape_cast %29 : vector<1x32x1xbf16> to vector<32x1xbf16>
    %cst_13 = arith.constant dense<0.000000e+00> : vector<64x1xf32>
    %31 = tpu.matmul %27, %30, %cst_13 {dimension_numbers = #tpu.dot_dimension_numbers<[1], [0], [0], [1], [0, 0, 1, 1], [], []>} : vector<64x32xbf16>, vector<32x1xbf16>, vector<64x1xf32> -> vector<64x1xf32>
    %32 = arith.addf %22, %31 : vector<64x1xf32>
    %c3_i32 = arith.constant 3 : i32
    %33 = arith.addi %1, %c3_i32 : i32
    %c0_14 = arith.constant 0 : index
    %34 = arith.index_cast %33 : i32 to index
    %c0_15 = arith.constant 0 : index
    %35 = vector.load %arg2[%c0_14, %34, %c0_15] : memref<1x79x32xf32, #tpu.memory_space<vmem>>, vector<1x64x32xf32>
    %36 = vector.shape_cast %35 : vector<1x64x32xf32> to vector<64x32xf32>
    %37 = arith.truncf %36 : vector<64x32xf32> to vector<64x32xbf16>
    %38 = arith.index_cast %c3_i32 : i32 to index
    %c0_16 = arith.constant 0 : index
    %c0_17 = arith.constant 0 : index
    %39 = vector.load %arg3[%38, %c0_16, %c0_17] : memref<16x32x1xbf16, #tpu.memory_space<vmem>>, vector<1x32x1xbf16>
    %40 = vector.shape_cast %39 : vector<1x32x1xbf16> to vector<32x1xbf16>
    %cst_18 = arith.constant dense<0.000000e+00> : vector<64x1xf32>
    %41 = tpu.matmul %37, %40, %cst_18 {dimension_numbers = #tpu.dot_dimension_numbers<[1], [0], [0], [1], [0, 0, 1, 1], [], []>} : vector<64x32xbf16>, vector<32x1xbf16>, vector<64x1xf32> -> vector<64x1xf32>
    %42 = arith.addf %32, %41 : vector<64x1xf32>
    %c4_i32 = arith.constant 4 : i32
    %43 = arith.addi %1, %c4_i32 : i32
    %c0_19 = arith.constant 0 : index
    %44 = arith.index_cast %43 : i32 to index
    %c0_20 = arith.constant 0 : index
    %45 = vector.load %arg2[%c0_19, %44, %c0_20] : memref<1x79x32xf32, #tpu.memory_space<vmem>>, vector<1x64x32xf32>
    %46 = vector.shape_cast %45 : vector<1x64x32xf32> to vector<64x32xf32>
    %47 = arith.truncf %46 : vector<64x32xf32> to vector<64x32xbf16>
    %48 = arith.index_cast %c4_i32 : i32 to index
    %c0_21 = arith.constant 0 : index
    %c0_22 = arith.constant 0 : index
    %49 = vector.load %arg3[%48, %c0_21, %c0_22] : memref<16x32x1xbf16, #tpu.memory_space<vmem>>, vector<1x32x1xbf16>
    %50 = vector.shape_cast %49 : vector<1x32x1xbf16> to vector<32x1xbf16>
    %cst_23 = arith.constant dense<0.000000e+00> : vector<64x1xf32>
    %51 = tpu.matmul %47, %50, %cst_23 {dimension_numbers = #tpu.dot_dimension_numbers<[1], [0], [0], [1], [0, 0, 1, 1], [], []>} : vector<64x32xbf16>, vector<32x1xbf16>, vector<64x1xf32> -> vector<64x1xf32>
    %52 = arith.addf %42, %51 : vector<64x1xf32>
    %c5_i32 = arith.constant 5 : i32
    %53 = arith.addi %1, %c5_i32 : i32
    %c0_24 = arith.constant 0 : index
    %54 = arith.index_cast %53 : i32 to index
    %c0_25 = arith.constant 0 : index
    %55 = vector.load %arg2[%c0_24, %54, %c0_25] : memref<1x79x32xf32, #tpu.memory_space<vmem>>, vector<1x64x32xf32>
    %56 = vector.shape_cast %55 : vector<1x64x32xf32> to vector<64x32xf32>
    %57 = arith.truncf %56 : vector<64x32xf32> to vector<64x32xbf16>
    %58 = arith.index_cast %c5_i32 : i32 to index
    %c0_26 = arith.constant 0 : index
    %c0_27 = arith.constant 0 : index
    %59 = vector.load %arg3[%58, %c0_26, %c0_27] : memref<16x32x1xbf16, #tpu.memory_space<vmem>>, vector<1x32x1xbf16>
    %60 = vector.shape_cast %59 : vector<1x32x1xbf16> to vector<32x1xbf16>
    %cst_28 = arith.constant dense<0.000000e+00> : vector<64x1xf32>
    %61 = tpu.matmul %57, %60, %cst_28 {dimension_numbers = #tpu.dot_dimension_numbers<[1], [0], [0], [1], [0, 0, 1, 1], [], []>} : vector<64x32xbf16>, vector<32x1xbf16>, vector<64x1xf32> -> vector<64x1xf32>
    %62 = arith.addf %52, %61 : vector<64x1xf32>
    %c6_i32 = arith.constant 6 : i32
    %63 = arith.addi %1, %c6_i32 : i32
    %c0_29 = arith.constant 0 : index
    %64 = arith.index_cast %63 : i32 to index
    %c0_30 = arith.constant 0 : index
    %65 = vector.load %arg2[%c0_29, %64, %c0_30] : memref<1x79x32xf32, #tpu.memory_space<vmem>>, vector<1x64x32xf32>
    %66 = vector.shape_cast %65 : vector<1x64x32xf32> to vector<64x32xf32>
    %67 = arith.truncf %66 : vector<64x32xf32> to vector<64x32xbf16>
    %68 = arith.index_cast %c6_i32 : i32 to index
    %c0_31 = arith.constant 0 : index
    %c0_32 = arith.constant 0 : index
    %69 = vector.load %arg3[%68, %c0_31, %c0_32] : memref<16x32x1xbf16, #tpu.memory_space<vmem>>, vector<1x32x1xbf16>
    %70 = vector.shape_cast %69 : vector<1x32x1xbf16> to vector<32x1xbf16>
    %cst_33 = arith.constant dense<0.000000e+00> : vector<64x1xf32>
    %71 = tpu.matmul %67, %70, %cst_33 {dimension_numbers = #tpu.dot_dimension_numbers<[1], [0], [0], [1], [0, 0, 1, 1], [], []>} : vector<64x32xbf16>, vector<32x1xbf16>, vector<64x1xf32> -> vector<64x1xf32>
    %72 = arith.addf %62, %71 : vector<64x1xf32>
    %c7_i32 = arith.constant 7 : i32
    %73 = arith.addi %1, %c7_i32 : i32
    %c0_34 = arith.constant 0 : index
    %74 = arith.index_cast %73 : i32 to index
    %c0_35 = arith.constant 0 : index
    %75 = vector.load %arg2[%c0_34, %74, %c0_35] : memref<1x79x32xf32, #tpu.memory_space<vmem>>, vector<1x64x32xf32>
    %76 = vector.shape_cast %75 : vector<1x64x32xf32> to vector<64x32xf32>
    %77 = arith.truncf %76 : vector<64x32xf32> to vector<64x32xbf16>
    %78 = arith.index_cast %c7_i32 : i32 to index
    %c0_36 = arith.constant 0 : index
    %c0_37 = arith.constant 0 : index
    %79 = vector.load %arg3[%78, %c0_36, %c0_37] : memref<16x32x1xbf16, #tpu.memory_space<vmem>>, vector<1x32x1xbf16>
    %80 = vector.shape_cast %79 : vector<1x32x1xbf16> to vector<32x1xbf16>
    %cst_38 = arith.constant dense<0.000000e+00> : vector<64x1xf32>
    %81 = tpu.matmul %77, %80, %cst_38 {dimension_numbers = #tpu.dot_dimension_numbers<[1], [0], [0], [1], [0, 0, 1, 1], [], []>} : vector<64x32xbf16>, vector<32x1xbf16>, vector<64x1xf32> -> vector<64x1xf32>
    %82 = arith.addf %72, %81 : vector<64x1xf32>
    %c8_i32 = arith.constant 8 : i32
    %83 = arith.addi %1, %c8_i32 : i32
    %c0_39 = arith.constant 0 : index
    %84 = arith.index_cast %83 : i32 to index
    %c0_40 = arith.constant 0 : index
    %85 = vector.load %arg2[%c0_39, %84, %c0_40] : memref<1x79x32xf32, #tpu.memory_space<vmem>>, vector<1x64x32xf32>
    %86 = vector.shape_cast %85 : vector<1x64x32xf32> to vector<64x32xf32>
    %87 = arith.truncf %86 : vector<64x32xf32> to vector<64x32xbf16>
    %88 = arith.index_cast %c8_i32 : i32 to index
    %c0_41 = arith.constant 0 : index
    %c0_42 = arith.constant 0 : index
    %89 = vector.load %arg3[%88, %c0_41, %c0_42] : memref<16x32x1xbf16, #tpu.memory_space<vmem>>, vector<1x32x1xbf16>
    %90 = vector.shape_cast %89 : vector<1x32x1xbf16> to vector<32x1xbf16>
    %cst_43 = arith.constant dense<0.000000e+00> : vector<64x1xf32>
    %91 = tpu.matmul %87, %90, %cst_43 {dimension_numbers = #tpu.dot_dimension_numbers<[1], [0], [0], [1], [0, 0, 1, 1], [], []>} : vector<64x32xbf16>, vector<32x1xbf16>, vector<64x1xf32> -> vector<64x1xf32>
    %92 = arith.addf %82, %91 : vector<64x1xf32>
    %c9_i32 = arith.constant 9 : i32
    %93 = arith.addi %1, %c9_i32 : i32
    %c0_44 = arith.constant 0 : index
    %94 = arith.index_cast %93 : i32 to index
    %c0_45 = arith.constant 0 : index
    %95 = vector.load %arg2[%c0_44, %94, %c0_45] : memref<1x79x32xf32, #tpu.memory_space<vmem>>, vector<1x64x32xf32>
    %96 = vector.shape_cast %95 : vector<1x64x32xf32> to vector<64x32xf32>
    %97 = arith.truncf %96 : vector<64x32xf32> to vector<64x32xbf16>
    %98 = arith.index_cast %c9_i32 : i32 to index
    %c0_46 = arith.constant 0 : index
    %c0_47 = arith.constant 0 : index
    %99 = vector.load %arg3[%98, %c0_46, %c0_47] : memref<16x32x1xbf16, #tpu.memory_space<vmem>>, vector<1x32x1xbf16>
    %100 = vector.shape_cast %99 : vector<1x32x1xbf16> to vector<32x1xbf16>
    %cst_48 = arith.constant dense<0.000000e+00> : vector<64x1xf32>
    %101 = tpu.matmul %97, %100, %cst_48 {dimension_numbers = #tpu.dot_dimension_numbers<[1], [0], [0], [1], [0, 0, 1, 1], [], []>} : vector<64x32xbf16>, vector<32x1xbf16>, vector<64x1xf32> -> vector<64x1xf32>
    %102 = arith.addf %92, %101 : vector<64x1xf32>
    %c10_i32 = arith.constant 10 : i32
    %103 = arith.addi %1, %c10_i32 : i32
    %c0_49 = arith.constant 0 : index
    %104 = arith.index_cast %103 : i32 to index
    %c0_50 = arith.constant 0 : index
    %105 = vector.load %arg2[%c0_49, %104, %c0_50] : memref<1x79x32xf32, #tpu.memory_space<vmem>>, vector<1x64x32xf32>
    %106 = vector.shape_cast %105 : vector<1x64x32xf32> to vector<64x32xf32>
    %107 = arith.truncf %106 : vector<64x32xf32> to vector<64x32xbf16>
    %108 = arith.index_cast %c10_i32 : i32 to index
    %c0_51 = arith.constant 0 : index
    %c0_52 = arith.constant 0 : index
    %109 = vector.load %arg3[%108, %c0_51, %c0_52] : memref<16x32x1xbf16, #tpu.memory_space<vmem>>, vector<1x32x1xbf16>
    %110 = vector.shape_cast %109 : vector<1x32x1xbf16> to vector<32x1xbf16>
    %cst_53 = arith.constant dense<0.000000e+00> : vector<64x1xf32>
    %111 = tpu.matmul %107, %110, %cst_53 {dimension_numbers = #tpu.dot_dimension_numbers<[1], [0], [0], [1], [0, 0, 1, 1], [], []>} : vector<64x32xbf16>, vector<32x1xbf16>, vector<64x1xf32> -> vector<64x1xf32>
    %112 = arith.addf %102, %111 : vector<64x1xf32>
    %c11_i32 = arith.constant 11 : i32
    %113 = arith.addi %1, %c11_i32 : i32
    %c0_54 = arith.constant 0 : index
    %114 = arith.index_cast %113 : i32 to index
    %c0_55 = arith.constant 0 : index
    %115 = vector.load %arg2[%c0_54, %114, %c0_55] : memref<1x79x32xf32, #tpu.memory_space<vmem>>, vector<1x64x32xf32>
    %116 = vector.shape_cast %115 : vector<1x64x32xf32> to vector<64x32xf32>
    %117 = arith.truncf %116 : vector<64x32xf32> to vector<64x32xbf16>
    %118 = arith.index_cast %c11_i32 : i32 to index
    %c0_56 = arith.constant 0 : index
    %c0_57 = arith.constant 0 : index
    %119 = vector.load %arg3[%118, %c0_56, %c0_57] : memref<16x32x1xbf16, #tpu.memory_space<vmem>>, vector<1x32x1xbf16>
    %120 = vector.shape_cast %119 : vector<1x32x1xbf16> to vector<32x1xbf16>
    %cst_58 = arith.constant dense<0.000000e+00> : vector<64x1xf32>
    %121 = tpu.matmul %117, %120, %cst_58 {dimension_numbers = #tpu.dot_dimension_numbers<[1], [0], [0], [1], [0, 0, 1, 1], [], []>} : vector<64x32xbf16>, vector<32x1xbf16>, vector<64x1xf32> -> vector<64x1xf32>
    %122 = arith.addf %112, %121 : vector<64x1xf32>
    %c12_i32 = arith.constant 12 : i32
    %123 = arith.addi %1, %c12_i32 : i32
    %c0_59 = arith.constant 0 : index
    %124 = arith.index_cast %123 : i32 to index
    %c0_60 = arith.constant 0 : index
    %125 = vector.load %arg2[%c0_59, %124, %c0_60] : memref<1x79x32xf32, #tpu.memory_space<vmem>>, vector<1x64x32xf32>
    %126 = vector.shape_cast %125 : vector<1x64x32xf32> to vector<64x32xf32>
    %127 = arith.truncf %126 : vector<64x32xf32> to vector<64x32xbf16>
    %128 = arith.index_cast %c12_i32 : i32 to index
    %c0_61 = arith.constant 0 : index
    %c0_62 = arith.constant 0 : index
    %129 = vector.load %arg3[%128, %c0_61, %c0_62] : memref<16x32x1xbf16, #tpu.memory_space<vmem>>, vector<1x32x1xbf16>
    %130 = vector.shape_cast %129 : vector<1x32x1xbf16> to vector<32x1xbf16>
    %cst_63 = arith.constant dense<0.000000e+00> : vector<64x1xf32>
    %131 = tpu.matmul %127, %130, %cst_63 {dimension_numbers = #tpu.dot_dimension_numbers<[1], [0], [0], [1], [0, 0, 1, 1], [], []>} : vector<64x32xbf16>, vector<32x1xbf16>, vector<64x1xf32> -> vector<64x1xf32>
    %132 = arith.addf %122, %131 : vector<64x1xf32>
    %c13_i32 = arith.constant 13 : i32
    %133 = arith.addi %1, %c13_i32 : i32
    %c0_64 = arith.constant 0 : index
    %134 = arith.index_cast %133 : i32 to index
    %c0_65 = arith.constant 0 : index
    %135 = vector.load %arg2[%c0_64, %134, %c0_65] : memref<1x79x32xf32, #tpu.memory_space<vmem>>, vector<1x64x32xf32>
    %136 = vector.shape_cast %135 : vector<1x64x32xf32> to vector<64x32xf32>
    %137 = arith.truncf %136 : vector<64x32xf32> to vector<64x32xbf16>
    %138 = arith.index_cast %c13_i32 : i32 to index
    %c0_66 = arith.constant 0 : index
    %c0_67 = arith.constant 0 : index
    %139 = vector.load %arg3[%138, %c0_66, %c0_67] : memref<16x32x1xbf16, #tpu.memory_space<vmem>>, vector<1x32x1xbf16>
    %140 = vector.shape_cast %139 : vector<1x32x1xbf16> to vector<32x1xbf16>
    %cst_68 = arith.constant dense<0.000000e+00> : vector<64x1xf32>
    %141 = tpu.matmul %137, %140, %cst_68 {dimension_numbers = #tpu.dot_dimension_numbers<[1], [0], [0], [1], [0, 0, 1, 1], [], []>} : vector<64x32xbf16>, vector<32x1xbf16>, vector<64x1xf32> -> vector<64x1xf32>
    %142 = arith.addf %132, %141 : vector<64x1xf32>
    %c14_i32 = arith.constant 14 : i32
    %143 = arith.addi %1, %c14_i32 : i32
    %c0_69 = arith.constant 0 : index
    %144 = arith.index_cast %143 : i32 to index
    %c0_70 = arith.constant 0 : index
    %145 = vector.load %arg2[%c0_69, %144, %c0_70] : memref<1x79x32xf32, #tpu.memory_space<vmem>>, vector<1x64x32xf32>
    %146 = vector.shape_cast %145 : vector<1x64x32xf32> to vector<64x32xf32>
    %147 = arith.truncf %146 : vector<64x32xf32> to vector<64x32xbf16>
    %148 = arith.index_cast %c14_i32 : i32 to index
    %c0_71 = arith.constant 0 : index
    %c0_72 = arith.constant 0 : index
    %149 = vector.load %arg3[%148, %c0_71, %c0_72] : memref<16x32x1xbf16, #tpu.memory_space<vmem>>, vector<1x32x1xbf16>
    %150 = vector.shape_cast %149 : vector<1x32x1xbf16> to vector<32x1xbf16>
    %cst_73 = arith.constant dense<0.000000e+00> : vector<64x1xf32>
    %151 = tpu.matmul %147, %150, %cst_73 {dimension_numbers = #tpu.dot_dimension_numbers<[1], [0], [0], [1], [0, 0, 1, 1], [], []>} : vector<64x32xbf16>, vector<32x1xbf16>, vector<64x1xf32> -> vector<64x1xf32>
    %152 = arith.addf %142, %151 : vector<64x1xf32>
    %c15_i32 = arith.constant 15 : i32
    %153 = arith.addi %1, %c15_i32 : i32
    %c0_74 = arith.constant 0 : index
    %154 = arith.index_cast %153 : i32 to index
    %c0_75 = arith.constant 0 : index
    %155 = vector.load %arg2[%c0_74, %154, %c0_75] : memref<1x79x32xf32, #tpu.memory_space<vmem>>, vector<1x64x32xf32>
    %156 = vector.shape_cast %155 : vector<1x64x32xf32> to vector<64x32xf32>
    %157 = arith.truncf %156 : vector<64x32xf32> to vector<64x32xbf16>
    %158 = arith.index_cast %c15_i32 : i32 to index
    %c0_76 = arith.constant 0 : index
    %c0_77 = arith.constant 0 : index
    %159 = vector.load %arg3[%158, %c0_76, %c0_77] : memref<16x32x1xbf16, #tpu.memory_space<vmem>>, vector<1x32x1xbf16>
    %160 = vector.shape_cast %159 : vector<1x32x1xbf16> to vector<32x1xbf16>
    %cst_78 = arith.constant dense<0.000000e+00> : vector<64x1xf32>
    %161 = tpu.matmul %157, %160, %cst_78 {dimension_numbers = #tpu.dot_dimension_numbers<[1], [0], [0], [1], [0, 0, 1, 1], [], []>} : vector<64x32xbf16>, vector<32x1xbf16>, vector<64x1xf32> -> vector<64x1xf32>
    %162 = arith.addf %152, %161 : vector<64x1xf32>
    %c16_i32 = arith.constant 16 : i32
    %c0_79 = arith.constant 0 : index
    %c0_80 = arith.constant 0 : index
    %163 = vector.load %arg4[%c0_79, %c0_80] : memref<1x1xf32, #tpu.memory_space<vmem>>, vector<1x1xf32>
    %164 = vector.broadcast %163 : vector<1x1xf32> to vector<64x1xf32>
    %165 = arith.mulf %162, %164 : vector<64x1xf32>
    %c0_81 = arith.constant 0 : index
    %c0_82 = arith.constant 0 : index
    %166 = vector.load %arg5[%c0_81, %c0_82] : memref<1x1xf32, #tpu.memory_space<vmem>>, vector<1x1xf32>
    %167 = vector.broadcast %166 : vector<1x1xf32> to vector<64x1xf32>
    %168 = arith.addf %165, %167 : vector<64x1xf32>
    %c0_83 = arith.constant 0 : index
    %c0_84 = arith.constant 0 : index
    %c0_85 = arith.constant 0 : index
    %169 = vector.load %arg6[%c0_83, %c0_84, %c0_85] : memref<1x64x1xf32, #tpu.memory_space<vmem>>, vector<1x64x1xf32>
    %170 = vector.shape_cast %169 : vector<1x64x1xf32> to vector<64x1xf32>
    %171 = vector.shape_cast %168 : vector<64x1xf32> to vector<1x64x1xf32>
    tpu.vector_store %arg6[%c0_83, %c0_84, %c0_85], %171 {strides = array<i32>} : memref<1x64x1xf32, #tpu.memory_space<vmem>>, vector<1x64x1xf32>,
    return
  }
  func.func @transform_0(%arg0: i32, %arg1: i32) -> (i32, i32, i32) {
    %c0_i32 = arith.constant 0 : i32
    %c0_i32_0 = arith.constant 0 : i32
    %c0_i32_1 = arith.constant 0 : i32
    return %arg0, %c0_i32, %c0_i32_0 : i32, i32, i32
  }
  func.func @transform_1(%arg0: i32, %arg1: i32) -> (i32, i32, i32) {
    %c0_i32 = arith.constant 0 : i32
    %c0_i32_0 = arith.constant 0 : i32
    %c0_i32_1 = arith.constant 0 : i32
    %c0_i32_2 = arith.constant 0 : i32
    return %c0_i32, %c0_i32_0, %c0_i32_1 : i32, i32, i32
  }
  func.func @transform_2(%arg0: i32, %arg1: i32) -> (i32, i32) {
    %c0_i32 = arith.constant 0 : i32
    %c0_i32_0 = arith.constant 0 : i32
    %c0_i32_1 = arith.constant 0 : i32
    return %c0_i32, %c0_i32_0 : i32, i32
  }
  func.func @transform_3(%arg0: i32, %arg1: i32) -> (i32, i32) {
    %c0_i32 = arith.constant 0 : i32
    %c0_i32_0 = arith.constant 0 : i32
    %c0_i32_1 = arith.constant 0 : i32
    return %c0_i32, %c0_i32_0 : i32, i32
  }
  func.func @transform_4(%arg0: i32, %arg1: i32) -> (i32, i32, i32) {
    %c0_i32 = arith.constant 0 : i32
    %c0_i32_0 = arith.constant 0 : i32
    return %arg0, %arg1, %c0_i32 : i32, i32, i32
  }
}

</mosaic_0001>

<bundles_post_ra>
// kernel: snakenet_forward.5
= control target key start
LH: loop header
LB: loop body
LE: loop exit
PB: predicated region body
PF: predicated region fallthrough
CT: control target
= control target key end

     0   :  { %s1172_s15 = smov 0   ;;  %s1174_s16 = smov 0   ;;  %s1305_s0 = inlined_call_operand.vmem [shape: f32[2,39,2], index: 0, kind: input, shape index: {}]   ;;  %s1306_s1 = inlined_call_operand.vmem [shape: bf16[8,2,16], index: 1, kind: input, shape index: {}]   ;;  %s1307_s2 = inlined_call_operand.vmem [shape: f32[1,16], index: 2, kind: input, shape index: {}]   ;;  %s1308_s3 = inlined_call_operand.vmem [shape: f32[1,16], index: 3, kind: input, shape index: {}]   ;;  %s1309_s4 = inlined_call_operand.vmem [shape: f32[2,32,16], index: 4, kind: output, shape index: {}]  }
   0x1   :  { %s1176_s17 = smov 0  }
   0x2 LB: > { %s26_s18 = sadd.s32 1, %s1141_s16  ;;  %p930_p0 = scmp.ge.s32.totalorder %s1145_s17, 1  ;;  %s1145_s17 = sphi %s1176_s17, %s14_s17   ;;  %s1141_s16 = sphi %s1174_s16, %s1311_s16   ;;  %s1137_s15 = sphi %s1172_s15, %s1310_s15  }
   0x3   : > { %p28_p1 = scmp.ge.s32.totalorder %s26_s18, 2  ;;  %p176_p2 = scmp.lt.s32.totalorder %s1145_s17, 3 }
   0x5   : > { %s1313_s18 = smov (%p28_p1, %s26_s18), 0  ;;  %p177_p3 = pnand %p930_p0, %p176_p2 }
   0x6   : > { %v938_v0 = vld [vmem:[%s1306_s1 + $0x1] sm:$0x1] (!%p177_p3)  ;;  %vm248_vm0 = vcmask (!%p177_p3), 1040384   ;;  %v961_v1 = vld [vmem:[%s1306_s1 + $0x4] sm:$0x1] (!%p177_p3)  ;;  %p206_p4 = scmp.lt.s32.totalorder (!%p177_p3), %s1137_s15, 1 }
   0x7   : > { %180 = sbr.rel (%p177_p3) target bundleno = 283 (0x11b), region = 36  ;;  %1090 = vmatprep.subr.msk.bf16.mxu1 (!%p177_p3), %vm248_vm0, %v938_v0  ;;  %1094 = vmatprep.subr.msk.bf16.mxu0 (!%p177_p3), %vm248_vm0, %v961_v1  ;;  %v250_v2 = vsel (!%p177_p3), %vm248_vm0, %v938_v0, 0  ;;  %v520_v3 = vsel (!%p177_p3), %vm248_vm0, %v961_v1, 0  ;;  %v230_v4 = vld [vmem:[%s1306_s1] sm:$0x1] (!%p177_p3)  ;;  %vm241_vm1 = vcmask (!%p177_p3), 15360  }
   0x8   : > { %1015 = vmatpush3.bf16.msra.mxu1 (!%p177_p3), %v250_v2  ;;  %1039 = vmatpush3.bf16.msra.mxu0 (!%p177_p3), %v520_v3  ;;  %v968_v5 = vld [vmem:[%s1306_s1 + $0x5] sm:$0x1] (!%p177_p3)  ;;  %v308_v15 = vsel (!%p177_p3), %vm248_vm0, %v230_v4, 0  ;;  %v947_v25 = vld [vmem:[%s1306_s1 + $0x2] sm:$0x1] (!%p177_p3)  ;;  %vm817_vm2 = vcmask (!%p177_p3), 130048  }
   0x9   : > { %1091 = vmatprep.subr.msk.bf16.mxu1 (!%p177_p3), %vm248_vm0, %v230_v4  ;;  %1095 = vmatprep.subr.msk.bf16.mxu0 (!%p177_p3), %vm248_vm0, %v968_v5  ;;  %v592_v20 = vsel (!%p177_p3), %vm248_vm0, %v968_v5, 0  ;;  %v975_v27 = vld [vmem:[%s1306_s1 + $0x6] sm:$0x1] (!%p177_p3)  ;;  %v376_v38 = vsel (!%p177_p3), %vm248_vm0, %v947_v25, 0  ;;  %v954_v42 = vld [vmem:[%s1306_s1 + $0x3] sm:$0x1] (!%p177_p3) }
   0xa   : > { %v664_v40 = vsel (!%p177_p3), %vm248_vm0, %v975_v27, 0  ;;  %v982_v43 = vld [vmem:[%s1306_s1 + $0x7] sm:$0x1] (!%p177_p3)  ;;  %v448_v54 = vsel (!%p177_p3), %vm248_vm0, %v954_v42, 0  ;;  %v985_v2 = vld [vmem:[%s1307_s2] ss:$0 sm:$0xff] (!%p177_p3) }
   0xb   : > { %v736_v56 = vsel (!%p177_p3), %vm248_vm0, %v982_v43, 0 }
   0xe   : > { %s1315_s15 = smov (!%p206_p4, %s1137_s15), 1 }
   0xf   : > { %s1098_s27 = smul.u32 40, %s1315_s15  ;;  %s989_s21 = sshll.u32 %s1315_s15, 5 }
  0x10   : > { %s219_s24 = scalar_lea.vmem %s1309_s4, %s989_s21 }
  0x11   : > { %s1214_s30 = scalar_lea.vmem %s1305_s0, %s1098_s27 }
  0x12   : > { %v934_v6 = vld [vmem:[%s1214_s30 + $0x1] sm:$0xff]  ;;  %v935_v7 = vld [vmem:[%s1214_s30 + $0x9] sm:$0xff]  ;;  %v936_v11 = vld [vmem:[%s1214_s30 + $0x11] sm:$0xff] }
  0x13   : > { %v957_v8 = vld [vmem:[%s1214_s30 + $0x4] sm:$0xff]  ;;  %v237_v9 = vpack.c.bf16 %v935_v7, %v934_v6  ;;  %v958_v10 = vld [vmem:[%s1214_s30 + $0xc] sm:$0xff]  ;;  %v937_v12 = vld [vmem:[%s1214_s30 + $0x19] sm:$0xff] }
  0x14   : > { %v509_v13 = vpack.c.bf16 %v958_v10, %v957_v8  ;;  %v238_v14 = vpack.c.bf16 %v937_v12, %v936_v11  ;;  %v959_v16 = vld [vmem:[%s1214_s30 + $0x14] sm:$0xff]  ;;  %v960_v17 = vld [vmem:[%s1214_s30 + $0x1c] sm:$0xff]  ;;  %v225_v21 = vld [vmem:[%s1214_s30 + $0x8] sm:$0xff] }
  0x15   : > { %v224_v18 = vld [vmem:[%s1214_s30] sm:$0xff]  ;;  %1016 = vmatprep.mubr.msk.bf16.mxu1 %vm241_vm1, %v237_v9  ;;  %v510_v19 = vpack.c.bf16 %v960_v17, %v959_v16  ;;  %v965_v23 = vld [vmem:[%s1214_s30 + $0xd] sm:$0xff]  ;;  %v227_v29 = vld [vmem:[%s1214_s30 + $0x18] sm:$0xff] }
  0x16   : > { %v964_v22 = vld [vmem:[%s1214_s30 + $0x5] sm:$0xff]  ;;  %1040 = vmatprep.mubr.msk.bf16.mxu0 %vm241_vm1, %v509_v13  ;;  %1017 = vmatmul.mubr.msk.bf16.vlgmr.msra.gmra.mrb[0].mxu1 %vm241_vm1, %v238_v14  ;;  %v228_v24 = vpack.c.bf16 %v225_v21, %v224_v18  ;;  %v226_v28 = vld [vmem:[%s1214_s30 + $0x10] sm:$0xff]  ;;  %v967_v31 = vld [vmem:[%s1214_s30 + $0x1d] sm:$0xff] }
  0x17   : > { %v581_v26 = vpack.c.bf16 %v965_v23, %v964_v22  ;;  %1021 = vmatpush3.bf16.msra.mxu1 %v308_v15  ;;  %1041 = vmatmul.mubr.msk.bf16.vlgmr.msra.gmra.mrb[0].mxu0 %vm241_vm1, %v510_v19  ;;  %v966_v30 = vld [vmem:[%s1214_s30 + $0x15] sm:$0xff]  ;;  %v943_v32 = vld [vmem:[%s1214_s30 + $0x2] sm:$0xff]  ;;  %v944_v33 = vld [vmem:[%s1214_s30 + $0xa] sm:$0xff]  ;;  %v229_v34 = vpack.c.bf16 %v227_v29, %v226_v28 }
  0x18   : > { %1045 = vmatpush3.bf16.msra.mxu0 %v592_v20  ;;  %1022 = vmatprep.mubr.msk.bf16.mxu1 %vm241_vm1, %v228_v24  ;;  %v971_v35 = vld [vmem:[%s1214_s30 + $0x6] sm:$0xff]  ;;  %v972_v36 = vld [vmem:[%s1214_s30 + $0xe] sm:$0xff]  ;;  %v582_v37 = vpack.c.bf16 %v967_v31, %v966_v30  ;;  %v365_v39 = vpack.c.bf16 %v944_v33, %v943_v32  ;;  %v946_v45 = vld [vmem:[%s1214_s30 + $0x1a] sm:$0xff] }
  0x19   : > { %1092 = vmatprep.subr.msk.bf16.mxu1 %vm248_vm0, %v947_v25  ;;  %1046 = vmatprep.mubr.msk.bf16.mxu0 %vm241_vm1, %v581_v26  ;;  %v653_v41 = vpack.c.bf16 %v972_v36, %v971_v35  ;;  %v945_v44 = vld [vmem:[%s1214_s30 + $0x12] sm:$0xff]  ;;  %v974_v47 = vld [vmem:[%s1214_s30 + $0x1e] sm:$0xff]  ;;  %v978_v51 = vld [vmem:[%s1214_s30 + $0x7] sm:$0xff] }
  0x1a   : > { %1096 = vmatprep.subr.msk.bf16.mxu0 %vm248_vm0, %v975_v27  ;;  %v973_v46 = vld [vmem:[%s1214_s30 + $0x16] sm:$0xff]  ;;  %v950_v48 = vld [vmem:[%s1214_s30 + $0x3] sm:$0xff]  ;;  %v951_v49 = vld [vmem:[%s1214_s30 + $0xb] sm:$0xff]  ;;  %v366_v50 = vpack.c.bf16 %v946_v45, %v945_v44 }
  0x1b   : > { %v979_v52 = vld [vmem:[%s1214_s30 + $0xf] sm:$0xff]  ;;  %v654_v53 = vpack.c.bf16 %v974_v47, %v973_v46  ;;  %v437_v55 = vpack.c.bf16 %v951_v49, %v950_v48  ;;  %v953_v59 = vld [vmem:[%s1214_s30 + $0x1b] sm:$0xff] }
  0x1c   : > { %v725_v57 = vpack.c.bf16 %v979_v52, %v978_v51  ;;  %v952_v58 = vld [vmem:[%s1214_s30 + $0x13] sm:$0xff]  ;;  %v981_v61 = vld [vmem:[%s1214_s30 + $0x1f] sm:$0xff] }
  0x1d   : > { %v980_v60 = vld [vmem:[%s1214_s30 + $0x17] sm:$0xff]  ;;  %v438_v62 = vpack.c.bf16 %v953_v59, %v952_v58  ;;  %v986_v7 = vld [vmem:[%s1308_s3] ss:$0 sm:$0xff] }
  0x1e   : > { %v726_v63 = vpack.c.bf16 %v981_v61, %v980_v60 }
  0x22   : > { %1023 = vmatmul.mubr.msk.bf16.vlgmr.msra.gmra.mrb[0].mxu1 %vm241_vm1, %v229_v34 }
  0x23   : > { %1027 = vmatpush3.bf16.msra.mxu1 %v376_v38  ;;  %1047 = vmatmul.mubr.msk.bf16.vlgmr.msra.gmra.mrb[0].mxu0 %vm241_vm1, %v582_v37 }
  0x24   : > { %1051 = vmatpush3.bf16.msra.mxu0 %v664_v40  ;;  %1028 = vmatprep.mubr.msk.bf16.mxu1 %vm241_vm1, %v365_v39 }
  0x25   : > { %1093 = vmatprep.subr.msk.bf16.mxu1 %vm248_vm0, %v954_v42  ;;  %1052 = vmatprep.mubr.msk.bf16.mxu0 %vm241_vm1, %v653_v41 }
  0x26   : > { %1097 = vmatprep.subr.msk.bf16.mxu0 %vm248_vm0, %v982_v43 }
  0x2e   : > { %1029 = vmatmul.mubr.msk.bf16.vlgmr.msra.gmra.mrb[0].mxu1 %vm241_vm1, %v366_v50 }
  0x2f   : > { %1033 = vmatpush3.bf16.msra.mxu1 %v448_v54  ;;  %1053 = vmatmul.mubr.msk.bf16.vlgmr.msra.gmra.mrb[0].mxu0 %vm241_vm1, %v654_v53 }
  0x30   : > { %1057 = vmatpush3.bf16.msra.mxu0 %v736_v56  ;;  %1034 = vmatprep.mubr.msk.bf16.mxu1 %vm241_vm1, %v437_v55 }
  0x31   : > { %1058 = vmatprep.mubr.msk.bf16.mxu0 %vm241_vm1, %v725_v57 }
  0x3a   : > { %1035 = vmatmul.mubr.msk.bf16.vlgmr.msra.gmra.mrb[0].mxu1 %vm241_vm1, %v438_v62 }
  0x3b   : > { %1059 = vmatmul.mubr.msk.bf16.vlgmr.msra.gmra.mrb[0].mxu0 %vm241_vm1, %v726_v63 }
 0x10d   : > { %v1036_v0 = vpop.f32.mrb[0].mxu1 }
 0x10e   : > { %v1060_v1 = vpop.f32.mrb[0].mxu0  ;;  %v484_v3 = vpop.f32.mrb[1].mxu1 }
 0x10f   : > { %v1062_v4 = vadd.f32 %v1060_v1, %v1036_v0  ;;  %v772_v5 = vpop.f32.mrb[1].mxu0  ;;  %v1037_v6 = vpop.f32.mrb[2].mxu1 }
 0x110   : > { %v1063_v8 = vadd.f32 %v772_v5, %v484_v3  ;;  %v1061_v9 = vpop.f32.mrb[2].mxu0  ;;  %v487_v10 = vpop.f32.mrb[3].mxu1 }
 0x111   : > { %v800_v11 = vmul.f32 %v1062_v4, %v985_v2  ;;  %v1064_v12 = vadd.f32 %v1061_v9, %v1037_v6  ;;  %v775_v13 = vpop.f32.mrb[3].mxu0 }
 0x112   : > { %v798_v14 = vmul.f32 %v1063_v8, %v985_v2  ;;  %v1065_v15 = vadd.f32 %v775_v13, %v487_v10 }
 0x113   : > { %v811_v16 = vadd.f32 %v986_v7, %v800_v11  ;;  %v801_v17 = vmul.f32 %v1064_v12, %v985_v2 }
 0x114   : > { %v809_v18 = vadd.f32 %v986_v7, %v798_v14  ;;  %v799_v19 = vmul.f32 %v1065_v15, %v985_v2 }
 0x115   : > { %v815_v20 = vmax.f32 %v811_v16, 0.0  ;;  %v812_v21 = vadd.f32 %v986_v7, %v801_v17 }
 0x116   : > { %v813_v22 = vmax.f32 %v809_v18, 0.0  ;;  %v810_v23 = vadd.f32 %v986_v7, %v799_v19 }
 0x117   : > { %820 = vst.msk [vmem:[%s219_s24 + $0x10] sm:$0xff] %vm817_vm2, %v815_v20  ;;  %v816_v24 = vmax.f32 %v812_v21, 0.0 }
 0x118   : > { %818 = vst.msk [vmem:[%s219_s24] sm:$0xff] %vm817_vm2, %v813_v22  ;;  %v814_v25 = vmax.f32 %v810_v23, 0.0 }
 0x119   : > { %821 = vst.msk [vmem:[%s219_s24 + $0x18] sm:$0xff] %vm817_vm2, %v816_v24 }
 0x11a   : > { %819 = vst.msk [vmem:[%s219_s24 + $0x8] sm:$0xff] %vm817_vm2, %v814_v25 }
 0x11b PF: > { %s14_s17 = sadd.s32 1, %s1145_s17   ;;  %s1310_s15 = smov %s1141_s16 }
 0x11c   : > { %p11_p5 = scmp.ge.s32.totalorder %s14_s17, 4   ;;  %s1311_s16 = smov %s1313_s18 }
 0x11e   :  { %13 = sbr.rel (!%p11_p5) target bundleno = 2 (0x2), region = 81 }

// kernel: snakenet_forward.6
= control target key start
LH: loop header
LB: loop body
LE: loop exit
PB: predicated region body
PF: predicated region fallthrough
CT: control target
= control target key end

     0   :  { %s1953_s15 = smov 0   ;;  %s1955_s16 = smov 0   ;;  %s2198_s0 = inlined_call_operand.vmem [shape: f32[2,31,32], index: 0, kind: input, shape index: {}]   ;;  %s2199_s1 = inlined_call_operand.vmem [shape: bf16[16,32,8], index: 1, kind: input, shape index: {}]   ;;  %s2200_s2 = inlined_call_operand.vmem [shape: f32[1,8], index: 2, kind: input, shape index: {}]   ;;  %s2201_s3 = inlined_call_operand.vmem [shape: f32[1,8], index: 3, kind: input, shape index: {}]   ;;  %s2202_s4 = inlined_call_operand.vmem [shape: f32[2,16,8], index: 4, kind: output, shape index: {}]  }
   0x1   :  { %s1957_s17 = smov 0  }
   0x2 LB: > { %s26_s18 = sadd.s32 1, %s1920_s16  ;;  %p1461_p0 = scmp.ge.s32.totalorder %s1924_s17, 1  ;;  %s1924_s17 = sphi %s1957_s17, %s14_s17   ;;  %s1920_s16 = sphi %s1955_s16, %s2204_s16   ;;  %s1916_s15 = sphi %s1953_s15, %s2203_s15  }
   0x3   : > { %p28_p1 = scmp.ge.s32.totalorder %s26_s18, 2  ;;  %p176_p2 = scmp.lt.s32.totalorder %s1924_s17, 3 }
   0x5   : > { %s2206_s18 = smov (%p28_p1, %s26_s18), 0  ;;  %p177_p3 = pnand %p1461_p0, %p176_p2 }
   0x6   : > { %v1870_v0 = vld [vmem:[%s2199_s1 + $0x10] sm:$0xff] (!%p177_p3)   ;;  %v1926_v1 = vmov (!%p177_p3), 0.0   ;;  %v1871_v2 = vld [vmem:[%s2199_s1 + $0x80] sm:$0xff] (!%p177_p3)   ;;  %v1872_v3 = vld [vmem:[%s2199_s1 + $0x18] sm:$0xff] (!%p177_p3)   ;;  %vm1927_vm0 = vmmov (!%p177_p3), 0   ;;  %p206_p4 = scmp.lt.s32.totalorder (!%p177_p3), %s1916_s15, 1 }
   0x7   : > { %180 = sbr.rel (%p177_p3) target bundleno = 328 (0x148), region = 36  ;;  %1658 = vmatprep.subr.bf16.mxu1 (!%p177_p3), %v1926_v1  ;;  %1722 = vmatprep.subr.bf16.mxu0 (!%p177_p3), %v1926_v1  ;;  %v1873_v4 = vld [vmem:[%s2199_s1 + $0x88] sm:$0xff] (!%p177_p3)   ;;  %v1874_v5 = vld [vmem:[%s2199_s1] sm:$0xff] (!%p177_p3)   ;;  %vm253_vm1 = vcmask (!%p177_p3), 261120   ;;  %v1875_v11 = vld [vmem:[%s2199_s1 + $0x90] sm:$0xff] (!%p177_p3)   ;;  %vm1326_vm2 = vcmask (!%p177_p3), 64512  }
   0x8   : > { %1659 = vmatpush3.bf16.msra.mxu1 (!%p177_p3), %v1870_v0  ;;  %1662 = vmatprep.mubr.msk.bf16.mxu1 (!%p177_p3), %vm1927_vm0, %v1926_v1  ;;  %v1876_v13 = vld [vmem:[%s2199_s1 + $0x8] sm:$0xff] (!%p177_p3)   ;;  %v1877_v14 = vld [vmem:[%s2199_s1 + $0x98] sm:$0xff] (!%p177_p3)   ;;  %v1878_v19 = vld [vmem:[%s2199_s1 + $0x20] sm:$0xff] (!%p177_p3)  }
   0x9   : > { %1723 = vmatpush3.bf16.msra.mxu0 (!%p177_p3), %v1871_v2  ;;  %1660 = vmatprep.subr.bf16.mxu1 (!%p177_p3), %v1926_v1  ;;  %v1879_v20 = vld [vmem:[%s2199_s1 + $0xa0] sm:$0xff] (!%p177_p3)   ;;  %v1880_v21 = vld [vmem:[%s2199_s1 + $0x28] sm:$0xff] (!%p177_p3)   ;;  %v1882_v28 = vld [vmem:[%s2199_s1 + $0x30] sm:$0xff] (!%p177_p3)  }
   0xa   : > { %1724 = vmatprep.subr.bf16.mxu0 (!%p177_p3), %v1926_v1  ;;  %1726 = vmatprep.mubr.msk.bf16.mxu0 (!%p177_p3), %vm1927_vm0, %v1926_v1  ;;  %v1881_v22 = vld [vmem:[%s2199_s1 + $0xa8] sm:$0xff] (!%p177_p3)   ;;  %v1883_v29 = vld [vmem:[%s2199_s1 + $0xb0] sm:$0xff] (!%p177_p3)   ;;  %v1884_v30 = vld [vmem:[%s2199_s1 + $0x38] sm:$0xff] (!%p177_p3)  }
   0xb   : > { %v1885_v31 = vld [vmem:[%s2199_s1 + $0xb8] sm:$0xff] (!%p177_p3)   ;;  %v1886_v37 = vld [vmem:[%s2199_s1 + $0x40] sm:$0xff] (!%p177_p3)   ;;  %v1888_v39 = vld [vmem:[%s2199_s1 + $0x48] sm:$0xff] (!%p177_p3)  }
   0xc   : > { %1661 = vmatpush3.bf16.msra.mxu1 (!%p177_p3), %v1872_v3  ;;  %v1887_v38 = vld [vmem:[%s2199_s1 + $0xc0] sm:$0xff] (!%p177_p3)   ;;  %v1889_v40 = vld [vmem:[%s2199_s1 + $0xc8] sm:$0xff] (!%p177_p3)   ;;  %v1890_v46 = vld [vmem:[%s2199_s1 + $0x50] sm:$0xff] (!%p177_p3)  }
   0xd   : > { %1725 = vmatpush3.bf16.msra.mxu0 (!%p177_p3), %v1873_v4  ;;  %1666 = vmatprep.subr.bf16.mxu1 (!%p177_p3), %v1926_v1  ;;  %v1891_v47 = vld [vmem:[%s2199_s1 + $0xd0] sm:$0xff] (!%p177_p3)   ;;  %v1892_v48 = vld [vmem:[%s2199_s1 + $0x58] sm:$0xff] (!%p177_p3)   ;;  %v1894_v55 = vld [vmem:[%s2199_s1 + $0x60] sm:$0xff] (!%p177_p3)  }
   0xe   : > { %s2208_s15 = smov (!%p206_p4, %s1916_s15), 1  ;;  %1730 = vmatprep.subr.bf16.mxu0 %v1926_v1  ;;  %v1893_v49 = vld [vmem:[%s2199_s1 + $0xd8] sm:$0xff]   ;;  %v1895_v56 = vld [vmem:[%s2199_s1 + $0xe0] sm:$0xff]   ;;  %v1896_v57 = vld [vmem:[%s2199_s1 + $0x68] sm:$0xff]  }
   0xf   : > { %s1608_s27 = sshll.u32 %s2208_s15, 5  ;;  %v1897_v58 = vld [vmem:[%s2199_s1 + $0xe8] sm:$0xff]   ;;  %v1898_v0 = vld [vmem:[%s2199_s1 + $0x70] sm:$0xff]   ;;  %v1900_v3 = vld [vmem:[%s2199_s1 + $0x78] sm:$0xff]  }
  0x10   : > { %s1997_s30 = scalar_lea.vmem %s2198_s0, %s1608_s27  ;;  %v1899_v2 = vld [vmem:[%s2199_s1 + $0xf0] sm:$0xff]   ;;  %v1901_v4 = vld [vmem:[%s2199_s1 + $0xf8] sm:$0xff]  }
  0x11   : > { %v1466_v6 = vld [vmem:[%s1997_s30 + $0x1] sm:$0xff]  ;;  %v1467_v7 = vld [vmem:[%s1997_s30 + $0x9] sm:$0xff]  ;;  %v1542_v16 = vld [vmem:[%s1997_s30 + $0x11] sm:$0xff] }
  0x12   : > { %v1532_v8 = vld [vmem:[%s1997_s30 + $0x8] sm:$0xff]  ;;  %v235_v9 = vpack.c.bf16 %v1467_v7, %v1466_v6  ;;  %v1533_v10 = vld [vmem:[%s1997_s30 + $0x10] sm:$0xff]  ;;  %v224_v15 = vld [vmem:[%s1997_s30] sm:$0xff]  ;;  %v834_v18 = vpack.c.bf16 %v1542_v16, %v1467_v7 }
  0x13   : > { %v766_v12 = vpack.c.bf16 %v1533_v10, %v1532_v8  ;;  %v226_v17 = vpack.c.bf16 %v1532_v8, %v224_v15  ;;  %v1478_v23 = vld [vmem:[%s1997_s30 + $0x2] sm:$0xff]  ;;  %v1479_v24 = vld [vmem:[%s1997_s30 + $0xa] sm:$0xff]  ;;  %v1551_v25 = vld [vmem:[%s1997_s30 + $0x12] sm:$0xff] }
  0x14   : > { %1663 = vmatmul.mubr.msk.bf16.vlgmr.msra.gmra.mrb[0].mxu1 %vm253_vm1, %v235_v9  ;;  %v358_v26 = vpack.c.bf16 %v1479_v24, %v1478_v23  ;;  %v902_v27 = vpack.c.bf16 %v1551_v25, %v1479_v24  ;;  %v1487_v32 = vld [vmem:[%s1997_s30 + $0x3] sm:$0xff]  ;;  %v1488_v33 = vld [vmem:[%s1997_s30 + $0xb] sm:$0xff]  ;;  %v1560_v34 = vld [vmem:[%s1997_s30 + $0x13] sm:$0xff] }
  0x15   : > { %1727 = vmatmul.mubr.msk.bf16.vlgmr.msra.gmra.mrb[0].mxu0 %vm253_vm1, %v766_v12  ;;  %1667 = vmatpush3.bf16.msra.mxu1 %v1874_v5  ;;  %v426_v35 = vpack.c.bf16 %v1488_v33, %v1487_v32  ;;  %v970_v36 = vpack.c.bf16 %v1560_v34, %v1488_v33  ;;  %v1496_v41 = vld [vmem:[%s1997_s30 + $0x4] sm:$0xff]  ;;  %v1497_v42 = vld [vmem:[%s1997_s30 + $0xc] sm:$0xff]  ;;  %v1569_v43 = vld [vmem:[%s1997_s30 + $0x14] sm:$0xff] }
  0x16   : > { %1731 = vmatpush3.bf16.msra.mxu0 %v1875_v11  ;;  %1668 = vmatprep.subr.bf16.mxu1 %v1926_v1  ;;  %v494_v44 = vpack.c.bf16 %v1497_v42, %v1496_v41  ;;  %v1038_v45 = vpack.c.bf16 %v1569_v43, %v1497_v42  ;;  %v1505_v50 = vld [vmem:[%s1997_s30 + $0x5] sm:$0xff]  ;;  %v1506_v51 = vld [vmem:[%s1997_s30 + $0xd] sm:$0xff]  ;;  %v1578_v52 = vld [vmem:[%s1997_s30 + $0x15] sm:$0xff] }
  0x17   : > { %1732 = vmatprep.subr.bf16.mxu0 %v1926_v1  ;;  %1670 = vmatprep.mubr.msk.bf16.mxu1 %vm1927_vm0, %v1926_v1  ;;  %v562_v53 = vpack.c.bf16 %v1506_v51, %v1505_v50  ;;  %v1106_v54 = vpack.c.bf16 %v1578_v52, %v1506_v51  ;;  %v1514_v59 = vld [vmem:[%s1997_s30 + $0x6] sm:$0xff]  ;;  %v1515_v60 = vld [vmem:[%s1997_s30 + $0xe] sm:$0xff]  ;;  %v1587_v61 = vld [vmem:[%s1997_s30 + $0x16] sm:$0xff] }
  0x18   : > { %1734 = vmatprep.mubr.msk.bf16.mxu0 %vm1927_vm0, %v1926_v1  ;;  %v630_v62 = vpack.c.bf16 %v1515_v60, %v1514_v59  ;;  %v1174_v63 = vpack.c.bf16 %v1587_v61, %v1515_v60  ;;  %v1523_v5 = vld [vmem:[%s1997_s30 + $0x7] sm:$0xff]  ;;  %v1524_v6 = vld [vmem:[%s1997_s30 + $0xf] sm:$0xff]  ;;  %v1596_v7 = vld [vmem:[%s1997_s30 + $0x17] sm:$0xff]  ;;  %s1609_s30 = sshll.u32 %s2208_s15, 4 }
  0x19   : > { %1669 = vmatpush3.bf16.msra.mxu1 %v1876_v13  ;;  %v698_v8 = vpack.c.bf16 %v1524_v6, %v1523_v5  ;;  %v1242_v9 = vpack.c.bf16 %v1596_v7, %v1524_v6  ;;  %v1604_v12 = vld [vmem:[%s2200_s2] ss:$0 sm:$0xff]  ;;  %s219_s29 = scalar_lea.vmem %s2202_s4, %s1609_s30 }
  0x1a   : > { %1733 = vmatpush3.bf16.msra.mxu0 %v1877_v14  ;;  %1674 = vmatprep.subr.bf16.mxu1 %v1926_v1  ;;  %v1605_v16 = vld [vmem:[%s2201_s3] ss:$0 sm:$0xff] }
  0x1b   : > { %1738 = vmatprep.subr.bf16.mxu0 %v1926_v1 }
  0x20   : > { %1671 = vmatmul.mubr.msk.bf16.vlgmr.msra.gmra.mrb[0].mxu1 %vm253_vm1, %v226_v17 }
  0x21   : > { %1735 = vmatmul.mubr.msk.bf16.vlgmr.msra.gmra.mrb[0].mxu0 %vm253_vm1, %v834_v18  ;;  %1675 = vmatpush3.bf16.msra.mxu1 %v1878_v19 }
  0x22   : > { %1739 = vmatpush3.bf16.msra.mxu0 %v1879_v20  ;;  %1676 = vmatprep.subr.bf16.mxu1 %v1926_v1 }
  0x23   : > { %1740 = vmatprep.subr.bf16.mxu0 %v1926_v1  ;;  %1678 = vmatprep.mubr.msk.bf16.mxu1 %vm1927_vm0, %v1926_v1 }
  0x24   : > { %1742 = vmatprep.mubr.msk.bf16.mxu0 %vm1927_vm0, %v1926_v1 }
  0x25   : > { %1677 = vmatpush3.bf16.msra.mxu1 %v1880_v21 }
  0x26   : > { %1741 = vmatpush3.bf16.msra.mxu0 %v1881_v22  ;;  %1682 = vmatprep.subr.bf16.mxu1 %v1926_v1 }
  0x27   : > { %1746 = vmatprep.subr.bf16.mxu0 %v1926_v1 }
  0x2c   : > { %1679 = vmatmul.mubr.msk.bf16.vlgmr.msra.gmra.mrb[0].mxu1 %vm253_vm1, %v358_v26 }
  0x2d   : > { %1743 = vmatmul.mubr.msk.bf16.vlgmr.msra.gmra.mrb[0].mxu0 %vm253_vm1, %v902_v27  ;;  %1683 = vmatpush3.bf16.msra.mxu1 %v1882_v28 }
  0x2e   : > { %1747 = vmatpush3.bf16.msra.mxu0 %v1883_v29  ;;  %1684 = vmatprep.subr.bf16.mxu1 %v1926_v1 }
  0x2f   : > { %1748 = vmatprep.subr.bf16.mxu0 %v1926_v1  ;;  %1686 = vmatprep.mubr.msk.bf16.mxu1 %vm1927_vm0, %v1926_v1 }
  0x30   : > { %1750 = vmatprep.mubr.msk.bf16.mxu0 %vm1927_vm0, %v1926_v1 }
  0x31   : > { %1685 = vmatpush3.bf16.msra.mxu1 %v1884_v30 }
  0x32   : > { %1749 = vmatpush3.bf16.msra.mxu0 %v1885_v31  ;;  %1690 = vmatprep.subr.bf16.mxu1 %v1926_v1 }
  0x33   : > { %1754 = vmatprep.subr.bf16.mxu0 %v1926_v1 }
  0x38   : > { %1687 = vmatmul.mubr.msk.bf16.vlgmr.msra.gmra.mrb[0].mxu1 %vm253_vm1, %v426_v35 }
  0x39   : > { %1751 = vmatmul.mubr.msk.bf16.vlgmr.msra.gmra.mrb[0].mxu0 %vm253_vm1, %v970_v36  ;;  %1691 = vmatpush3.bf16.msra.mxu1 %v1886_v37 }
  0x3a   : > { %1755 = vmatpush3.bf16.msra.mxu0 %v1887_v38  ;;  %1692 = vmatprep.subr.bf16.mxu1 %v1926_v1 }
  0x3b   : > { %1756 = vmatprep.subr.bf16.mxu0 %v1926_v1  ;;  %1694 = vmatprep.mubr.msk.bf16.mxu1 %vm1927_vm0, %v1926_v1 }
  0x3c   : > { %1758 = vmatprep.mubr.msk.bf16.mxu0 %vm1927_vm0, %v1926_v1 }
  0x3d   : > { %1693 = vmatpush3.bf16.msra.mxu1 %v1888_v39 }
  0x3e   : > { %1757 = vmatpush3.bf16.msra.mxu0 %v1889_v40  ;;  %1698 = vmatprep.subr.bf16.mxu1 %v1926_v1 }
  0x3f   : > { %1762 = vmatprep.subr.bf16.mxu0 %v1926_v1 }
  0x44   : > { %1695 = vmatmul.mubr.msk.bf16.vlgmr.msra.gmra.mrb[0].mxu1 %vm253_vm1, %v494_v44 }
  0x45   : > { %1759 = vmatmul.mubr.msk.bf16.vlgmr.msra.gmra.mrb[0].mxu0 %vm253_vm1, %v1038_v45  ;;  %1699 = vmatpush3.bf16.msra.mxu1 %v1890_v46 }
  0x46   : > { %1763 = vmatpush3.bf16.msra.mxu0 %v1891_v47  ;;  %1700 = vmatprep.subr.bf16.mxu1 %v1926_v1 }
  0x47   : > { %1764 = vmatprep.subr.bf16.mxu0 %v1926_v1  ;;  %1702 = vmatprep.mubr.msk.bf16.mxu1 %vm1927_vm0, %v1926_v1 }
  0x48   : > { %1766 = vmatprep.mubr.msk.bf16.mxu0 %vm1927_vm0, %v1926_v1 }
  0x49   : > { %1701 = vmatpush3.bf16.msra.mxu1 %v1892_v48 }
  0x4a   : > { %1765 = vmatpush3.bf16.msra.mxu0 %v1893_v49  ;;  %1706 = vmatprep.subr.bf16.mxu1 %v1926_v1 }
  0x4b   : > { %1770 = vmatprep.subr.bf16.mxu0 %v1926_v1 }
  0x50   : > { %1703 = vmatmul.mubr.msk.bf16.vlgmr.msra.gmra.mrb[0].mxu1 %vm253_vm1, %v562_v53 }
  0x51   : > { %1767 = vmatmul.mubr.msk.bf16.vlgmr.msra.gmra.mrb[0].mxu0 %vm253_vm1, %v1106_v54  ;;  %1707 = vmatpush3.bf16.msra.mxu1 %v1894_v55 }
  0x52   : > { %1771 = vmatpush3.bf16.msra.mxu0 %v1895_v56  ;;  %1708 = vmatprep.subr.bf16.mxu1 %v1926_v1 }
  0x53   : > { %1772 = vmatprep.subr.bf16.mxu0 %v1926_v1  ;;  %1710 = vmatprep.mubr.msk.bf16.mxu1 %vm1927_vm0, %v1926_v1 }
  0x54   : > { %1774 = vmatprep.mubr.msk.bf16.mxu0 %vm1927_vm0, %v1926_v1 }
  0x55   : > { %1709 = vmatpush3.bf16.msra.mxu1 %v1896_v57 }
  0x56   : > { %1773 = vmatpush3.bf16.msra.mxu0 %v1897_v58  ;;  %1714 = vmatprep.subr.bf16.mxu1 %v1926_v1 }
  0x57   : > { %1778 = vmatprep.subr.bf16.mxu0 %v1926_v1 }
  0x5c   : > { %1711 = vmatmul.mubr.msk.bf16.vlgmr.msra.gmra.mrb[0].mxu1 %vm253_vm1, %v630_v62 }
  0x5d   : > { %1775 = vmatmul.mubr.msk.bf16.vlgmr.msra.gmra.mrb[0].mxu0 %vm253_vm1, %v1174_v63  ;;  %1715 = vmatpush3.bf16.msra.mxu1 %v1898_v0 }
  0x5e   : > { %1779 = vmatpush3.bf16.msra.mxu0 %v1899_v2  ;;  %1716 = vmatprep.subr.bf16.mxu1 %v1926_v1 }
  0x5f   : > { %1780 = vmatprep.subr.bf16.mxu0 %v1926_v1  ;;  %1718 = vmatprep.mubr.msk.bf16.mxu1 %vm1927_vm0, %v1926_v1 }
  0x60   : > { %1782 = vmatprep.mubr.msk.bf16.mxu0 %vm1927_vm0, %v1926_v1 }
  0x61   : > { %1717 = vmatpush3.bf16.msra.mxu1 %v1900_v3 }
  0x62   : > { %1781 = vmatpush3.bf16.msra.mxu0 %v1901_v4 }
  0x68   : > { %1719 = vmatmul.mubr.msk.bf16.vlgmr.msra.gmra.mrb[0].mxu1 %vm253_vm1, %v698_v8 }
  0x69   : > { %1783 = vmatmul.mubr.msk.bf16.vlgmr.msra.gmra.mrb[0].mxu0 %vm253_vm1, %v1242_v9 }
 0x13b   : > { %v753_v10 = vpop.f32.mrb[0].mxu1 }
 0x13c   : > { %v1297_v11 = vpop.f32.mrb[0].mxu0  ;;  %v1720_v13 = vpop.f32.mrb[1].mxu1 }
 0x13d   : > { %v1786_v1 = vadd.f32 %v1297_v11, %v753_v10  ;;  %v1784_v14 = vpop.f32.mrb[1].mxu0  ;;  %v756_v15 = vpop.f32.mrb[2].mxu1 }
 0x13e   : > { %v1300_v17 = vpop.f32.mrb[2].mxu0  ;;  %v1721_v18 = vpop.f32.mrb[3].mxu1 }
 0x13f   : > { %v1313_v19 = vmul.f32 %v1786_v1, %v1604_v12  ;;  %v1787_v20 = vadd.f32 %v1300_v17, %v756_v15  ;;  %v1785_v21 = vpop.f32.mrb[3].mxu0 }
 0x141   : > { %v1322_v22 = vadd.f32 %v1605_v16, %v1313_v19  ;;  %v1314_v23 = vmul.f32 %v1787_v20, %v1604_v12 }
 0x143   : > { %v1324_v24 = vmax.f32 %v1322_v22, 0.0  ;;  %v1323_v25 = vadd.f32 %v1605_v16, %v1314_v23 }
 0x145   : > { %1327 = vst.msk [vmem:[%s219_s29] sm:$0xff] %vm1326_vm2, %v1324_v24  ;;  %v1325_v26 = vmax.f32 %v1323_v25, 0.0 }
 0x147   : > { %1328 = vst.msk [vmem:[%s219_s29 + $0x8] sm:$0xff] %vm1326_vm2, %v1325_v26 }
 0x148 PF: > { %s14_s17 = sadd.s32 1, %s1924_s17   ;;  %s2203_s15 = smov %s1920_s16 }
 0x149   : > { %p11_p5 = scmp.ge.s32.totalorder %s14_s17, 4   ;;  %s2204_s16 = smov %s2206_s18 }
 0x14b   :  { %13 = sbr.rel (!%p11_p5) target bundleno = 2 (0x2), region = 97 }

// kernel: snakenet_forward.7
= control target key start
LH: loop header
LB: loop body
LE: loop exit
PB: predicated region body
PF: predicated region fallthrough
CT: control target
= control target key end

     0   :  { %s2592_s29 = smov 0   ;;  %s2806_s0 = inlined_call_operand.vmem [shape: f32[2,2,16,8], index: 0, kind: input, shape index: {}]   ;;  %s2807_s1 = inlined_call_operand.vmem [shape: f32[2,1,1,8], index: 1, kind: input, shape index: {}]   ;;  %s2808_s2 = inlined_call_operand.vmem [shape: f32[2,8,32], index: 2, kind: input, shape index: {}]   ;;  %s2809_s3 = inlined_call_operand.vmem [shape: f32[2,8,32], index: 3, kind: input, shape index: {}]   ;;  %s2810_s4 = inlined_call_operand.vmem [shape: f32[2,1,1,32], index: 4, kind: input, shape index: {}]   ;;  %s2811_s5 = inlined_call_operand.vmem [shape: f32[2,1,1,32], index: 5, kind: input, shape index: {}]   ;;  %s2812_s6 = inlined_call_operand.vmem [shape: f32[2,1,1,32], index: 6, kind: input, shape index: {}]   ;;  %s2813_s7 = inlined_call_operand.vmem [shape: f32[2,32,32], index: 7, kind: input, shape index: {}]   ;;  %s2814_s8 = inlined_call_operand.vmem [shape: f32[2,32,8], index: 8, kind: input, shape index: {}]   ;;  %s2815_s9 = inlined_call_operand.vmem [shape: f32[2,32,8], index: 9, kind: input, shape index: {}]   ;;  %s2816_s10 = inlined_call_operand.vmem [shape: f32[2,1,1,32], index: 10, kind: input, shape index: {}]   ;;  %s2817_s11 = inlined_call_operand.vmem [shape: f32[2,8,32], index: 11, kind: input, shape index: {}]   ;;  %s2818_s12 = inlined_call_operand.vmem [shape: f32[2,1,1,32], index: 12, kind: input, shape index: {}]   ;;  %s2819_s13 = inlined_call_operand.vmem [shape: f32[2,32,8], index: 13, kind: input, shape index: {}]   ;;  %s2820_s14 = inlined_call_operand.vmem [shape: f32[2,2,16,8], index: 14, kind: output, shape index: {}]  }
   0x1 LB: > { %s2141_s30 = sadd.s32 4294967295, %s2500_s29   ;;  %p2145_p0 = scmp.ge.s32.totalorder %s2500_s29, 1  ;;  %s2500_s29 = sphi %s2592_s29, %s24_s29  }
   0x2   : > { %p527_p1 = scmp.lt.s32.totalorder %s2500_s29, 3 }
   0x4   : > { %p528_p2 = pnand %p2145_p0, %p527_p1 }
   0x5   : > { %p623_p3 = scmp.lt.s32.totalorder (!%p528_p2), %s2141_s30, 1  ;;  %vm691_vm0 = vcmask (!%p528_p2), 64512   ;;  %vm921_vm1 = vcmask (!%p528_p2), 253952   ;;  %v2514_v40 = vmov (!%p528_p2), 0.0   ;;  %vm925_vm2 = vcmask (!%p528_p2), 260096  }
   0x6   : > { %531 = sbr.rel (%p528_p2) target bundleno = 1485 (0x5cd), region = 76  ;;  %922 = vst.msk [vmem:[#allocation7] sm:$0x1] (!%p528_p2), %vm921_vm1, %v2514_v40  ;;  %923 = vst.msk [vmem:[#allocation7 + $0x10] sm:$0x1] (!%p528_p2), %vm921_vm1, %v2514_v40  ;;  %vm916_vm3 = vcmask (!%p528_p2), 261120  }
   0xd   : > { %s2822_s30 = smov (!%p623_p3, %s2141_s30), 1 }
   0xe   : > { %s2603_s15 = sshll.u32 %s2822_s30, 5  ;;  %s672_s18 = scalar_lea.vmem %s2818_s12, %s2822_s30 }
   0xf   : > { %s627_s21 = scalar_lea.vmem %s2806_s0, %s2603_s15  ;;  %s2617_s24 = scalar_lea.vmem %s2819_s13, %s2603_s15 }
  0x10   : > { %s2623_s27 = scalar_lea.vmem %s2820_s14, %s2603_s15  ;;  %v683_v0 = vld [vmem:[%s627_s21] sm:$0xff]  ;;  %v685_v1 = vld [vmem:[%s627_s21 + $0x10] sm:$0xff]  ;;  %v684_v2 = vld [vmem:[%s627_s21 + $0x8] sm:$0xff]  ;;  %s2148_s28 = sshll.u32 %s2822_s30, 3 }
  0x11   : > { %v687_v3 = vmul.f32 %v683_v0, %v683_v0  ;;  %v689_v4 = vmul.f32 %v685_v1, %v685_v1  ;;  %v688_v5 = vmul.f32 %v684_v2, %v684_v2  ;;  %v686_v6 = vld [vmem:[%s627_s21 + $0x18] sm:$0xff]  ;;  %s634_s19 = scalar_lea.vmem %s2808_s2, %s2148_s28  ;;  %s669_s22 = scalar_lea.vmem %s2817_s11, %s2148_s28 }
  0x12   : > { %v690_v7 = vmul.f32 %v686_v6, %v686_v6  ;;  %v732_v12 = vld [vmem:[%s634_s19] sm:$0xff]  ;;  %s638_s26 = scalar_lea.vmem %s2809_s3, %s2148_s28  ;;  %s630_s17 = scalar_lea.vmem %s2807_s1, %s2822_s30 }
  0x13   : > { %v692_v8 = vsel %vm691_vm0, %v687_v3, 0.0  ;;  %v698_v9 = vsel %vm691_vm0, %v689_v4, 0.0  ;;  %v695_v10 = vsel %vm691_vm0, %v688_v5, 0.0  ;;  %v2636_v13 = vld [vmem:[%s669_s22] sm:$0xff]  ;;  %2255 = vmatprep.subr.mxu0 %v732_v12  ;;  %s652_s21 = scalar_lea.vmem %s2813_s7, %s2603_s15  ;;  %s657_s25 = scalar_lea.vmem %s2814_s8, %s2603_s15 }
  0x14   : > { %693 = vadd.xlane.f32.xlu0 %v692_v8  ;;  %699 = vadd.xlane.f32.xlu1 %v698_v9  ;;  %v701_v11 = vsel %vm691_vm0, %v690_v7, 0.0  ;;  %v830_v14 = vld [vmem:[%s638_s26] sm:$0xff]  ;;  %v1003_v42 = vld [vmem:[%s652_s21 + $0x8] sm:$0xff]  ;;  %v1004_v47 = vld [vmem:[%s652_s21 + $0x10] sm:$0xff]  ;;  %s2667_s16 = scalar_lea.vmem %s2815_s9, %s2603_s15  ;;  %s644_s19 = scalar_lea.vmem %s2811_s5, %s2822_s30 }
  0x15   : > { %2263 = vmatprep.subr.mxu1 %v830_v14  ;;  %2256 = vmatpush3.msra.mxu0 %v732_v12  ;;  %v2161_v28 = vld [vmem:[%s630_s17] ss:$0 sm:$0xff]  ;;  %v1175_v45 = vld [vmem:[%s657_s25 + $0x8] sm:$0xff]  ;;  %v1005_v48 = vld [vmem:[%s652_s21 + $0x18] sm:$0xff]  ;;  %s641_s22 = scalar_lea.vmem %s2810_s4, %s2822_s30  ;;  %s647_s26 = scalar_lea.vmem %s2812_s6, %s2822_s30 }
  0x16   : > { %2264 = vmatpush3.msra.mxu1 %v830_v14  ;;  %v1002_v41 = vld [vmem:[%s652_s21] sm:$0xff]  ;;  %v1176_v49 = vld [vmem:[%s657_s25 + $0x10] sm:$0xff]  ;;  %v2351_v50 = vpack.c.bf16 %v1005_v48, %v1004_v47  ;;  %v1177_v51 = vld [vmem:[%s657_s25 + $0x18] sm:$0xff]  ;;  %s665_s15 = scalar_lea.vmem %s2816_s10, %s2822_s30  ;;  %s2753_s17 = smov 0  }
  0x17   : > { %v1174_v43 = vld [vmem:[%s657_s25] sm:$0xff]  ;;  %v2347_v44 = vpack.c.bf16 %v1003_v42, %v1002_v41  ;;  %v2359_v52 = vpack.c.bf16 %v1177_v51, %v1176_v49  ;;  %v1268_v54 = vld [vmem:[%s2667_s16 + $0x8] sm:$0xff]  ;;  %v1269_v40 = vld [vmem:[%s2667_s16 + $0x10] sm:$0xff] }
  0x18   : > { %696 = vadd.xlane.f32.xlu0 %v695_v10  ;;  %702 = vadd.xlane.f32.xlu1 %v701_v11  ;;  %v2355_v46 = vpack.c.bf16 %v1175_v45, %v1174_v43  ;;  %v1267_v53 = vld [vmem:[%s2667_s16] sm:$0xff]  ;;  %v1270_v41 = vld [vmem:[%s2667_s16 + $0x18] sm:$0xff] }
  0x19   : > { %2348 = vmatprep.subr.bf16.mxu0 %v2347_v44  ;;  %v2671_v55 = vpack.c.bf16 %v1268_v54, %v1267_v53  ;;  %v2172_v8 = vld [vmem:[%s647_s26] ss:$0 sm:$0xff] }
  0x1a   : > { %2356 = vmatprep.subr.bf16.mxu1 %v2355_v46  ;;  %v2177_v51 = vld [vmem:[%s665_s15] ss:$0 sm:$0xff] }
  0xa1   : > { %v694_v15 = vpop.xlane.xlu0 %693  ;;  %v700_v16 = vpop.xlane.xlu1 %699 }
  0xa2   : > { %v705_v17 = vmul.f32 0.125, %v694_v15  ;;  %v707_v18 = vmul.f32 0.125, %v700_v16 }
  0xa4   : > { %v709_v19 = vadd.f32 1e-05, %v705_v17  ;;  %v711_v20 = vadd.f32 1e-05, %v707_v18 }
  0xa5   : > { %v697_v21 = vpop.xlane.xlu0 %696  ;;  %v703_v22 = vpop.xlane.xlu1 %702 }
  0xa6   : > { %2422 = vrsqrt.f32 %v709_v19  ;;  %v706_v23 = vmul.f32 0.125, %v697_v21  ;;  %v708_v24 = vmul.f32 0.125, %v703_v22 }
  0xa7   : > { %2424 = vrsqrt.f32 %v711_v20 }
  0xa8   : > { %v710_v25 = vadd.f32 1e-05, %v706_v23  ;;  %v712_v26 = vadd.f32 1e-05, %v708_v24 }
  0xaa   : > { %2426 = vrsqrt.f32 %v710_v25 }
  0xab   : > { %2428 = vrsqrt.f32 %v712_v26 }
  0xb0   : > { %v2423_v27 = vpop.eup %2422 }
  0xb1   : > { %v2425_v29 = vpop.eup %2424  ;;  %v717_v30 = vmul.f32 %v2423_v27, %v683_v0  ;;  %v2171_v0 = vld [vmem:[%s644_s19] ss:$0 sm:$0xff] }
  0xb2   : > { %v719_v31 = vmul.f32 %v2425_v29, %v685_v1  ;;  %v2170_v1 = vld [vmem:[%s641_s22] ss:$0 sm:$0xff] }
  0xb3   : > { %v728_v32 = vmul.f32 %v2161_v28, %v717_v30 }
  0xb4   : > { %v2427_v33 = vpop.eup %2426  ;;  %v730_v36 = vmul.f32 %v2161_v28, %v719_v31 }
  0xb5   : > { %v2429_v34 = vpop.eup %2428  ;;  %2257 = vmatprep.mubr.msk.f32.mxu0 %vm691_vm0, %v728_v32  ;;  %2265 = vmatprep.mubr.msk.f32.mxu1 %vm691_vm0, %v728_v32  ;;  %v718_v35 = vmul.f32 %v2427_v33, %v684_v2 }
  0xb6   : > { %v720_v37 = vmul.f32 %v2429_v34, %v686_v6 }
  0xb7   : > { %v729_v38 = vmul.f32 %v2161_v28, %v718_v35 }
  0xb8   : > { %v731_v39 = vmul.f32 %v2161_v28, %v720_v37 }
  0xb9   : > { %2258 = vmatmul.mubr.msk.f32.vlgmr.msra.gmra.mrb[0].mxu0 %vm691_vm0, %v729_v38  ;;  %2266 = vmatmul.mubr.msk.f32.vlgmr.msra.gmra.mrb[0].mxu1 %vm691_vm0, %v729_v38 }
  0xba   : > { %2260 = vmatprep.mubr.msk.f32.mxu0 %vm691_vm0, %v730_v36  ;;  %2268 = vmatprep.mubr.msk.f32.mxu1 %vm691_vm0, %v730_v36 }
  0xbb   : > { %2350 = vmatpush3.bf16.msra.mxu0 %v2347_v44  ;;  %2358 = vmatpush3.bf16.msra.mxu1 %v2355_v46  ;;  %v2367_v46 = vpack.c.bf16 %v1270_v41, %v1269_v40 }
  0xbc   : > { %2352 = vmatprep.subr.bf16.mxu0 %v2351_v50  ;;  %2360 = vmatprep.subr.bf16.mxu1 %v2359_v52 }
  0xbd   : > { %2261 = vmatmul.mubr.msk.f32.gmra.mrb[2].mxu0 %vm691_vm0, %v731_v39  ;;  %2269 = vmatmul.mubr.msk.f32.gmra.mrb[2].mxu1 %vm691_vm0, %v731_v39 }
  0xbf   : > { %2354 = vmatpush3.bf16.msra.mxu0 %v2351_v50  ;;  %2362 = vmatpush3.bf16.msra.mxu1 %v2359_v52 }
  0xc0   : > { %2364 = vmatprep.subr.bf16.mxu0 %v2671_v55  ;;  %2379 = vmatprep.subr.bf16.mxu1 %v2671_v55 }
 0x18c   : > { %v2259_v56 = vpop.f32.mrb[0].mxu0  ;;  %v2267_v57 = vpop.f32.mrb[0].mxu1 }
 0x18d   : > { %926 = vst.msk [vmem:[#allocation7 + $0x9] sm:$0x7f] %vm925_vm2, %v2259_v56  ;;  %v811_v58 = vpop.f32.mrb[1].mxu0  ;;  %v897_v59 = vpop.f32.mrb[1].mxu1  ;;  %v952_v4 = vmul.f32 %v2259_v56, %v2171_v0 }
 0x18e   : > { %918 = vst.msk [vmem:[#allocation3 + $0x8] sm:$0xff] %vm916_vm3, %v2267_v57  ;;  %924 = vst.msk [vmem:[#allocation7 + $0x1] sm:$0xff] %vm916_vm3, %v811_v58  ;;  %v951_v7 = vmul.f32 %v2171_v0, %v811_v58 }
 0x18f   : > { %917 = vst.msk [vmem:[#allocation3] sm:$0xff] %vm916_vm3, %v897_v59 }
 0x190   : > { %v2262_v60 = vpop.f32.mrb[2].mxu0  ;;  %v2270_v61 = vpop.f32.mrb[2].mxu1 }
 0x191   : > { %928 = vst.msk [vmem:[#allocation7 + $0x19] sm:$0x7f] %vm925_vm2, %v2262_v60  ;;  %v821_v62 = vpop.f32.mrb[3].mxu0  ;;  %v907_v63 = vpop.f32.mrb[3].mxu1  ;;  %v954_v11 = vmul.f32 %v2262_v60, %v2171_v0 }
 0x192   : > { %920 = vst.msk [vmem:[#allocation3 + $0x18] sm:$0xff] %vm916_vm3, %v2270_v61  ;;  %927 = vst.msk [vmem:[#allocation7 + $0x11] sm:$0xff] %vm916_vm3, %v821_v62  ;;  %v953_v14 = vmul.f32 %v2171_v0, %v821_v62 }
 0x193   : > { %919 = vst.msk [vmem:[#allocation3 + $0x10] sm:$0xff] %vm916_vm3, %v907_v63 }
 0x195   : > { %v929_v2 = vld [vmem:[#allocation7] sm:$0xff]  ;;  %v930_v3 = vld [vmem:[#allocation7 + $0x8] sm:$0xff] }
 0x196   : > { %v940_v5 = vmul.f32 %v2170_v1, %v929_v2  ;;  %v941_v6 = vmul.f32 %v2170_v1, %v930_v3 }
 0x198   : > { %v955_v9 = vadd.f32 %v951_v7, %v940_v5  ;;  %v956_v10 = vadd.f32 %v952_v4, %v941_v6 }
 0x199   : > { %v931_v12 = vld [vmem:[#allocation7 + $0x10] sm:$0xff]  ;;  %v932_v15 = vld [vmem:[#allocation7 + $0x18] sm:$0xff] }
 0x19a   : > { %v966_v16 = vadd.f32 %v2172_v8, %v955_v9  ;;  %v967_v17 = vadd.f32 %v2172_v8, %v956_v10  ;;  %v942_v18 = vmul.f32 %v2170_v1, %v931_v12  ;;  %v943_v19 = vmul.f32 %v2170_v1, %v932_v15 }
 0x19c   : > { %v970_v20 = vsub.f32 0.0, %v966_v16  ;;  %v971_v21 = vsub.f32 0.0, %v967_v17  ;;  %v957_v22 = vadd.f32 %v953_v14, %v942_v18  ;;  %v958_v23 = vadd.f32 %v954_v11, %v943_v19 }
 0x19e   : > { %v974_v24 = vmul.f32 1.442695, %v970_v20  ;;  %v976_v25 = vmul.f32 1.442695, %v971_v21  ;;  %v968_v26 = vadd.f32 %v2172_v8, %v957_v22  ;;  %v969_v27 = vadd.f32 %v2172_v8, %v958_v23 }
 0x1a0   : > { %2430 = vpow2.f32 %v974_v24  ;;  %v972_v28 = vsub.f32 0.0, %v968_v26  ;;  %v973_v29 = vsub.f32 0.0, %v969_v27 }
 0x1a1   : > { %2432 = vpow2.f32 %v976_v25 }
 0x1a2   : > { %v978_v30 = vmul.f32 1.442695, %v972_v28  ;;  %v980_v31 = vmul.f32 1.442695, %v973_v29 }
 0x1a4   : > { %2434 = vpow2.f32 %v978_v30 }
 0x1a5   : > { %2436 = vpow2.f32 %v980_v31 }
 0x1aa   : > { %v2431_v32 = vpop.eup %2430 }
 0x1ab   : > { %v2433_v33 = vpop.eup %2432  ;;  %v982_v34 = vadd.f32 1.0, %v2431_v32 }
 0x1ac   : > { %v983_v35 = vadd.f32 1.0, %v2433_v33 }
 0x1ad   : > { %2438 = vrcp.f32 %v982_v34 }
 0x1ae   : > { %v2435_v36 = vpop.eup %2434  ;;  %2440 = vrcp.f32 %v983_v35 }
 0x1af   : > { %v2437_v37 = vpop.eup %2436  ;;  %v984_v38 = vadd.f32 1.0, %v2435_v36 }
 0x1b0   : > { %v985_v39 = vadd.f32 1.0, %v2437_v37 }
 0x1b1   : > { %2442 = vrcp.f32 %v984_v38 }
 0x1b2   : > { %2444 = vrcp.f32 %v985_v39 }
 0x1b7   : > { %v2439_v42 = vpop.eup %2438 }
 0x1b8   : > { %v2441_v43 = vpop.eup %2440  ;;  %v994_v44 = vmul.f32 %v2439_v42, %v966_v16 }
 0x1b9   : > { %v995_v45 = vmul.f32 %v2441_v43, %v967_v17 }
 0x1ba   : > { %998 = vst.msk [vmem:[#allocation2] sm:$0xff] %vm916_vm3, %v994_v44  ;;  %2279 = vmatprep.mubr.msk.f32.mxu0 %vm916_vm3, %v994_v44  ;;  %2293 = vmatprep.mubr.msk.f32.mxu1 %vm916_vm3, %v994_v44 }
 0x1bb   : > { %v2443_v47 = vpop.eup %2442  ;;  %999 = vst.msk [vmem:[#allocation2 + $0x8] sm:$0xff] %vm916_vm3, %v995_v45  ;;  %2280 = vmatmul.mubr.msk.f32.vlgmr.msra.gmra.mrb[4].mxu0 %vm916_vm3, %v995_v45  ;;  %2294 = vmatmul.mubr.msk.f32.vlgmr.msra.gmra.mrb[4].mxu1 %vm916_vm3, %v995_v45 }
 0x1bc   : > { %v2445_v48 = vpop.eup %2444  ;;  %2366 = vmatpush3.bf16.msra.mxu0 %v2671_v55  ;;  %2381 = vmatpush3.bf16.msra.mxu1 %v2671_v55  ;;  %v996_v49 = vmul.f32 %v2443_v47, %v968_v26 }
 0x1bd   : > { %v997_v50 = vmul.f32 %v2445_v48, %v969_v27  ;;  %2368 = vmatprep.subr.bf16.mxu0 %v2367_v46  ;;  %2380 = vmatprep.subr.bf16.mxu1 %v2367_v46 }
 0x1be   : > { %1000 = vst.msk [vmem:[#allocation2 + $0x10] sm:$0xff] %vm916_vm3, %v996_v49  ;;  %2282 = vmatprep.mubr.msk.f32.mxu0 %vm916_vm3, %v996_v49  ;;  %2296 = vmatprep.mubr.msk.f32.mxu1 %vm916_vm3, %v996_v49 }
 0x1bf   : > { %1001 = vst.msk [vmem:[#allocation2 + $0x18] sm:$0xff] %vm916_vm3, %v997_v50  ;;  %2283 = vmatmul.mubr.msk.f32.gmra.mrb[6].mxu0 %vm916_vm3, %v997_v50  ;;  %2297 = vmatmul.mubr.msk.f32.gmra.mrb[6].mxu1 %vm916_vm3, %v997_v50 }
 0x1c0   : > { %2370 = vmatpush3.bf16.msra.mxu0 %v2367_v46  ;;  %2382 = vmatpush3.bf16.msra.mxu1 %v2367_v46 }
 0x1c1   : > { %2307 = vmatprep.mubr.msk.f32.mxu0 %vm916_vm3, %v994_v44  ;;  %2310 = vmatprep.mubr.msk.f32.mxu1 %vm916_vm3, %v996_v49 }
 0x1c3   : > { %2308 = vmatmul.mubr.msk.f32.vlgmr.msra.gmra.mrb[8].mxu0 %vm916_vm3, %v995_v45  ;;  %2311 = vmatmul.mubr.msk.f32.vlgmr.msra.gmra.mrb[8].mxu1 %vm916_vm3, %v997_v50 }
 0x28e   : > { %v2281_v52 = vpop.f32.mrb[4].mxu0  ;;  %v2295_v53 = vpop.f32.mrb[4].mxu1 }
 0x28f   : > { %v2717_v54 = vadd.f32 %v2281_v52, %v2177_v51  ;;  %1264 = vst.msk [vmem:[#allocation5 + $0x8] sm:$0xff] %vm691_vm0, %v2295_v53  ;;  %v1084_v55 = vpop.f32.mrb[5].mxu0  ;;  %v1244_v56 = vpop.f32.mrb[5].mxu1  ;;  %v2749_v53 = vmov 0.0  }
 0x290   : > { %v2720_v57 = vadd.f32 %v2177_v51, %v1084_v55  ;;  %1263 = vst.msk [vmem:[#allocation5] sm:$0xff] %vm691_vm0, %v1244_v56 }
 0x291   : > { %v1119_v58 = vmin.f32 %v2717_v54, 20.0  ;;  %vm1115_vm5 = vcmp.gt.f32.partialorder %v2717_v54, 20.0 }
 0x292   : > { %v1118_v59 = vmin.f32 %v2720_v57, 20.0  ;;  %v2284_v60 = vpop.f32.mrb[6].mxu0  ;;  %v2298_v61 = vpop.f32.mrb[6].mxu1  ;;  %vm1114_vm7 = vcmp.gt.f32.partialorder %v2720_v57, 20.0 }
 0x293   : > { %v1124_v62 = vmul.f32 1.442695, %v1119_v58  ;;  %v2725_v63 = vadd.f32 %v2284_v60, %v2177_v51  ;;  %1266 = vst.msk [vmem:[#allocation5 + $0x18] sm:$0xff] %vm691_vm0, %v2298_v61  ;;  %v1094_v0 = vpop.f32.mrb[7].mxu0  ;;  %v1254_v1 = vpop.f32.mrb[7].mxu1 }
 0x294   : > { %v1122_v2 = vmul.f32 1.442695, %v1118_v59  ;;  %v2728_v3 = vadd.f32 %v2177_v51, %v1094_v0  ;;  %1265 = vst.msk [vmem:[#allocation5 + $0x10] sm:$0xff] %vm691_vm0, %v1254_v1 }
 0x295   : > { %2446 = vpow2.f32 %v1124_v62  ;;  %v1121_v4 = vmin.f32 %v2725_v63, 20.0  ;;  %vm1117_vm9 = vcmp.gt.f32.partialorder %v2725_v63, 20.0 }
 0x296   : > { %2448 = vpow2.f32 %v1122_v2  ;;  %v1120_v5 = vmin.f32 %v2728_v3, 20.0  ;;  %v2309_v6 = vpop.f32.mrb[8].mxu0  ;;  %v2312_v7 = vpop.f32.mrb[8].mxu1  ;;  %vm1116_vm11 = vcmp.gt.f32.partialorder %v2728_v3, 20.0 }
 0x297   : > { %v1128_v8 = vmul.f32 1.442695, %v1121_v4  ;;  %1357 = vst.msk [vmem:[#allocation6 + $0x8] sm:$0xff] %vm691_vm0, %v2309_v6  ;;  %1359 = vst.msk [vmem:[#allocation6 + $0x18] sm:$0xff] %vm691_vm0, %v2312_v7  ;;  %v1337_v9 = vpop.f32.mrb[9].mxu0  ;;  %v1347_v10 = vpop.f32.mrb[9].mxu1 }
 0x298   : > { %v1126_v11 = vmul.f32 1.442695, %v1120_v5  ;;  %1356 = vst.msk [vmem:[#allocation6] sm:$0xff] %vm691_vm0, %v1337_v9  ;;  %1358 = vst.msk [vmem:[#allocation6 + $0x10] sm:$0xff] %vm691_vm0, %v1347_v10 }
 0x299   : > { %2450 = vpow2.f32 %v1128_v8 }
 0x29a   : > { %2452 = vpow2.f32 %v1126_v11 }
 0x29f   : > { %v2447_v12 = vpop.eup %2446 }
 0x2a0   : > { %v2449_v14 = vpop.eup %2448  ;;  %v1139_v15 = vadd.f32 1.0, %v2447_v12  ;;  %v1142_v20 = vmul.f32 -0.5, %v2447_v12  ;;  %v1145_v24 = vand.u32 2147483647, %v2447_v12 }
 0x2a1   : > { %v1130_v16 = vadd.f32 1.0, %v2449_v14  ;;  %v1133_v22 = vmul.f32 -0.5, %v2449_v14  ;;  %v1136_v28 = vand.u32 2147483647, %v2449_v14 }
 0x2a2   : > { %2454 = vlog2.f32 %v1139_v15  ;;  %v1143_v23 = vadd.f32 1.0, %v1142_v20  ;;  %vm1146_vm4 = vcmp.lt.f32.partialorder %v1145_v24, 0.0004427343 }
 0x2a3   : > { %v2451_v17 = vpop.eup %2450  ;;  %2456 = vlog2.f32 %v1130_v16  ;;  %v1134_v26 = vadd.f32 1.0, %v1133_v22  ;;  %vm1137_vm6 = vcmp.lt.f32.partialorder %v1136_v28, 0.0004427343 }
 0x2a4   : > { %v2453_v18 = vpop.eup %2452  ;;  %v1157_v19 = vadd.f32 1.0, %v2451_v17  ;;  %v1160_v25 = vmul.f32 -0.5, %v2451_v17  ;;  %v1144_v32 = vmul.f32 %v2447_v12, %v1143_v23  ;;  %v1163_v36 = vand.u32 2147483647, %v2451_v17 }
 0x2a5   : > { %v1148_v21 = vadd.f32 1.0, %v2453_v18  ;;  %v1151_v27 = vmul.f32 -0.5, %v2453_v18  ;;  %v1135_v35 = vmul.f32 %v2449_v14, %v1134_v26  ;;  %v1154_v39 = vand.u32 2147483647, %v2453_v18 }
 0x2a6   : > { %2458 = vlog2.f32 %v1157_v19  ;;  %v1161_v33 = vadd.f32 1.0, %v1160_v25  ;;  %vm1164_vm8 = vcmp.lt.f32.partialorder %v1163_v36, 0.0004427343 }
 0x2a7   : > { %2460 = vlog2.f32 %v1148_v21  ;;  %v1152_v37 = vadd.f32 1.0, %v1151_v27  ;;  %vm1155_vm10 = vcmp.lt.f32.partialorder %v1154_v39, 0.0004427343 }
 0x2a8   : > { %v1162_v46 = vmul.f32 %v2451_v17, %v1161_v33 }
 0x2a9   : > { %v1153_v48 = vmul.f32 %v2453_v18, %v1152_v37 }
 0x2ac   : > { %v2455_v29 = vpop.eup %2454 }
 0x2ad   : > { %v2457_v30 = vpop.eup %2456  ;;  %v1141_v31 = vmul.f32 0.6931472, %v2455_v29 }
 0x2ae   : > { %v1132_v34 = vmul.f32 0.6931472, %v2457_v30 }
 0x2af   : > { %v1147_v38 = vsel %vm1146_vm4, %v1144_v32, %v1141_v31 }
 0x2b0   : > { %v2459_v40 = vpop.eup %2458  ;;  %v1167_v41 = vsel %vm1115_vm5, %v2717_v54, %v1147_v38  ;;  %v1138_v42 = vsel %vm1137_vm6, %v1135_v35, %v1132_v34  ;;  %v2751_v54 = vmov 0.0  }
 0x2b1   : > { %v2461_v43 = vpop.eup %2460  ;;  %1171 = vst.msk [vmem:[#allocation4 + $0x8] sm:$0xff] %vm916_vm3, %v1167_v41  ;;  %v1166_v44 = vsel %vm1114_vm7, %v2720_v57, %v1138_v42  ;;  %v1159_v45 = vmul.f32 0.6931472, %v2459_v40 }
 0x2b2   : > { %1170 = vst.msk [vmem:[#allocation4] sm:$0xff] %vm916_vm3, %v1166_v44  ;;  %v1150_v47 = vmul.f32 0.6931472, %v2461_v43 }
 0x2b3   : > { %v1165_v49 = vsel %vm1164_vm8, %v1162_v46, %v1159_v45 }
 0x2b4   : > { %v1169_v50 = vsel %vm1117_vm9, %v2725_v63, %v1165_v49  ;;  %v1156_v51 = vsel %vm1155_vm10, %v1153_v48, %v1150_v47 }
 0x2b5   : > { %1173 = vst.msk [vmem:[#allocation4 + $0x18] sm:$0xff] %vm916_vm3, %v1169_v50  ;;  %v1168_v52 = vsel %vm1116_vm11, %v2728_v3, %v1156_v51 }
 0x2b6   : > { %1172 = vst.msk [vmem:[#allocation4 + $0x10] sm:$0xff] %vm916_vm3, %v1168_v52 }
 0x2b7 LB: >> { %v2515_v55 = vmov 0.0   ;;  %vm2516_vm12 = vmmov 0   ;;  %s1375_s19 = scalar_lea.vmem [#allocation5], %s2512_s17  ;;  %s1369_s20 = scalar_lea.vmem [#allocation4], %s2512_s17  ;;  %vm1433_vm13 = vcmask 1040384   ;;  %vm1429_vm14 = vcmask 7168   ;;  %s2512_s17 = sphi %s2753_s17, %s1366_s17   ;;  %v2508_v54 = vphi %v2751_v54, %v1617_v54   ;;  %v2504_v53 = vphi %v2749_v53, %v1618_v53  }
 0x2b8   : >> { %2313 = vmatprep.subr.mxu0 %v2515_v55  ;;  %2315 = vmatprep.mubr.msk.f32.mxu0 %vm2516_vm12, %v2515_v55  ;;  %v1376_v56 = vld [vmem:[%s1375_s19] sm:$0x1]  ;;  %v1377_v58 = vld [vmem:[%s1375_s19 + $0x10] sm:$0x1]  ;;  %s1372_s21 = scalar_lea.vmem [#allocation2], %s2512_s17  ;;  %v1381_v2 = vlaneseq  ;;  %s1378_s22 = scalar_lea.vmem [#allocation6], %s2512_s17 }
 0x2b9   : >> { %2318 = vmatprep.subr.mxu1 %v2515_v55  ;;  %2320 = vmatprep.mubr.msk.f32.mxu1 %vm2516_vm12, %v2515_v55  ;;  %v1373_v59 = vld [vmem:[%s1372_s21] sm:$0x1]  ;;  %v1374_v61 = vld [vmem:[%s1372_s21 + $0x10] sm:$0x1]  ;;  %s1765_s23 = scalar_lea.vmem [#allocation7], %s2512_s17  ;;  %s1366_s17 = sadd.s32 1, %s2512_s17  }
 0x2ba   : >> { %1397 = vxpose.xlu0.b32.start.end [1/1] (short) (narrow) %v1376_v56, 8  ;;  %v1382_v3 = vshrl.u32 %v1381_v2, 7  ;;  %v1379_v18 = vld [vmem:[%s1378_s22] sm:$0x1]  ;;  %v1380_v21 = vld [vmem:[%s1378_s22 + $0x10] sm:$0x1] }
 0x2bb   : >> { %p1363_p4 = scmp.ge.s32.totalorder %s1366_s17, 16  }
 0x2bc   : >> { %v1383_v4 = vsub.s32 0, %v1382_v3  ;;  %v1827_v26 = vld [vmem:[%s2617_s24] sm:$0xff] (%p1363_p4)  ;;  %v1828_v27 = vld [vmem:[%s2617_s24 + $0x8] sm:$0xff] (%p1363_p4)  ;;  %v1829_v28 = vld [vmem:[%s2617_s24 + $0x10] sm:$0xff] (%p1363_p4) }
 0x2bd   : >> { %v1370_v57 = vld [vmem:[%s1369_s20] sm:$0x1]  ;;  %v1371_v60 = vld [vmem:[%s1369_s20 + $0x10] sm:$0x1]  ;;  %v2371_v29 = vpack.c.bf16 (%p1363_p4), %v1828_v27, %v1827_v26  ;;  %v1830_v30 = vld [vmem:[%s2617_s24 + $0x18] sm:$0xff] (%p1363_p4) }
 0x2be   : >> { %v1395_v62 = vmul.f32 %v1373_v59, %v1370_v57  ;;  %v1396_v63 = vmul.f32 %v1374_v61, %v1371_v60  ;;  %1507 = vxpose.xlu0.b32.start.end [1/1] (short) (narrow) %v1377_v58, 8  ;;  %v1384_v5 = vrot.slane %v1370_v57, %v1383_v4  ;;  %v1388_v7 = vrot.slane %v1371_v60, %v1383_v4  ;;  %v1791_v32 = vld [vmem:[#allocation3] sm:$0xff] (%p1363_p4)  ;;  %v1793_v34 = vld [vmem:[#allocation3 + $0x10] sm:$0xff] (%p1363_p4)  ;;  %v1792_v36 = vld [vmem:[#allocation3 + $0x8] sm:$0xff] (%p1363_p4) }
 0x2bf   : > { %v2375_v31 = vpack.c.bf16 (%p1363_p4), %v1830_v30, %v1829_v28  ;;  %v1795_v33 = vsub.f32 (%p1363_p4), 0.0, %v1791_v32  ;;  %v1797_v35 = vsub.f32 (%p1363_p4), 0.0, %v1793_v34  ;;  %v1796_v37 = vsub.f32 (%p1363_p4), 0.0, %v1792_v36  ;;  %v1794_v38 = vld [vmem:[#allocation3 + $0x18] sm:$0xff] (%p1363_p4)  ;;  %v1772_v51 = vld [vmem:[#allocation2] sm:$0xff] (%p1363_p4) }
 0x2c0   : >> { %2314 = vmatpush3.msk.msra.mxu0 %vm1433_vm13, %v1395_v62  ;;  %2319 = vmatpush3.msk.msra.mxu1 %vm1433_vm13, %v1396_v63  ;;  %v1389_v6 = vmul.f32 %v1384_v5, %v2636_v13  ;;  %v1390_v9 = vmul.f32 %v1388_v7, %v2636_v13  ;;  %v1798_v40 = vsub.f32 (%p1363_p4), 0.0, %v1794_v38  ;;  %v2192_v52 = vld [vmem:[%s672_s18] ss:$0 sm:$0xff] (%p1363_p4)  ;;  %v1775_v56 = vld [vmem:[#allocation2 + $0x18] sm:$0xff] (%p1363_p4) }
 0x2c1   : >> { %2323 = vmatprep.subr.mxu0 %v2515_v55  ;;  %2328 = vmatprep.subr.mxu1 %v2515_v55  ;;  %v1799_v13 = vmul.f32 (%p1363_p4), 1.442695, %v1795_v33  ;;  %v1803_v39 = vmul.f32 (%p1363_p4), 1.442695, %v1797_v35  ;;  %v1801_v41 = vmul.f32 (%p1363_p4), 1.442695, %v1796_v37  ;;  %v1786_v62 = vmul.f32 (%p1363_p4), %v2192_v52, %v1775_v56 }
 0x2c2   : >> { %v1391_v8 = vmul.f32 1.442695, %v1389_v6  ;;  %v1393_v10 = vmul.f32 1.442695, %v1390_v9  ;;  %v1805_v42 = vmul.f32 (%p1363_p4), 1.442695, %v1798_v40 }
 0x2c4   : >> { %2462 = vpow2.f32 %v1391_v8 }
 0x2c5   : >> { %2464 = vpow2.f32 %v1393_v10 }
 0x2c6   : > { %2466 = vpow2.f32 (%p1363_p4), %v1799_v13 }
 0x2c7   : > { %2468 = vpow2.f32 (%p1363_p4), %v1803_v39 }
 0x2c8   : > { %2470 = vpow2.f32 (%p1363_p4), %v1801_v41 }
 0x2c9   : > { %2472 = vpow2.f32 (%p1363_p4), %v1805_v42 }
 0x2ce   : >> { %v2463_v11 = vpop.eup %2462 }
 0x2cf   : >> { %v1615_v12 = vmul.f32 %v2508_v54, %v2463_v11  ;;  %v2465_v14 = vpop.eup %2464 }
 0x2d0   : >> { %v1616_v17 = vmul.f32 %v2504_v53, %v2465_v14  ;;  %v2467_v43 = vpop.eup (%p1363_p4), %2466 }
 0x2d1   : > { %v2469_v44 = vpop.eup (%p1363_p4), %2468  ;;  %v1807_v45 = vadd.f32 (%p1363_p4), 1.0, %v2467_v43 }
 0x2d2   : > { %v2471_v46 = vpop.eup (%p1363_p4), %2470  ;;  %v1809_v47 = vadd.f32 (%p1363_p4), 1.0, %v2469_v44 }
 0x2d3   : > { %v2473_v48 = vpop.eup (%p1363_p4), %2472  ;;  %2474 = vrcp.f32 (%p1363_p4), %v1807_v45  ;;  %v1808_v49 = vadd.f32 (%p1363_p4), 1.0, %v2471_v46 }
 0x2d4   : > { %2476 = vrcp.f32 (%p1363_p4), %v1809_v47  ;;  %v1810_v50 = vadd.f32 (%p1363_p4), 1.0, %v2473_v48 }
 0x2d5   : > { %2478 = vrcp.f32 (%p1363_p4), %v1808_v49 }
 0x2d6   : > { %2480 = vrcp.f32 (%p1363_p4), %v1810_v50 }
 0x33a   : >> { %v1413_v0 = vpop.trf.xlu0 }
 0x33b   : >> { %2316 = vmatmul.mubr.msk.f32.vlgmr.msra.gmra.mrb[0].mxu0 %vm1429_vm14, %v1413_v0 }
 0x33c   : >> { %2325 = vmatprep.mubr.msk.f32.mxu0 %vm2516_vm12, %v2515_v55 }
 0x33e   : >> { %v1523_v1 = vpop.trf.xlu0 }
 0x33f   : >> { %2321 = vmatmul.mubr.msk.f32.vlgmr.msra.gmra.mrb[0].mxu1 %vm1429_vm14, %v1523_v1  ;;  %v2475_v1 = vpop.eup (%p1363_p4), %2474 }
 0x340   : >> { %2330 = vmatprep.mubr.msk.f32.mxu1 %vm2516_vm12, %v2515_v55  ;;  %v1783_v55 = vmul.f32 (%p1363_p4), %v2192_v52, %v1772_v51  ;;  %v2477_v3 = vpop.eup (%p1363_p4), %2476  ;;  %v1819_v4 = vmul.f32 (%p1363_p4), %v2475_v1, %v1791_v32 }
 0x341   : > { %v2479_v6 = vpop.eup (%p1363_p4), %2478  ;;  %v1821_v7 = vmul.f32 (%p1363_p4), %v2477_v3, %v1793_v34 }
 0x342   : > { %v2481_v9 = vpop.eup (%p1363_p4), %2480  ;;  %v1820_v11 = vmul.f32 (%p1363_p4), %v2479_v6, %v1792_v36 }
 0x343   : > { %v1822_v14 = vmul.f32 (%p1363_p4), %v2481_v9, %v1794_v38 }
 0x40e   : >> { %v1503_v15 = vpop.f32.mrb[0].mxu0 }
 0x40f   : >> { %v1617_v54 = vadd.f32 %v1615_v12, %v1503_v15   ;;  %v2317_v16 = vpop.f32.mrb[1].mxu0 }
 0x411   : >> { %2324 = vmatpush3.msra.mxu0 %v1617_v54  ;;  %v1773_v54 = vld [vmem:[#allocation2 + $0x8] sm:$0xff] (%p1363_p4) }
 0x412   : >> { %v1611_v19 = vpop.f32.mrb[0].mxu1  ;;  %2326 = vmatmul.mubr.msk.f32.vlgmr.msra.gmra.mrb[2].mxu0 %vm691_vm0, %v1379_v18  ;;  %2372 = vmatprep.subr.bf16.mxu0 (%p1363_p4), %v2371_v29  ;;  %v1784_v60 = vmul.f32 (%p1363_p4), %v2192_v52, %v1773_v54 }
 0x413   : >> { %v1618_v53 = vadd.f32 %v1616_v17, %v1611_v19   ;;  %v2322_v20 = vpop.f32.mrb[1].mxu1  ;;  %2374 = vmatpush3.bf16.msra.mxu0 (%p1363_p4), %v2371_v29 }
 0x414   : > { %2376 = vmatprep.subr.bf16.mxu0 (%p1363_p4), %v2375_v31 }
 0x415   : >> { %2329 = vmatpush3.msra.mxu1 %v1618_v53  ;;  %v1774_v53 = vld [vmem:[#allocation2 + $0x10] sm:$0xff] (%p1363_p4) }
 0x416   : >> { %2331 = vmatmul.mubr.msk.f32.vlgmr.msra.gmra.mrb[2].mxu1 %vm691_vm0, %v1380_v21  ;;  %2383 = vmatprep.subr.bf16.mxu1 (%p1363_p4), %v2371_v29  ;;  %v1785_v58 = vmul.f32 (%p1363_p4), %v2192_v52, %v1774_v53 }
 0x417   : > { %2385 = vmatpush3.bf16.msra.mxu1 (%p1363_p4), %v2371_v29  ;;  %2378 = vmatpush3.bf16.msra.mxu0 (%p1363_p4), %v2375_v31 }
 0x418   : > { %2384 = vmatprep.subr.bf16.mxu1 (%p1363_p4), %v2375_v31 }
 0x41b   : > { %2386 = vmatpush3.bf16.msra.mxu1 (%p1363_p4), %v2375_v31 }
 0x4e4   : > { %1365 = sbr.rel (!%p1363_p4) target bundleno = 695 (0x2b7), region = 157 }
 0x4e5   : >> { %v1688_v22 = vpop.f32.mrb[2].mxu0 }
 0x4e6   : >> { %1766 = vst.msk [vmem:[%s1765_s23] sm:$0x1] %vm921_vm1, %v1688_v22  ;;  %v2327_v23 = vpop.f32.mrb[3].mxu0 }
 0x4e9   : >> { %v1761_v24 = vpop.f32.mrb[2].mxu1 }
 0x4ea   : >> { %1767 = vst.msk [vmem:[%s1765_s23 + $0x10] sm:$0x1] %vm921_vm1, %v1761_v24  ;;  %v2332_v25 = vpop.f32.mrb[3].mxu1 }
 0x4f1   : > { %v1768_v57 = vld [vmem:[#allocation7] sm:$0xff]  ;;  %v1770_v59 = vld [vmem:[#allocation7 + $0x10] sm:$0xff]  ;;  %v1769_v61 = vld [vmem:[#allocation7 + $0x8] sm:$0xff] }
 0x4f2   : > { %v1787_v63 = vadd.f32 %v1783_v55, %v1768_v57  ;;  %v1771_v0 = vld [vmem:[#allocation7 + $0x18] sm:$0xff]  ;;  %v1789_v2 = vadd.f32 %v1785_v58, %v1770_v59  ;;  %v1788_v5 = vadd.f32 %v1784_v60, %v1769_v61 }
 0x4f3   : > { %v1790_v8 = vadd.f32 %v1786_v62, %v1771_v0 }
 0x4f4   : > { %v1823_v10 = vmul.f32 %v1819_v4, %v1787_v63  ;;  %v1825_v12 = vmul.f32 %v1821_v7, %v1789_v2  ;;  %v1824_v15 = vmul.f32 %v1820_v11, %v1788_v5 }
 0x4f5   : > { %v1826_v16 = vmul.f32 %v1822_v14, %v1790_v8 }
 0x4f6   : > { %2341 = vmatprep.mubr.msk.f32.mxu0 %vm916_vm3, %v1823_v10  ;;  %2344 = vmatprep.mubr.msk.f32.mxu1 %vm916_vm3, %v1825_v12 }
 0x4f7   : > { %2342 = vmatmul.mubr.msk.f32.vlgmr.msra.gmra.mrb[0].mxu0 %vm916_vm3, %v1824_v15  ;;  %2345 = vmatmul.mubr.msk.f32.vlgmr.msra.gmra.mrb[0].mxu1 %vm916_vm3, %v1826_v16 }
 0x5ca   : > { %v2343_v17 = vpop.f32.mrb[0].mxu0  ;;  %v2346_v18 = vpop.f32.mrb[0].mxu1 }
 0x5cb   : > { %1929 = vst.msk [vmem:[%s2623_s27 + $0x8] sm:$0xff] %vm691_vm0, %v2343_v17  ;;  %v1909_v19 = vpop.f32.mrb[1].mxu0  ;;  %1931 = vst.msk [vmem:[%s2623_s27 + $0x18] sm:$0xff] %vm691_vm0, %v2346_v18  ;;  %v1919_v20 = vpop.f32.mrb[1].mxu1 }
 0x5cc   : > { %1928 = vst.msk [vmem:[%s2623_s27] sm:$0xff] %vm691_vm0, %v1909_v19  ;;  %1930 = vst.msk [vmem:[%s2623_s27 + $0x10] sm:$0xff] %vm691_vm0, %v1919_v20 }
 0x5cd PF: > { %s24_s29 = sadd.s32 1, %s2500_s29  }
 0x5ce   : > { %p21_p5 = scmp.ge.s32.totalorder %s24_s29, 4  }
 0x5d0   :  { %23 = sbr.rel (!%p21_p5) target bundleno = 1 (0x1), region = 168 }

// kernel: snakenet_forward.9
= control target key start
LH: loop header
LB: loop body
LE: loop exit
PB: predicated region body
PF: predicated region fallthrough
CT: control target
= control target key end

     0   :  { %s3042_s19 = smov 0   ;;  %s3044_s20 = smov 0   ;;  %s3331_s0 = inlined_call_operand.vmem [shape: f32[2,79,32], index: 0, kind: input, shape index: {}]   ;;  %s3332_s1 = inlined_call_operand.vmem [shape: bf16[16,32,1], index: 1, kind: input, shape index: {}]   ;;  %s3333_s2 = inlined_call_operand.<no memory space> [shape: f32[1,1], index: 2, kind: input, shape index: {}]   ;;  %s3334_s4 = inlined_call_operand.vmem [shape: f32[2,64,1], index: 4, kind: output, shape index: {}]   ;;  %s3335_s3 = inlined_call_operand.<no memory space> [shape: f32[1,1], index: 3, kind: input, shape index: {}]  }
   0x1   :  { %v9_v0 = vstv %s3333_s2  ;;  %v11_v1 = vstv %s3335_s3  ;;  %s3046_s21 = smov 0  }
   0x2   :  { %10 = vst [vmem:[#allocation2] sm:$0x1] %v9_v0  ;;  %12 = vst [vmem:[#allocation3] sm:$0x1] %v11_v1 }
   0x3 LB: > { %s30_s2 = sadd.s32 1, %s3005_s20  ;;  %p2237_p0 = scmp.ge.s32.totalorder %s3009_s21, 1  ;;  %s3009_s21 = sphi %s3046_s21, %s18_s21   ;;  %s3005_s20 = sphi %s3044_s20, %s3337_s20   ;;  %s3001_s19 = sphi %s3042_s19, %s3336_s19  }
   0x4   : > { %p32_p1 = scmp.ge.s32.totalorder %s30_s2, 2  ;;  %p180_p2 = scmp.lt.s32.totalorder %s3009_s21, 3 }
   0x6   : > { %s3339_s2 = smov (%p32_p1, %s30_s2), 0  ;;  %p181_p3 = pnand %p2237_p0, %p180_p2 }
   0x7   : > { %v2955_v2 = vld [vmem:[%s3332_s1 + $0x10] sm:$0xff] (!%p181_p3)   ;;  %p210_p4 = scmp.lt.s32.totalorder (!%p181_p3), %s3001_s19, 1  ;;  %v2956_v3 = vld [vmem:[%s3332_s1 + $0x80] sm:$0xff] (!%p181_p3)   ;;  %v2957_v4 = vld [vmem:[%s3332_s1 + $0x18] sm:$0xff] (!%p181_p3)   ;;  %vm275_vm0 = vcmask (!%p181_p3), 261120   ;;  %vm2096_vm1 = vcmask (!%p181_p3), 7168  }
   0x8   : > { %184 = sbr.rel (%p181_p3) target bundleno = 366 (0x16e), region = 36  ;;  %2618 = vmatprep.subr.bf16.mxu1 (!%p181_p3), %v2955_v2  ;;  %2714 = vmatprep.subr.bf16.mxu0 (!%p181_p3), %v2956_v3  ;;  %v2958_v5 = vld [vmem:[%s3332_s1 + $0x88] sm:$0xff] (!%p181_p3)   ;;  %v2959_v6 = vld [vmem:[%s3332_s1] sm:$0xff] (!%p181_p3)   ;;  %v2960_v7 = vld [vmem:[%s3332_s1 + $0x90] sm:$0xff] (!%p181_p3)  }
   0x9   : > { %2619 = vmatpush3.bf16.msra.mxu1 (!%p181_p3), %v2955_v2  ;;  %2715 = vmatpush3.bf16.msra.mxu0 (!%p181_p3), %v2956_v3  ;;  %v2961_v15 = vld [vmem:[%s3332_s1 + $0x8] sm:$0xff] (!%p181_p3)   ;;  %v2962_v31 = vld [vmem:[%s3332_s1 + $0x98] sm:$0xff] (!%p181_p3)   ;;  %v2963_v33 = vld [vmem:[%s3332_s1 + $0x20] sm:$0xff] (!%p181_p3)  }
   0xa   : > { %2620 = vmatprep.subr.bf16.mxu1 (!%p181_p3), %v2957_v4  ;;  %2716 = vmatprep.subr.bf16.mxu0 (!%p181_p3), %v2958_v5  ;;  %v2964_v35 = vld [vmem:[%s3332_s1 + $0xa0] sm:$0xff] (!%p181_p3)   ;;  %v2965_v43 = vld [vmem:[%s3332_s1 + $0x28] sm:$0xff] (!%p181_p3)   ;;  %v2967_v48 = vld [vmem:[%s3332_s1 + $0x30] sm:$0xff] (!%p181_p3)  }
   0xb   : > { %v2966_v44 = vld [vmem:[%s3332_s1 + $0xa8] sm:$0xff] (!%p181_p3)   ;;  %v2968_v50 = vld [vmem:[%s3332_s1 + $0xb0] sm:$0xff] (!%p181_p3)   ;;  %v2969_v0 = vld [vmem:[%s3332_s1 + $0x38] sm:$0xff] (!%p181_p3)  }
   0xc   : > { %v2970_v2 = vld [vmem:[%s3332_s1 + $0xb8] sm:$0xff] (!%p181_p3)  }
   0xd   : > { %2621 = vmatpush3.bf16.msra.mxu1 (!%p181_p3), %v2957_v4  ;;  %2717 = vmatpush3.bf16.msra.mxu0 (!%p181_p3), %v2958_v5  ;;  %v2971_v5 = vld [vmem:[%s3332_s1 + $0x40] sm:$0xff] (!%p181_p3)  }
   0xe   : > { %2630 = vmatprep.subr.bf16.mxu1 (!%p181_p3), %v2959_v6  ;;  %2726 = vmatprep.subr.bf16.mxu0 (!%p181_p3), %v2960_v7 }
   0xf   : > { %s3341_s19 = smov (!%p210_p4, %s3001_s19), 1 }
  0x10   : > { %s2930_s29 = smul.u32 80, %s3341_s19  ;;  %s2521_s17 = sshll.u32 %s3341_s19, 6 }
  0x11   : > { %s3304_s3 = scalar_lea.vmem %s3334_s4, %s2521_s17 }
  0x12   : > { %s3084_s10 = scalar_lea.vmem %s3331_s0, %s2930_s29 }
  0x13   : > { %v2241_v8 = vld [vmem:[%s3084_s10 + $0x1] sm:$0xff]  ;;  %v2242_v9 = vld [vmem:[%s3084_s10 + $0x9] sm:$0xff]  ;;  %v2243_v13 = vld [vmem:[%s3084_s10 + $0x11] sm:$0xff] }
  0x14   : > { %v2373_v10 = vld [vmem:[%s3084_s10 + $0x8] sm:$0xff]  ;;  %v254_v11 = vpack.c.bf16 %v2242_v9, %v2241_v8  ;;  %v2374_v12 = vld [vmem:[%s3084_s10 + $0x10] sm:$0xff]  ;;  %v2244_v14 = vld [vmem:[%s3084_s10 + $0x19] sm:$0xff]  ;;  %v1264_v38 = vpack.c.bf16 %v2243_v13, %v2242_v9 }
  0x15   : > { %v1148_v16 = vpack.c.bf16 %v2374_v12, %v2373_v10  ;;  %v255_v17 = vpack.c.bf16 %v2244_v14, %v2243_v13  ;;  %v2375_v18 = vld [vmem:[%s3084_s10 + $0x18] sm:$0xff]  ;;  %v2376_v19 = vld [vmem:[%s3084_s10 + $0x20] sm:$0xff]  ;;  %v2246_v22 = vld [vmem:[%s3084_s10 + $0x29] sm:$0xff] }
  0x16   : > { %v2245_v20 = vld [vmem:[%s3084_s10 + $0x21] sm:$0xff]  ;;  %2622 = vmatprep.mubr.msk.bf16.mxu1 %vm275_vm0, %v254_v11  ;;  %v1149_v21 = vpack.c.bf16 %v2376_v19, %v2375_v18  ;;  %v2378_v24 = vld [vmem:[%s3084_s10 + $0x30] sm:$0xff]  ;;  %v2248_v28 = vld [vmem:[%s3084_s10 + $0x39] sm:$0xff]  ;;  %v237_v39 = vpack.c.bf16 %v2375_v18, %v2374_v12 }
  0x17   : > { %v2377_v23 = vld [vmem:[%s3084_s10 + $0x28] sm:$0xff]  ;;  %2718 = vmatprep.mubr.msk.bf16.mxu0 %vm275_vm0, %v1148_v16  ;;  %2623 = vmatmul.mubr.msk.bf16.vlgmr.msra.gmra.mrb[0].mxu1 %vm275_vm0, %v255_v17  ;;  %v256_v25 = vpack.c.bf16 %v2246_v22, %v2245_v20  ;;  %v2247_v27 = vld [vmem:[%s3084_s10 + $0x31] sm:$0xff]  ;;  %v2380_v30 = vld [vmem:[%s3084_s10 + $0x40] sm:$0xff]  ;;  %v1265_v40 = vpack.c.bf16 %v2245_v20, %v2244_v14 }
  0x18   : > { %v1150_v26 = vpack.c.bf16 %v2378_v24, %v2377_v23  ;;  %v2379_v29 = vld [vmem:[%s3084_s10 + $0x38] sm:$0xff]  ;;  %2719 = vmatmul.mubr.msk.bf16.vlgmr.msra.gmra.mrb[0].mxu0 %vm275_vm0, %v1149_v21  ;;  %2631 = vmatpush3.bf16.msra.mxu1 %v2959_v6  ;;  %v228_v32 = vld [vmem:[%s3084_s10] sm:$0xff]  ;;  %v257_v34 = vpack.c.bf16 %v2248_v28, %v2247_v27  ;;  %v238_v41 = vpack.c.bf16 %v2377_v23, %v2376_v19  ;;  %v2266_v47 = vld [vmem:[%s3084_s10 + $0xa] sm:$0xff] }
  0x19   : > { %2727 = vmatpush3.bf16.msra.mxu0 %v2960_v7  ;;  %2626 = vmatprep.mubr.msk.bf16.mxu1 %vm275_vm0, %v256_v25  ;;  %v1151_v36 = vpack.c.bf16 %v2380_v30, %v2379_v29  ;;  %v236_v37 = vpack.c.bf16 %v2373_v10, %v228_v32  ;;  %v1266_v42 = vpack.c.bf16 %v2247_v27, %v2246_v22  ;;  %v2398_v45 = vld [vmem:[%s3084_s10 + $0x41] sm:$0xff]  ;;  %v2410_v49 = vld [vmem:[%s3084_s10 + $0x12] sm:$0xff]  ;;  %v2270_v57 = vld [vmem:[%s3084_s10 + $0x2a] sm:$0xff] }
  0x1a   : > { %2722 = vmatprep.mubr.msk.bf16.mxu0 %vm275_vm0, %v1150_v26  ;;  %2632 = vmatprep.subr.bf16.mxu1 %v2961_v15  ;;  %v2265_v46 = vld [vmem:[%s3084_s10 + $0x2] sm:$0xff]  ;;  %v239_v51 = vpack.c.bf16 %v2379_v29, %v2378_v24  ;;  %v1267_v52 = vpack.c.bf16 %v2398_v45, %v2248_v28  ;;  %v1380_v54 = vpack.c.bf16 %v2410_v49, %v2266_v47  ;;  %v2268_v55 = vld [vmem:[%s3084_s10 + $0x1a] sm:$0xff]  ;;  %v2414_v59 = vld [vmem:[%s3084_s10 + $0x32] sm:$0xff] }
  0x1b   : > { %2728 = vmatprep.subr.bf16.mxu0 %v2962_v31  ;;  %v452_v53 = vpack.c.bf16 %v2266_v47, %v2265_v46  ;;  %v2412_v56 = vld [vmem:[%s3084_s10 + $0x22] sm:$0xff]  ;;  %v453_v58 = vpack.c.bf16 %v2268_v55, %v2410_v49  ;;  %v1382_v62 = vpack.c.bf16 %v2414_v59, %v2270_v57  ;;  %v2272_v63 = vld [vmem:[%s3084_s10 + $0x3a] sm:$0xff]  ;;  %v2284_v4 = vld [vmem:[%s3084_s10 + $0xb] sm:$0xff] }
  0x1c   : > { %2633 = vmatpush3.bf16.msra.mxu1 %v2961_v15  ;;  %v1381_v60 = vpack.c.bf16 %v2412_v56, %v2268_v55  ;;  %v454_v61 = vpack.c.bf16 %v2270_v57, %v2412_v56  ;;  %v2416_v1 = vld [vmem:[%s3084_s10 + $0x42] sm:$0xff]  ;;  %v2428_v6 = vld [vmem:[%s3084_s10 + $0x13] sm:$0xff]  ;;  %v455_v8 = vpack.c.bf16 %v2272_v63, %v2414_v59  ;;  %v2288_v14 = vld [vmem:[%s3084_s10 + $0x2b] sm:$0xff] }
  0x1d   : > { %2729 = vmatpush3.bf16.msra.mxu0 %v2962_v31  ;;  %2642 = vmatprep.subr.bf16.mxu1 %v2963_v33  ;;  %v2283_v3 = vld [vmem:[%s3084_s10 + $0x3] sm:$0xff]  ;;  %v1383_v9 = vpack.c.bf16 %v2416_v1, %v2272_v63  ;;  %v1496_v11 = vpack.c.bf16 %v2428_v6, %v2284_v4  ;;  %v2286_v12 = vld [vmem:[%s3084_s10 + $0x1b] sm:$0xff]  ;;  %v2432_v16 = vld [vmem:[%s3084_s10 + $0x33] sm:$0xff] }
  0x1e   : > { %2738 = vmatprep.subr.bf16.mxu0 %v2964_v35  ;;  %v2972_v7 = vld [vmem:[%s3332_s1 + $0xc0] sm:$0xff]   ;;  %v568_v10 = vpack.c.bf16 %v2284_v4, %v2283_v3  ;;  %v569_v15 = vpack.c.bf16 %v2286_v12, %v2428_v6  ;;  %v1498_v19 = vpack.c.bf16 %v2432_v16, %v2288_v14  ;;  %v2973_v20 = vld [vmem:[%s3332_s1 + $0x48] sm:$0xff]   ;;  %v2975_v26 = vld [vmem:[%s3332_s1 + $0x50] sm:$0xff]  }
  0x1f   : > { %2627 = vmatmul.mubr.msk.bf16.gmra.mrb[4].mxu1 %vm275_vm0, %v257_v34  ;;  %v2430_v13 = vld [vmem:[%s3084_s10 + $0x23] sm:$0xff]  ;;  %v2290_v22 = vld [vmem:[%s3084_s10 + $0x3b] sm:$0xff]  ;;  %v2302_v25 = vld [vmem:[%s3084_s10 + $0xc] sm:$0xff] }
  0x20   : > { %2723 = vmatmul.mubr.msk.bf16.gmra.mrb[4].mxu0 %vm275_vm0, %v1151_v36  ;;  %2634 = vmatprep.mubr.msk.bf16.mxu1 %vm275_vm0, %v236_v37  ;;  %v1497_v17 = vpack.c.bf16 %v2430_v13, %v2286_v12  ;;  %v570_v18 = vpack.c.bf16 %v2288_v14, %v2430_v13  ;;  %v2974_v21 = vld [vmem:[%s3332_s1 + $0xc8] sm:$0xff]   ;;  %v2446_v27 = vld [vmem:[%s3084_s10 + $0x14] sm:$0xff]  ;;  %v571_v29 = vpack.c.bf16 %v2290_v22, %v2432_v16  ;;  %v2979_v47 = vld [vmem:[%s3332_s1 + $0x60] sm:$0xff]  }
  0x21   : > { %2730 = vmatprep.mubr.msk.bf16.mxu0 %vm275_vm0, %v1264_v38  ;;  %v2434_v23 = vld [vmem:[%s3084_s10 + $0x43] sm:$0xff]  ;;  %v2976_v28 = vld [vmem:[%s3332_s1 + $0xd0] sm:$0xff]   ;;  %v1612_v32 = vpack.c.bf16 %v2446_v27, %v2302_v25 }
  0x22   : > { %v2301_v24 = vld [vmem:[%s3084_s10 + $0x4] sm:$0xff]  ;;  %v1499_v30 = vpack.c.bf16 %v2434_v23, %v2290_v22  ;;  %v2450_v37 = vld [vmem:[%s3084_s10 + $0x34] sm:$0xff] }
  0x23   : > { %v684_v31 = vpack.c.bf16 %v2302_v25, %v2301_v24  ;;  %v2448_v34 = vld [vmem:[%s3084_s10 + $0x24] sm:$0xff]  ;;  %v2320_v46 = vld [vmem:[%s3084_s10 + $0xd] sm:$0xff]  ;;  %v2500_v25 = vld [vmem:[%s3084_s10 + $0x17] sm:$0xff] }
  0x24   : > { %v2319_v45 = vld [vmem:[%s3084_s10 + $0x5] sm:$0xff]  ;;  %v2324_v56 = vld [vmem:[%s3084_s10 + $0x2d] sm:$0xff] }
  0x25   : > { %v2980_v49 = vld [vmem:[%s3332_s1 + $0xe0] sm:$0xff]   ;;  %v2982_v63 = vld [vmem:[%s3332_s1 + $0xe8] sm:$0xff]   ;;  %v2983_v4 = vld [vmem:[%s3332_s1 + $0x70] sm:$0xff]  }
  0x26   : > { %v2466_v55 = vld [vmem:[%s3084_s10 + $0x25] sm:$0xff]  ;;  %v2338_v3 = vld [vmem:[%s3084_s10 + $0xe] sm:$0xff] }
  0x27   : > { %2635 = vmatmul.mubr.msk.bf16.vlgmr.msra.gmra.mrb[0].mxu1 %vm275_vm0, %v237_v39  ;;  %v2470_v1 = vld [vmem:[%s3084_s10 + $0x45] sm:$0xff]  ;;  %v2984_v6 = vld [vmem:[%s3332_s1 + $0xf0] sm:$0xff]  }
  0x28   : > { %2731 = vmatmul.mubr.msk.bf16.vlgmr.msra.gmra.mrb[0].mxu0 %vm275_vm0, %v1265_v40  ;;  %2643 = vmatpush3.bf16.msra.mxu1 %v2963_v33  ;;  %v2304_v33 = vld [vmem:[%s3084_s10 + $0x1c] sm:$0xff]  ;;  %v2484_v12 = vld [vmem:[%s3084_s10 + $0x26] sm:$0xff]  ;;  %v2342_v13 = vld [vmem:[%s3084_s10 + $0x2e] sm:$0xff] }
  0x29   : > { %2739 = vmatpush3.bf16.msra.mxu0 %v2964_v35  ;;  %2638 = vmatprep.mubr.msk.bf16.mxu1 %vm275_vm0, %v238_v41  ;;  %v2306_v35 = vld [vmem:[%s3084_s10 + $0x2c] sm:$0xff]  ;;  %v685_v36 = vpack.c.bf16 %v2304_v33, %v2446_v27  ;;  %v1613_v38 = vpack.c.bf16 %v2448_v34, %v2304_v33  ;;  %v2977_v41 = vld [vmem:[%s3332_s1 + $0x58] sm:$0xff]  }
  0x2a   : > { %2734 = vmatprep.mubr.msk.bf16.mxu0 %vm275_vm0, %v1266_v42  ;;  %2644 = vmatprep.subr.bf16.mxu1 %v2965_v43  ;;  %v686_v39 = vpack.c.bf16 %v2306_v35, %v2448_v34  ;;  %v1614_v40 = vpack.c.bf16 %v2450_v37, %v2306_v35  ;;  %v2978_v42 = vld [vmem:[%s3332_s1 + $0xd8] sm:$0xff]   ;;  %v2488_v22 = vld [vmem:[%s3084_s10 + $0x46] sm:$0xff]  ;;  %v2356_v24 = vld [vmem:[%s3084_s10 + $0xf] sm:$0xff] }
  0x2b   : > { %2740 = vmatprep.subr.bf16.mxu0 %v2966_v44  ;;  %v2355_v23 = vld [vmem:[%s3084_s10 + $0x7] sm:$0xff]  ;;  %v2504_v33 = vld [vmem:[%s3084_s10 + $0x37] sm:$0xff] }
  0x2c   : > { %2645 = vmatpush3.bf16.msra.mxu1 %v2965_v43  ;;  %v2308_v43 = vld [vmem:[%s3084_s10 + $0x3c] sm:$0xff] }
  0x2d   : > { %2741 = vmatpush3.bf16.msra.mxu0 %v2966_v44  ;;  %2654 = vmatprep.subr.bf16.mxu1 %v2967_v48  ;;  %v2452_v44 = vld [vmem:[%s3084_s10 + $0x44] sm:$0xff] }
  0x2e   : > { %2750 = vmatprep.subr.bf16.mxu0 %v2968_v50 }
  0x2f   : > { %2639 = vmatmul.mubr.msk.bf16.gmra.mrb[4].mxu1 %vm275_vm0, %v239_v51  ;;  %v1615_v51 = vpack.c.bf16 %v2452_v44, %v2308_v43  ;;  %v2517_v44 = vld [vmem:[#allocation2] ss:$0 sm:$0xff] }
  0x30   : > { %2735 = vmatmul.mubr.msk.bf16.gmra.mrb[4].mxu0 %vm275_vm0, %v1267_v52  ;;  %2646 = vmatprep.mubr.msk.bf16.mxu1 %vm275_vm0, %v452_v53  ;;  %v800_v52 = vpack.c.bf16 %v2320_v46, %v2319_v45 }
  0x31   : > { %2742 = vmatprep.mubr.msk.bf16.mxu0 %vm275_vm0, %v1380_v54  ;;  %v2322_v54 = vld [vmem:[%s3084_s10 + $0x1d] sm:$0xff] }
  0x32   : > { %v1729_v59 = vpack.c.bf16 %v2466_v55, %v2322_v54 }
  0x37   : > { %2647 = vmatmul.mubr.msk.bf16.vlgmr.msra.gmra.mrb[0].mxu1 %vm275_vm0, %v453_v58  ;;  %v2468_v58 = vld [vmem:[%s3084_s10 + $0x35] sm:$0xff] }
  0x38   : > { %2743 = vmatmul.mubr.msk.bf16.vlgmr.msra.gmra.mrb[0].mxu0 %vm275_vm0, %v1381_v60  ;;  %2655 = vmatpush3.bf16.msra.mxu1 %v2967_v48  ;;  %v2464_v48 = vld [vmem:[%s3084_s10 + $0x15] sm:$0xff]  ;;  %v802_v60 = vpack.c.bf16 %v2324_v56, %v2466_v55 }
  0x39   : > { %2751 = vmatpush3.bf16.msra.mxu0 %v2968_v50  ;;  %2650 = vmatprep.mubr.msk.bf16.mxu1 %vm275_vm0, %v454_v61  ;;  %v687_v50 = vpack.c.bf16 %v2308_v43, %v2450_v37  ;;  %v1728_v53 = vpack.c.bf16 %v2464_v48, %v2320_v46  ;;  %v801_v57 = vpack.c.bf16 %v2322_v54, %v2464_v48 }
  0x3a   : > { %2746 = vmatprep.mubr.msk.bf16.mxu0 %vm275_vm0, %v1382_v62  ;;  %2656 = vmatprep.subr.bf16.mxu1 %v2969_v0  ;;  %v1730_v61 = vpack.c.bf16 %v2468_v58, %v2324_v56  ;;  %v2981_v62 = vld [vmem:[%s3332_s1 + $0x68] sm:$0xff]  }
  0x3b   : > { %2752 = vmatprep.subr.bf16.mxu0 %v2970_v2 }
  0x3c   : > { %2657 = vmatpush3.bf16.msra.mxu1 %v2969_v0  ;;  %v2326_v0 = vld [vmem:[%s3084_s10 + $0x3d] sm:$0xff] }
  0x3d   : > { %2753 = vmatpush3.bf16.msra.mxu0 %v2970_v2  ;;  %2666 = vmatprep.subr.bf16.mxu1 %v2971_v5  ;;  %v2337_v2 = vld [vmem:[%s3084_s10 + $0x6] sm:$0xff] }
  0x3e   : > { %2762 = vmatprep.subr.bf16.mxu0 %v2972_v7 }
  0x3f   : > { %2651 = vmatmul.mubr.msk.bf16.gmra.mrb[4].mxu1 %vm275_vm0, %v455_v8  ;;  %v1731_v8 = vpack.c.bf16 %v2470_v1, %v2326_v0 }
  0x40   : > { %2747 = vmatmul.mubr.msk.bf16.gmra.mrb[4].mxu0 %vm275_vm0, %v1383_v9  ;;  %2658 = vmatprep.mubr.msk.bf16.mxu1 %vm275_vm0, %v568_v10  ;;  %v916_v9 = vpack.c.bf16 %v2338_v3, %v2337_v2 }
  0x41   : > { %2754 = vmatprep.mubr.msk.bf16.mxu0 %vm275_vm0, %v1496_v11  ;;  %v2340_v11 = vld [vmem:[%s3084_s10 + $0x1e] sm:$0xff] }
  0x42   : > { %v1845_v16 = vpack.c.bf16 %v2484_v12, %v2340_v11 }
  0x47   : > { %2659 = vmatmul.mubr.msk.bf16.vlgmr.msra.gmra.mrb[0].mxu1 %vm275_vm0, %v569_v15  ;;  %v2486_v15 = vld [vmem:[%s3084_s10 + $0x36] sm:$0xff] }
  0x48   : > { %2755 = vmatmul.mubr.msk.bf16.vlgmr.msra.gmra.mrb[0].mxu0 %vm275_vm0, %v1497_v17  ;;  %2667 = vmatpush3.bf16.msra.mxu1 %v2971_v5  ;;  %v2482_v5 = vld [vmem:[%s3084_s10 + $0x16] sm:$0xff]  ;;  %v918_v17 = vpack.c.bf16 %v2342_v13, %v2484_v12 }
  0x49   : > { %2763 = vmatpush3.bf16.msra.mxu0 %v2972_v7  ;;  %2662 = vmatprep.mubr.msk.bf16.mxu1 %vm275_vm0, %v570_v18  ;;  %v803_v7 = vpack.c.bf16 %v2326_v0, %v2468_v58  ;;  %v1844_v10 = vpack.c.bf16 %v2482_v5, %v2338_v3  ;;  %v917_v14 = vpack.c.bf16 %v2340_v11, %v2482_v5 }
  0x4a   : > { %2758 = vmatprep.mubr.msk.bf16.mxu0 %vm275_vm0, %v1498_v19  ;;  %2668 = vmatprep.subr.bf16.mxu1 %v2973_v20  ;;  %v1846_v18 = vpack.c.bf16 %v2486_v15, %v2342_v13  ;;  %v2985_v19 = vld [vmem:[%s3332_s1 + $0x78] sm:$0xff]  }
  0x4b   : > { %2764 = vmatprep.subr.bf16.mxu0 %v2974_v21 }
  0x4c   : > { %2669 = vmatpush3.bf16.msra.mxu1 %v2973_v20  ;;  %v2986_v20 = vld [vmem:[%s3332_s1 + $0xf8] sm:$0xff]  }
  0x4d   : > { %2765 = vmatpush3.bf16.msra.mxu0 %v2974_v21  ;;  %2678 = vmatprep.subr.bf16.mxu1 %v2975_v26  ;;  %v2344_v21 = vld [vmem:[%s3084_s10 + $0x3e] sm:$0xff] }
  0x4e   : > { %2774 = vmatprep.subr.bf16.mxu0 %v2976_v28  ;;  %v1847_v27 = vpack.c.bf16 %v2488_v22, %v2344_v21 }
  0x4f   : > { %2663 = vmatmul.mubr.msk.bf16.gmra.mrb[4].mxu1 %vm275_vm0, %v571_v29  ;;  %v1960_v29 = vpack.c.bf16 %v2500_v25, %v2356_v24 }
  0x50   : > { %2759 = vmatmul.mubr.msk.bf16.gmra.mrb[4].mxu0 %vm275_vm0, %v1499_v30  ;;  %2670 = vmatprep.mubr.msk.bf16.mxu1 %vm275_vm0, %v684_v31  ;;  %v2358_v30 = vld [vmem:[%s3084_s10 + $0x1f] sm:$0xff]  ;;  %v2502_v31 = vld [vmem:[%s3084_s10 + $0x27] sm:$0xff] }
  0x51   : > { %2766 = vmatprep.mubr.msk.bf16.mxu0 %vm275_vm0, %v1612_v32  ;;  %v2360_v32 = vld [vmem:[%s3084_s10 + $0x2f] sm:$0xff]  ;;  %v1033_v34 = vpack.c.bf16 %v2358_v30, %v2500_v25  ;;  %v1961_v35 = vpack.c.bf16 %v2502_v31, %v2358_v30 }
  0x52   : > { %v1962_v37 = vpack.c.bf16 %v2504_v33, %v2360_v32 }
  0x57   : > { %2671 = vmatmul.mubr.msk.bf16.vlgmr.msra.gmra.mrb[0].mxu1 %vm275_vm0, %v685_v36  ;;  %v1034_v36 = vpack.c.bf16 %v2360_v32, %v2502_v31 }
  0x58   : > { %2767 = vmatmul.mubr.msk.bf16.vlgmr.msra.gmra.mrb[0].mxu0 %vm275_vm0, %v1613_v38  ;;  %2679 = vmatpush3.bf16.msra.mxu1 %v2975_v26  ;;  %v919_v26 = vpack.c.bf16 %v2344_v21, %v2486_v15  ;;  %v2362_v38 = vld [vmem:[%s3084_s10 + $0x3f] sm:$0xff] }
  0x59   : > { %2775 = vmatpush3.bf16.msra.mxu0 %v2976_v28  ;;  %2674 = vmatprep.mubr.msk.bf16.mxu1 %vm275_vm0, %v686_v39  ;;  %v1032_v28 = vpack.c.bf16 %v2356_v24, %v2355_v23  ;;  %v2506_v39 = vld [vmem:[%s3084_s10 + $0x47] sm:$0xff] }
  0x5a   : > { %2770 = vmatprep.mubr.msk.bf16.mxu0 %vm275_vm0, %v1614_v40  ;;  %2680 = vmatprep.subr.bf16.mxu1 %v2977_v41  ;;  %v1035_v40 = vpack.c.bf16 %v2362_v38, %v2504_v33 }
  0x5b   : > { %2776 = vmatprep.subr.bf16.mxu0 %v2978_v42 }
  0x5c   : > { %2681 = vmatpush3.bf16.msra.mxu1 %v2977_v41  ;;  %v1963_v41 = vpack.c.bf16 %v2506_v39, %v2362_v38 }
  0x5d   : > { %2777 = vmatpush3.bf16.msra.mxu0 %v2978_v42  ;;  %2690 = vmatprep.subr.bf16.mxu1 %v2979_v47 }
  0x5e   : > { %2786 = vmatprep.subr.bf16.mxu0 %v2980_v49 }
  0x5f   : > { %2675 = vmatmul.mubr.msk.bf16.gmra.mrb[4].mxu1 %vm275_vm0, %v687_v50 }
  0x60   : > { %2771 = vmatmul.mubr.msk.bf16.gmra.mrb[4].mxu0 %vm275_vm0, %v1615_v51  ;;  %2682 = vmatprep.mubr.msk.bf16.mxu1 %vm275_vm0, %v800_v52 }
  0x61   : > { %2778 = vmatprep.mubr.msk.bf16.mxu0 %vm275_vm0, %v1728_v53 }
  0x67   : > { %2683 = vmatmul.mubr.msk.bf16.vlgmr.msra.gmra.mrb[0].mxu1 %vm275_vm0, %v801_v57 }
  0x68   : > { %2779 = vmatmul.mubr.msk.bf16.vlgmr.msra.gmra.mrb[0].mxu0 %vm275_vm0, %v1729_v59  ;;  %2691 = vmatpush3.bf16.msra.mxu1 %v2979_v47 }
  0x69   : > { %2787 = vmatpush3.bf16.msra.mxu0 %v2980_v49  ;;  %2686 = vmatprep.mubr.msk.bf16.mxu1 %vm275_vm0, %v802_v60  ;;  %v2518_v49 = vld [vmem:[#allocation3] ss:$0 sm:$0xff] }
  0x6a   : > { %2782 = vmatprep.mubr.msk.bf16.mxu0 %vm275_vm0, %v1730_v61  ;;  %2692 = vmatprep.subr.bf16.mxu1 %v2981_v62 }
  0x6b   : > { %2788 = vmatprep.subr.bf16.mxu0 %v2982_v63 }
  0x6c   : > { %2693 = vmatpush3.bf16.msra.mxu1 %v2981_v62 }
  0x6d   : > { %2789 = vmatpush3.bf16.msra.mxu0 %v2982_v63  ;;  %2702 = vmatprep.subr.bf16.mxu1 %v2983_v4 }
  0x6e   : > { %2798 = vmatprep.subr.bf16.mxu0 %v2984_v6 }
  0x6f   : > { %2687 = vmatmul.mubr.msk.bf16.gmra.mrb[4].mxu1 %vm275_vm0, %v803_v7 }
  0x70   : > { %2783 = vmatmul.mubr.msk.bf16.gmra.mrb[4].mxu0 %vm275_vm0, %v1731_v8  ;;  %2694 = vmatprep.mubr.msk.bf16.mxu1 %vm275_vm0, %v916_v9 }
  0x71   : > { %2790 = vmatprep.mubr.msk.bf16.mxu0 %vm275_vm0, %v1844_v10 }
  0x77   : > { %2695 = vmatmul.mubr.msk.bf16.vlgmr.msra.gmra.mrb[0].mxu1 %vm275_vm0, %v917_v14 }
  0x78   : > { %2791 = vmatmul.mubr.msk.bf16.vlgmr.msra.gmra.mrb[0].mxu0 %vm275_vm0, %v1845_v16  ;;  %2703 = vmatpush3.bf16.msra.mxu1 %v2983_v4 }
  0x79   : > { %2799 = vmatpush3.bf16.msra.mxu0 %v2984_v6  ;;  %2698 = vmatprep.mubr.msk.bf16.mxu1 %vm275_vm0, %v918_v17 }
  0x7a   : > { %2794 = vmatprep.mubr.msk.bf16.mxu0 %vm275_vm0, %v1846_v18  ;;  %2704 = vmatprep.subr.bf16.mxu1 %v2985_v19 }
  0x7b   : > { %2800 = vmatprep.subr.bf16.mxu0 %v2986_v20 }
  0x7c   : > { %2705 = vmatpush3.bf16.msra.mxu1 %v2985_v19 }
  0x7d   : > { %2801 = vmatpush3.bf16.msra.mxu0 %v2986_v20 }
  0x7f   : > { %2699 = vmatmul.mubr.msk.bf16.gmra.mrb[4].mxu1 %vm275_vm0, %v919_v26 }
  0x80   : > { %2795 = vmatmul.mubr.msk.bf16.gmra.mrb[4].mxu0 %vm275_vm0, %v1847_v27  ;;  %2706 = vmatprep.mubr.msk.bf16.mxu1 %vm275_vm0, %v1032_v28 }
  0x81   : > { %2802 = vmatprep.mubr.msk.bf16.mxu0 %vm275_vm0, %v1960_v29 }
  0x87   : > { %2707 = vmatmul.mubr.msk.bf16.vlgmr.msra.gmra.mrb[0].mxu1 %vm275_vm0, %v1033_v34 }
  0x88   : > { %2803 = vmatmul.mubr.msk.bf16.vlgmr.msra.gmra.mrb[0].mxu0 %vm275_vm0, %v1961_v35  ;;  %2710 = vmatprep.mubr.msk.bf16.mxu1 %vm275_vm0, %v1034_v36 }
  0x89   : > { %2806 = vmatprep.mubr.msk.bf16.mxu0 %vm275_vm0, %v1962_v37 }
  0x8f   : > { %2711 = vmatmul.mubr.msk.bf16.gmra.mrb[4].mxu1 %vm275_vm0, %v1035_v40 }
  0x90   : > { %2807 = vmatmul.mubr.msk.bf16.gmra.mrb[4].mxu0 %vm275_vm0, %v1963_v41 }
 0x15a   : > { %v2708_v42 = vpop.f32.mrb[0].mxu1 }
 0x15b   : > { %v2804_v43 = vpop.f32.mrb[0].mxu0  ;;  %v1099_v45 = vpop.f32.mrb[1].mxu1 }
 0x15c   : > { %v2810_v46 = vadd.f32 %v2804_v43, %v2708_v42  ;;  %v2027_v47 = vpop.f32.mrb[1].mxu0  ;;  %v2709_v48 = vpop.f32.mrb[2].mxu1 }
 0x15d   : > { %v2811_v50 = vadd.f32 %v2027_v47, %v1099_v45  ;;  %v2805_v51 = vpop.f32.mrb[2].mxu0  ;;  %v1102_v52 = vpop.f32.mrb[3].mxu1 }
 0x15e   : > { %v2075_v53 = vmul.f32 %v2810_v46, %v2517_v44  ;;  %v2812_v54 = vadd.f32 %v2805_v51, %v2709_v48  ;;  %v2030_v55 = vpop.f32.mrb[3].mxu0 }
 0x15f   : > { %v2073_v56 = vmul.f32 %v2811_v50, %v2517_v44  ;;  %v2813_v57 = vadd.f32 %v2030_v55, %v1102_v52 }
 0x160   : > { %v2090_v58 = vadd.f32 %v2518_v49, %v2075_v53  ;;  %v2076_v59 = vmul.f32 %v2812_v54, %v2517_v44 }
 0x161   : > { %v2088_v60 = vadd.f32 %v2518_v49, %v2073_v56  ;;  %v2074_v61 = vmul.f32 %v2813_v57, %v2517_v44 }
 0x162   : > { %2099 = vst.msk [vmem:[%s3304_s3 + $0x10] sm:$0xff] %vm2096_vm1, %v2090_v58  ;;  %v2091_v62 = vadd.f32 %v2518_v49, %v2076_v59  ;;  %v2712_v63 = vpop.f32.mrb[4].mxu1 }
 0x163   : > { %2097 = vst.msk [vmem:[%s3304_s3] sm:$0xff] %vm2096_vm1, %v2088_v60  ;;  %v2089_v0 = vadd.f32 %v2518_v49, %v2074_v61  ;;  %v2808_v1 = vpop.f32.mrb[4].mxu0  ;;  %v1115_v2 = vpop.f32.mrb[5].mxu1 }
 0x164   : > { %2100 = vst.msk [vmem:[%s3304_s3 + $0x18] sm:$0xff] %vm2096_vm1, %v2091_v62  ;;  %v2814_v3 = vadd.f32 %v2808_v1, %v2712_v63  ;;  %v2043_v4 = vpop.f32.mrb[5].mxu0  ;;  %v2713_v5 = vpop.f32.mrb[6].mxu1 }
 0x165   : > { %2098 = vst.msk [vmem:[%s3304_s3 + $0x8] sm:$0xff] %vm2096_vm1, %v2089_v0  ;;  %v2815_v6 = vadd.f32 %v2043_v4, %v1115_v2  ;;  %v2809_v7 = vpop.f32.mrb[6].mxu0  ;;  %v1118_v8 = vpop.f32.mrb[7].mxu1 }
 0x166   : > { %v2079_v9 = vmul.f32 %v2814_v3, %v2517_v44  ;;  %v2816_v10 = vadd.f32 %v2809_v7, %v2713_v5  ;;  %v2046_v11 = vpop.f32.mrb[7].mxu0 }
 0x167   : > { %v2077_v12 = vmul.f32 %v2815_v6, %v2517_v44  ;;  %v2817_v13 = vadd.f32 %v2046_v11, %v1118_v8 }
 0x168   : > { %v2094_v14 = vadd.f32 %v2518_v49, %v2079_v9  ;;  %v2080_v15 = vmul.f32 %v2816_v10, %v2517_v44 }
 0x169   : > { %v2092_v16 = vadd.f32 %v2518_v49, %v2077_v12  ;;  %v2078_v17 = vmul.f32 %v2817_v13, %v2517_v44 }
 0x16a   : > { %2103 = vst.msk [vmem:[%s3304_s3 + $0x30] sm:$0xff] %vm2096_vm1, %v2094_v14  ;;  %v2095_v18 = vadd.f32 %v2518_v49, %v2080_v15 }
 0x16b   : > { %2101 = vst.msk [vmem:[%s3304_s3 + $0x20] sm:$0xff] %vm2096_vm1, %v2092_v16  ;;  %v2093_v19 = vadd.f32 %v2518_v49, %v2078_v17 }
 0x16c   : > { %2104 = vst.msk [vmem:[%s3304_s3 + $0x38] sm:$0xff] %vm2096_vm1, %v2095_v18 }
 0x16d   : > { %2102 = vst.msk [vmem:[%s3304_s3 + $0x28] sm:$0xff] %vm2096_vm1, %v2093_v19 }
 0x16e PF: > { %s18_s21 = sadd.s32 1, %s3009_s21   ;;  %s3336_s19 = smov %s3005_s20 }
 0x16f   : > { %p15_p5 = scmp.ge.s32.totalorder %s18_s21, 4   ;;  %s3337_s20 = smov %s3339_s2 }
 0x171   :  { %17 = sbr.rel (!%p15_p5) target bundleno = 3 (0x3), region = 97 }

// kernel: snakenet_forward.8
= control target key start
LH: loop header
LB: loop body
LE: loop exit
PB: predicated region body
PF: predicated region fallthrough
CT: control target
= control target key end

     0   :  { %s4115_s15 = smov 0   ;;  %s4117_s16 = smov 0   ;;  %s4712_s0 = inlined_call_operand.vmem [shape: f32[2,63,24], index: 0, kind: input, shape index: {}]   ;;  %s4713_s1 = inlined_call_operand.vmem [shape: bf16[32,24,16], index: 1, kind: input, shape index: {}]   ;;  %s4714_s2 = inlined_call_operand.vmem [shape: f32[1,16], index: 2, kind: input, shape index: {}]   ;;  %s4715_s3 = inlined_call_operand.vmem [shape: f32[1,16], index: 3, kind: input, shape index: {}]   ;;  %s4716_s4 = inlined_call_operand.vmem [shape: f32[2,32,16], index: 4, kind: output, shape index: {}]  }
   0x1   :  { %s4119_s17 = smov 0  }
   0x2 LB: > { %s26_s18 = sadd.s32 1, %s4084_s16  ;;  %p3082_p0 = scmp.ge.s32.totalorder %s4088_s17, 1  ;;  %s4088_s17 = sphi %s4119_s17, %s14_s17   ;;  %s4084_s16 = sphi %s4117_s16, %s4718_s16   ;;  %s4080_s15 = sphi %s4115_s15, %s4717_s15  }
   0x3   : > { %p28_p1 = scmp.ge.s32.totalorder %s26_s18, 2  ;;  %p176_p2 = scmp.lt.s32.totalorder %s4088_s17, 3 }
   0x5   : > { %s4720_s18 = smov (%p28_p1, %s26_s18), 0  ;;  %p177_p3 = pnand %p3082_p0, %p176_p2 }
   0x6   : > { %v4002_v0 = vld [vmem:[%s4713_s1 + $0xc] sm:$0xff] (!%p177_p3)   ;;  %vm261_vm0 = vcmask (!%p177_p3), 1043456   ;;  %v4003_v1 = vld [vmem:[%s4713_s1 + $0xc0] sm:$0xff] (!%p177_p3)   ;;  %p206_p4 = scmp.lt.s32.totalorder (!%p177_p3), %s4080_s15, 1  ;;  %v4004_v2 = vld [vmem:[%s4713_s1 + $0x14] ss:$0 sps:$4 sm:$0xff] (!%p177_p3)  }
   0x7   : > { %180 = sbr.rel (%p177_p3) target bundleno = 426 (0x1aa), region = 36  ;;  %3566 = vmatprep.subr.bf16.mxu1 (!%p177_p3), %v4002_v0  ;;  %3694 = vmatprep.subr.bf16.mxu0 (!%p177_p3), %v4003_v1  ;;  %v4005_v3 = vld [vmem:[%s4713_s1 + $0xc8] ss:$0 sps:$4 sm:$0xff] (!%p177_p3)   ;;  %v263_v4 = vsel (!%p177_p3), %vm261_vm0, %v4004_v2, 0  ;;  %v4006_v5 = vld [vmem:[%s4713_s1] sm:$0xff] (!%p177_p3)   ;;  %v4007_v7 = vld [vmem:[%s4713_s1 + $0xcc] sm:$0xff] (!%p177_p3)  }
   0x8   : > { %3567 = vmatpush3.bf16.msra.mxu1 (!%p177_p3), %v4002_v0  ;;  %3695 = vmatpush3.bf16.msra.mxu0 (!%p177_p3), %v4003_v1  ;;  %v1571_v6 = vsel (!%p177_p3), %vm261_vm0, %v4005_v3, 0  ;;  %vm254_vm1 = vcmask (!%p177_p3), 195584   ;;  %v4008_v11 = vld [vmem:[%s4713_s1 + $0x8] ss:$0 sps:$4 sm:$0xff] (!%p177_p3)   ;;  %v4009_v20 = vld [vmem:[%s4713_s1 + $0xd4] ss:$0 sps:$4 sm:$0xff] (!%p177_p3)  }
   0x9   : > { %3946 = vmatprep.subr.msk.bf16.mxu1 (!%p177_p3), %vm261_vm0, %v4004_v2  ;;  %3962 = vmatprep.subr.msk.bf16.mxu0 (!%p177_p3), %vm261_vm0, %v4005_v3  ;;  %v330_v30 = vsel (!%p177_p3), %vm261_vm0, %v4008_v11, 0  ;;  %v4010_v31 = vld [vmem:[%s4713_s1 + $0x18] sm:$0xff] (!%p177_p3)   ;;  %v1654_v32 = vsel (!%p177_p3), %vm261_vm0, %v4009_v20, 0  ;;  %v4012_v43 = vld [vmem:[%s4713_s1 + $0x20] ss:$0 sps:$4 sm:$0xff] (!%p177_p3)   ;;  %v4014_v54 = vld [vmem:[%s4713_s1 + $0x24] sm:$0xff] (!%p177_p3)  }
   0xa   : > { %v4011_v33 = vld [vmem:[%s4713_s1 + $0xd8] sm:$0xff] (!%p177_p3)   ;;  %v4013_v46 = vld [vmem:[%s4713_s1 + $0xe0] ss:$0 sps:$4 sm:$0xff] (!%p177_p3)   ;;  %v409_v53 = vsel (!%p177_p3), %vm261_vm0, %v4012_v43, 0  ;;  %v4015_v58 = vld [vmem:[%s4713_s1 + $0xe4] sm:$0xff] (!%p177_p3)   ;;  %vm2897_vm2 = vcmask (!%p177_p3), 130048  }
   0xb   : > { %v1737_v57 = vsel (!%p177_p3), %vm261_vm0, %v4013_v46, 0 }
   0xc   : > { %3569 = vmatpush3.bf16.msra.mxu1 (!%p177_p3), %v263_v4  ;;  %3697 = vmatpush3.bf16.msra.mxu0 (!%p177_p3), %v1571_v6  ;;  %v4016_v6 = vld [vmem:[%s4713_s1 + $0x2c] ss:$0 sps:$4 sm:$0xff] (!%p177_p3)  }
   0xd   : > { %3574 = vmatprep.subr.bf16.mxu1 (!%p177_p3), %v4006_v5  ;;  %3702 = vmatprep.subr.bf16.mxu0 (!%p177_p3), %v4007_v7 }
   0xe   : > { %s4722_s15 = smov (!%p206_p4, %s4080_s15), 1 }
   0xf   : > { %s3436_s29 = sshll.u32 %s4722_s15, 6 }
  0x10   : > { %s4161_s8 = scalar_lea.vmem %s4712_s0, %s3436_s29 }
  0x11   : > { %v3087_v8 = vld [vmem:[%s4161_s8 + $0x1] sm:$0xff]  ;;  %v4165_v9 = vld [vmem:[%s4161_s8 + $0x9] sm:$0xff]  ;;  %v3257_v13 = vld [vmem:[%s4161_s8 + $0x18] sm:$0xff] }
  0x12   : > { %v4168_v10 = vld [vmem:[%s4161_s8 + $0x10] sm:$0xff]  ;;  %v239_v12 = vpack.c.bf16 %v4165_v9, %v3087_v8  ;;  %v3090_v15 = vld [vmem:[%s4161_s8 + $0x19] sm:$0xff]  ;;  %v4183_v19 = vld [vmem:[%s4161_s8 + $0x28] sm:$0xff] }
  0x13   : > { %v4176_v14 = vld [vmem:[%s4161_s8 + $0x11] sm:$0xff]  ;;  %v1549_v16 = vpack.c.bf16 %v3257_v13, %v4168_v10  ;;  %v3258_v18 = vld [vmem:[%s4161_s8 + $0x20] sm:$0xff]  ;;  %v4194_v24 = vld [vmem:[%s4161_s8 + $0x8] sm:$0xff] }
  0x14   : > { %v240_v17 = vpack.c.bf16 %v3090_v15, %v4176_v14  ;;  %v968_v21 = vpack.c.bf16 %v4176_v14, %v4165_v9  ;;  %3570 = vmatprep.mubr.msk.bf16.mxu1 %vm254_vm1, %v239_v12  ;;  %v1550_v22 = vpack.c.bf16 %v4183_v19, %v3258_v18  ;;  %v224_v23 = vld [vmem:[%s4161_s8] sm:$0xff]  ;;  %v4196_v25 = vpack.c.bf16 %v3258_v18, %v3257_v13  ;;  %v4220_v34 = vld [vmem:[%s4161_s8 + $0xa] sm:$0xff]  ;;  %v4223_v35 = vld [vmem:[%s4161_s8 + $0x12] sm:$0xff] }
  0x15   : > { %3698 = vmatprep.mubr.msk.bf16.mxu0 %vm254_vm1, %v1549_v16  ;;  %v228_v26 = vpack.c.bf16 %v4194_v24, %v224_v23  ;;  %v3269_v27 = vld [vmem:[%s4161_s8 + $0x21] sm:$0xff]  ;;  %v885_v28 = vpack.c.bf16 %v4168_v10, %v4194_v24  ;;  %v1051_v38 = vpack.c.bf16 %v4223_v35, %v4220_v34  ;;  %v4230_v39 = vld [vmem:[%s4161_s8 + $0x29] sm:$0xff]  ;;  %v4243_v45 = vld [vmem:[%s4161_s8 + $0x13] sm:$0xff] }
  0x16   : > { %3571 = vmatmul.mubr.msk.bf16.vlgmr.msra.gmra.mrb[0].mxu1 %vm254_vm1, %v240_v17  ;;  %3699 = vmatmul.mubr.msk.bf16.vlgmr.msra.gmra.mrb[0].mxu0 %vm254_vm1, %v1550_v22  ;;  %v4205_v29 = vpack.c.bf16 %v3269_v27, %v3090_v15  ;;  %v3279_v36 = vld [vmem:[%s4161_s8 + $0x1a] sm:$0xff]  ;;  %v3280_v37 = vld [vmem:[%s4161_s8 + $0x22] sm:$0xff]  ;;  %v1633_v42 = vpack.c.bf16 %v4230_v39, %v3269_v27  ;;  %v4240_v44 = vld [vmem:[%s4161_s8 + $0xb] sm:$0xff]  ;;  %v492_v15 = vsel %vm261_vm0, %v4016_v6, 0 }
  0x17   : > { %3575 = vmatpush3.bf16.msra.mxu1 %v4006_v5  ;;  %3703 = vmatpush3.bf16.msra.mxu0 %v4007_v7  ;;  %v4232_v40 = vpack.c.bf16 %v3280_v37, %v3279_v36  ;;  %v3102_v41 = vld [vmem:[%s4161_s8 + $0x2] sm:$0xff]  ;;  %v1134_v47 = vpack.c.bf16 %v4243_v45, %v4240_v44  ;;  %v1715_v51 = vpack.c.bf16 %v3279_v36, %v4223_v35  ;;  %v4267_v55 = vld [vmem:[%s4161_s8 + $0xc] sm:$0xff]  ;;  %v4270_v56 = vld [vmem:[%s4161_s8 + $0x14] sm:$0xff] }
  0x18   : > { %3947 = vmatprep.subr.msk.bf16.mxu1 %vm261_vm0, %v4008_v11  ;;  %3963 = vmatprep.subr.msk.bf16.mxu0 %vm261_vm0, %v4009_v20  ;;  %v387_v48 = vpack.c.bf16 %v4220_v34, %v3102_v41  ;;  %v3290_v49 = vld [vmem:[%s4161_s8 + $0x1b] sm:$0xff]  ;;  %v4253_v50 = vld [vmem:[%s4161_s8 + $0x23] sm:$0xff]  ;;  %v1217_v59 = vpack.c.bf16 %v4270_v56, %v4267_v55  ;;  %v4293_v1 = vld [vmem:[%s4161_s8 + $0xd] sm:$0xff] }
  0x19   : > { %3578 = vmatprep.mubr.msk.bf16.mxu1 %vm254_vm1, %v228_v26  ;;  %3706 = vmatprep.mubr.msk.bf16.mxu0 %vm254_vm1, %v240_v17  ;;  %v4258_v52 = vpack.c.bf16 %v4253_v50, %v3290_v49  ;;  %v3301_v60 = vld [vmem:[%s4161_s8 + $0x1c] sm:$0xff]  ;;  %v4283_v61 = vld [vmem:[%s4161_s8 + $0x24] sm:$0xff]  ;;  %v4017_v11 = vld [vmem:[%s4713_s1 + $0xec] ss:$0 sps:$4 sm:$0xff]   ;;  %v1798_v13 = vpack.c.bf16 %v3290_v49, %v4243_v45 }
  0x1a   : > { %v4286_v62 = vpack.c.bf16 %v4283_v61, %v3301_v60  ;;  %v4289_v63 = vld [vmem:[%s4161_s8 + $0x2a] sm:$0xff]  ;;  %v4296_v2 = vld [vmem:[%s4161_s8 + $0x15] sm:$0xff]  ;;  %v4300_v4 = vld [vmem:[%s4161_s8 + $0x1d] sm:$0xff]  ;;  %v1820_v17 = vsel %vm261_vm0, %v4017_v11, 0 }
  0x1b   : > { %3577 = vmatpush3.bf16.msra.mxu1 %v330_v30  ;;  %3705 = vmatpush3.bf16.msra.mxu0 %v1654_v32  ;;  %v3113_v0 = vld [vmem:[%s4161_s8 + $0x3] sm:$0xff]  ;;  %v1716_v3 = vpack.c.bf16 %v4289_v63, %v3280_v37  ;;  %v1300_v7 = vpack.c.bf16 %v4296_v2, %v4293_v1  ;;  %v4019_v18 = vld [vmem:[%s4713_s1 + $0xf0] sm:$0xff]   ;;  %v4020_v32 = vld [vmem:[%s4713_s1 + $0x38] ss:$0 sps:$4 sm:$0xff]  }
  0x1c   : > { %3582 = vmatprep.subr.bf16.mxu1 %v4010_v31  ;;  %3710 = vmatprep.subr.bf16.mxu0 %v4011_v33  ;;  %v4303_v5 = vld [vmem:[%s4161_s8 + $0x25] sm:$0xff]  ;;  %v470_v12 = vpack.c.bf16 %v4240_v44, %v3113_v0  ;;  %v4338_v23 = vld [vmem:[%s4161_s8 + $0xe] sm:$0xff]  ;;  %v4341_v26 = vld [vmem:[%s4161_s8 + $0x16] sm:$0xff] }
  0x1d   : > { %v4312_v8 = vpack.c.bf16 %v4303_v5, %v4300_v4  ;;  %v4334_v20 = vld [vmem:[%s4161_s8 + $0x2b] sm:$0xff]  ;;  %v3323_v27 = vld [vmem:[%s4161_s8 + $0x1e] sm:$0xff]  ;;  %v4021_v37 = vld [vmem:[%s4713_s1 + $0xf8] ss:$0 sps:$4 sm:$0xff]  }
  0x1e   : > { %v3124_v22 = vld [vmem:[%s4161_s8 + $0x4] sm:$0xff]  ;;  %v1799_v30 = vpack.c.bf16 %v4334_v20, %v4253_v50  ;;  %v4023_v49 = vld [vmem:[%s4713_s1 + $0xfc] sm:$0xff]   ;;  %v4377_v50 = vld [vmem:[%s4161_s8 + $0x2c] sm:$0xff] }
  0x1f   : > { %v553_v41 = vpack.c.bf16 %v4267_v55, %v3124_v22  ;;  %v4024_v0 = vld [vmem:[%s4713_s1 + $0x44] ss:$0 sps:$4 sm:$0xff]   ;;  %v4040_v10 = vld [vmem:[%s4713_s1 + $0x74] ss:$0 sps:$4 sm:$0xff]   ;;  %v4044_v9 = vld [vmem:[%s4713_s1 + $0x80] ss:$0 sps:$4 sm:$0xff]  }
  0x20   : > { %v4041_v24 = vld [vmem:[%s4713_s1 + $0x134] ss:$0 sps:$4 sm:$0xff]   ;;  %v4045_v14 = vld [vmem:[%s4713_s1 + $0x140] ss:$0 sps:$4 sm:$0xff]   ;;  %v4048_v34 = vld [vmem:[%s4713_s1 + $0x8c] ss:$0 sps:$4 sm:$0xff]  }
  0x21   : > { %v4049_v35 = vld [vmem:[%s4713_s1 + $0x14c] ss:$0 sps:$4 sm:$0xff]   ;;  %v4052_v44 = vld [vmem:[%s4713_s1 + $0x98] ss:$0 sps:$4 sm:$0xff]   ;;  %v4056_v55 = vld [vmem:[%s4713_s1 + $0xa4] ss:$0 sps:$4 sm:$0xff]  }
  0x22   : > { %3579 = vmatmul.mubr.msk.bf16.vlgmr.msra.gmra.mrb[0].mxu1 %vm254_vm1, %v1549_v16  ;;  %3707 = vmatmul.mubr.msk.bf16.vlgmr.msra.gmra.mrb[0].mxu0 %vm254_vm1, %v1633_v42  ;;  %v4018_v16 = vld [vmem:[%s4713_s1 + $0x30] sm:$0xff]   ;;  %v1881_v42 = vpack.c.bf16 %v3301_v60, %v4270_v56  ;;  %v4390_v60 = vld [vmem:[%s4161_s8 + $0x27] sm:$0xff]  ;;  %v4053_v45 = vld [vmem:[%s4713_s1 + $0x158] ss:$0 sps:$4 sm:$0xff]  }
  0x23   : > { %3583 = vmatpush3.bf16.msra.mxu1 %v4010_v31  ;;  %3711 = vmatpush3.bf16.msra.mxu0 %v4011_v33  ;;  %v4347_v31 = vld [vmem:[%s4161_s8 + $0x26] sm:$0xff]  ;;  %v1383_v33 = vpack.c.bf16 %v4341_v26, %v4338_v23  ;;  %v4057_v56 = vld [vmem:[%s4713_s1 + $0x164] ss:$0 sps:$4 sm:$0xff]  }
  0x24   : > { %3948 = vmatprep.subr.msk.bf16.mxu1 %vm261_vm0, %v4012_v43  ;;  %3964 = vmatprep.subr.msk.bf16.mxu0 %vm261_vm0, %v4013_v46  ;;  %v4355_v36 = vpack.c.bf16 %v4347_v31, %v3323_v27  ;;  %v575_v43 = vsel %vm261_vm0, %v4020_v32, 0  ;;  %v4022_v46 = vld [vmem:[%s4713_s1 + $0x3c] sm:$0xff]  }
  0x25   : > { %3586 = vmatprep.mubr.msk.bf16.mxu1 %vm254_vm1, %v387_v48  ;;  %3714 = vmatprep.mubr.msk.bf16.mxu0 %vm254_vm1, %v1715_v51  ;;  %v1903_v48 = vsel %vm261_vm0, %v4021_v37, 0 }
  0x27   : > { %3585 = vmatpush3.bf16.msra.mxu1 %v409_v53  ;;  %3713 = vmatpush3.bf16.msra.mxu0 %v1737_v57  ;;  %v4381_v53 = vld [vmem:[%s4161_s8 + $0xf] sm:$0xff]  ;;  %v3334_v57 = vld [vmem:[%s4161_s8 + $0x1f] sm:$0xff] }
  0x28   : > { %3590 = vmatprep.subr.bf16.mxu1 %v4014_v54  ;;  %3718 = vmatprep.subr.bf16.mxu0 %v4015_v58 }
  0x2e   : > { %3587 = vmatmul.mubr.msk.bf16.vlgmr.msra.gmra.mrb[0].mxu1 %vm254_vm1, %v1715_v51  ;;  %3715 = vmatmul.mubr.msk.bf16.vlgmr.msra.gmra.mrb[0].mxu0 %vm254_vm1, %v1716_v3  ;;  %v3135_v51 = vld [vmem:[%s4161_s8 + $0x5] sm:$0xff] }
  0x2f   : > { %3591 = vmatpush3.bf16.msra.mxu1 %v4014_v54  ;;  %3719 = vmatpush3.bf16.msra.mxu0 %v4015_v58  ;;  %v4384_v54 = vld [vmem:[%s4161_s8 + $0x17] sm:$0xff]  ;;  %v1882_v58 = vpack.c.bf16 %v4377_v50, %v4283_v61  ;;  %v1964_v61 = vpack.c.bf16 %v4300_v4, %v4296_v2  ;;  %v4027_v4 = vld [vmem:[%s4713_s1 + $0x108] sm:$0xff]   ;;  %v4061_v2 = vld [vmem:[%s4713_s1 + $0x170] ss:$0 sps:$4 sm:$0xff]  }
  0x30   : > { %3949 = vmatprep.subr.msk.bf16.mxu1 %vm261_vm0, %v4016_v6  ;;  %3965 = vmatprep.subr.msk.bf16.mxu0 %vm261_vm0, %v4017_v11  ;;  %v1466_v3 = vpack.c.bf16 %v4384_v54, %v4381_v53  ;;  %v4398_v6 = vpack.c.bf16 %v4390_v60, %v3334_v57  ;;  %v4025_v11 = vld [vmem:[%s4713_s1 + $0x104] ss:$0 sps:$4 sm:$0xff]  }
  0x31   : > { %3594 = vmatprep.mubr.msk.bf16.mxu1 %vm254_vm1, %v470_v12  ;;  %3722 = vmatprep.mubr.msk.bf16.mxu0 %vm254_vm1, %v1798_v13  ;;  %v636_v12 = vpack.c.bf16 %v4293_v1, %v3135_v51  ;;  %v4032_v51 = vld [vmem:[%s4713_s1 + $0x5c] ss:$0 sps:$4 sm:$0xff]   ;;  %v4060_v1 = vld [vmem:[%s4713_s1 + $0xb0] ss:$0 sps:$4 sm:$0xff]  }
  0x33   : > { %3593 = vmatpush3.bf16.msra.mxu1 %v492_v15  ;;  %3721 = vmatpush3.bf16.msra.mxu0 %v1820_v17  ;;  %v4026_v15 = vld [vmem:[%s4713_s1 + $0x48] sm:$0xff]  }
  0x34   : > { %3598 = vmatprep.subr.bf16.mxu1 %v4018_v16  ;;  %3726 = vmatprep.subr.bf16.mxu0 %v4019_v18  ;;  %v4421_v17 = vld [vmem:[%s4161_s8 + $0x2d] sm:$0xff] }
  0x35   : > { %v1965_v22 = vpack.c.bf16 %v4421_v17, %v4303_v5 }
  0x3a   : > { %3595 = vmatmul.mubr.msk.bf16.vlgmr.msra.gmra.mrb[0].mxu1 %vm254_vm1, %v1798_v13  ;;  %3723 = vmatmul.mubr.msk.bf16.vlgmr.msra.gmra.mrb[0].mxu0 %vm254_vm1, %v1799_v30  ;;  %v658_v13 = vsel %vm261_vm0, %v4024_v0, 0  ;;  %v4028_v30 = vld [vmem:[%s4713_s1 + $0x50] ss:$0 sps:$4 sm:$0xff]  }
  0x3b   : > { %3599 = vmatpush3.bf16.msra.mxu1 %v4018_v16  ;;  %3727 = vmatpush3.bf16.msra.mxu0 %v4019_v18  ;;  %v1986_v16 = vsel %vm261_vm0, %v4025_v11, 0  ;;  %v3146_v18 = vld [vmem:[%s4161_s8 + $0x6] sm:$0xff]  ;;  %v741_v5 = vsel %vm261_vm0, %v4028_v30, 0 }
  0x3c   : > { %3950 = vmatprep.subr.msk.bf16.mxu1 %vm261_vm0, %v4020_v32  ;;  %3966 = vmatprep.subr.msk.bf16.mxu0 %vm261_vm0, %v4021_v37  ;;  %v4029_v32 = vld [vmem:[%s4713_s1 + $0x110] ss:$0 sps:$4 sm:$0xff]   ;;  %v719_v37 = vpack.c.bf16 %v4338_v23, %v3146_v18  ;;  %v4064_v23 = vld [vmem:[%s4713_s1 + $0xbc] ss:$0 sps:$4 sm:$0xff]  }
  0x3d   : > { %3602 = vmatprep.mubr.msk.bf16.mxu1 %vm254_vm1, %v553_v41  ;;  %3730 = vmatprep.mubr.msk.bf16.mxu0 %vm254_vm1, %v1881_v42  ;;  %v2047_v41 = vpack.c.bf16 %v3323_v27, %v4341_v26  ;;  %v4031_v27 = vld [vmem:[%s4713_s1 + $0x114] sm:$0xff]   ;;  %v4065_v26 = vld [vmem:[%s4713_s1 + $0x17c] ss:$0 sps:$4 sm:$0xff]  }
  0x3f   : > { %3601 = vmatpush3.bf16.msra.mxu1 %v575_v43  ;;  %3729 = vmatpush3.bf16.msra.mxu0 %v1903_v48  ;;  %v2069_v43 = vsel %vm261_vm0, %v4029_v32, 0  ;;  %v3157_v48 = vld [vmem:[%s4161_s8 + $0x7] sm:$0xff] }
  0x40   : > { %3606 = vmatprep.subr.bf16.mxu1 %v4022_v46  ;;  %3734 = vmatprep.subr.bf16.mxu0 %v4023_v49 }
  0x46   : > { %3603 = vmatmul.mubr.msk.bf16.vlgmr.msra.gmra.mrb[0].mxu1 %vm254_vm1, %v1881_v42  ;;  %3731 = vmatmul.mubr.msk.bf16.vlgmr.msra.gmra.mrb[0].mxu0 %vm254_vm1, %v1882_v58  ;;  %v4030_v42 = vld [vmem:[%s4713_s1 + $0x54] sm:$0xff]   ;;  %v4033_v58 = vld [vmem:[%s4713_s1 + $0x11c] ss:$0 sps:$4 sm:$0xff]  }
  0x47   : > { %3607 = vmatpush3.bf16.msra.mxu1 %v4022_v46  ;;  %3735 = vmatpush3.bf16.msra.mxu0 %v4023_v49  ;;  %v4449_v46 = vld [vmem:[%s4161_s8 + $0x2e] sm:$0xff] }
  0x48   : > { %3951 = vmatprep.subr.msk.bf16.mxu1 %vm261_vm0, %v4024_v0  ;;  %3967 = vmatprep.subr.msk.bf16.mxu0 %vm261_vm0, %v4025_v11  ;;  %v2048_v49 = vpack.c.bf16 %v4449_v46, %v4347_v31  ;;  %v802_v0 = vpack.c.bf16 %v4381_v53, %v3157_v48  ;;  %v2130_v11 = vpack.c.bf16 %v3334_v57, %v4384_v54  ;;  %v824_v31 = vsel %vm261_vm0, %v4032_v51, 0  ;;  %v4035_v57 = vld [vmem:[%s4713_s1 + $0x120] sm:$0xff]  }
  0x49   : > { %3610 = vmatprep.mubr.msk.bf16.mxu1 %vm254_vm1, %v636_v12  ;;  %3738 = vmatprep.mubr.msk.bf16.mxu0 %vm254_vm1, %v1964_v61  ;;  %v4034_v12 = vld [vmem:[%s4713_s1 + $0x60] sm:$0xff]  }
  0x4a   : > { %v3432_v53 = vld [vmem:[%s4714_s2] ss:$0 sm:$0xff] }
  0x4b   : > { %3609 = vmatpush3.bf16.msra.mxu1 %v658_v13  ;;  %3737 = vmatpush3.bf16.msra.mxu0 %v1986_v16  ;;  %v4477_v13 = vld [vmem:[%s4161_s8 + $0x2f] sm:$0xff]  ;;  %v4036_v16 = vld [vmem:[%s4713_s1 + $0x68] ss:$0 sps:$4 sm:$0xff]  }
  0x4c   : > { %3614 = vmatprep.subr.bf16.mxu1 %v4026_v15  ;;  %3742 = vmatprep.subr.bf16.mxu0 %v4027_v4  ;;  %v907_v18 = vsel %vm261_vm0, %v4036_v16, 0 }
  0x52   : > { %3611 = vmatmul.mubr.msk.bf16.vlgmr.msra.gmra.mrb[0].mxu1 %vm254_vm1, %v1964_v61  ;;  %3739 = vmatmul.mubr.msk.bf16.vlgmr.msra.gmra.mrb[0].mxu0 %vm254_vm1, %v1965_v22  ;;  %v2152_v61 = vsel %vm261_vm0, %v4033_v58, 0 }
  0x53   : > { %3615 = vmatpush3.bf16.msra.mxu1 %v4026_v15  ;;  %3743 = vmatpush3.bf16.msra.mxu0 %v4027_v4  ;;  %v2131_v15 = vpack.c.bf16 %v4477_v13, %v4390_v60  ;;  %v4037_v4 = vld [vmem:[%s4713_s1 + $0x128] ss:$0 sps:$4 sm:$0xff]   ;;  %v4038_v60 = vld [vmem:[%s4713_s1 + $0x6c] sm:$0xff]  }
  0x54   : > { %3952 = vmatprep.subr.msk.bf16.mxu1 %vm261_vm0, %v4028_v30  ;;  %3968 = vmatprep.subr.msk.bf16.mxu0 %vm261_vm0, %v4029_v32  ;;  %v2235_v22 = vsel %vm261_vm0, %v4037_v4, 0  ;;  %v4039_v30 = vld [vmem:[%s4713_s1 + $0x12c] sm:$0xff]  }
  0x55   : > { %3618 = vmatprep.mubr.msk.bf16.mxu1 %vm254_vm1, %v719_v37  ;;  %3746 = vmatprep.mubr.msk.bf16.mxu0 %vm254_vm1, %v2047_v41  ;;  %v3347_v32 = vld [vmem:[%s4161_s8 + $0x30] sm:$0xff] }
  0x56   : > { %v2214_v37 = vpack.c.bf16 %v3347_v32, %v4183_v19  ;;  %v990_v19 = vsel %vm261_vm0, %v4040_v10, 0 }
  0x57   : > { %3617 = vmatpush3.bf16.msra.mxu1 %v741_v5  ;;  %3745 = vmatpush3.bf16.msra.mxu0 %v2069_v43  ;;  %v3358_v5 = vld [vmem:[%s4161_s8 + $0x31] sm:$0xff]  ;;  %v2401_v43 = vsel %vm261_vm0, %v4045_v14, 0 }
  0x58   : > { %3622 = vmatprep.subr.bf16.mxu1 %v4030_v42  ;;  %3750 = vmatprep.subr.bf16.mxu0 %v4031_v27 }
  0x5e   : > { %3619 = vmatmul.mubr.msk.bf16.vlgmr.msra.gmra.mrb[0].mxu1 %vm254_vm1, %v2047_v41  ;;  %3747 = vmatmul.mubr.msk.bf16.vlgmr.msra.gmra.mrb[0].mxu0 %vm254_vm1, %v2048_v49  ;;  %v2318_v41 = vsel %vm261_vm0, %v4041_v24, 0  ;;  %v2484_v49 = vsel %vm261_vm0, %v4049_v35, 0 }
  0x5f   : > { %3623 = vmatpush3.bf16.msra.mxu1 %v4030_v42  ;;  %3751 = vmatpush3.bf16.msra.mxu0 %v4031_v27  ;;  %v2297_v42 = vpack.c.bf16 %v3358_v5, %v4230_v39  ;;  %v4046_v39 = vld [vmem:[%s4713_s1 + $0x84] sm:$0xff]   ;;  %v3369_v27 = vld [vmem:[%s4161_s8 + $0x32] sm:$0xff] }
  0x60   : > { %3953 = vmatprep.subr.msk.bf16.mxu1 %vm261_vm0, %v4032_v51  ;;  %3969 = vmatprep.subr.msk.bf16.mxu0 %vm261_vm0, %v4033_v58  ;;  %v2380_v48 = vpack.c.bf16 %v3369_v27, %v4289_v63  ;;  %v4050_v63 = vld [vmem:[%s4713_s1 + $0x90] sm:$0xff]  }
  0x61   : > { %3626 = vmatprep.mubr.msk.bf16.mxu1 %vm254_vm1, %v802_v0  ;;  %3754 = vmatprep.mubr.msk.bf16.mxu0 %vm254_vm1, %v2130_v11  ;;  %v3380_v51 = vld [vmem:[%s4161_s8 + $0x33] sm:$0xff]  ;;  %v2567_v0 = vsel %vm261_vm0, %v4053_v45, 0 }
  0x62   : > { %v2463_v58 = vpack.c.bf16 %v3380_v51, %v4334_v20  ;;  %v4054_v20 = vld [vmem:[%s4713_s1 + $0x9c] sm:$0xff]  }
  0x63   : > { %3625 = vmatpush3.bf16.msra.mxu1 %v824_v31  ;;  %3753 = vmatpush3.bf16.msra.mxu0 %v2152_v61  ;;  %v3402_v61 = vld [vmem:[%s4161_s8 + $0x35] sm:$0xff] }
  0x64   : > { %3630 = vmatprep.subr.bf16.mxu1 %v4034_v12  ;;  %3758 = vmatprep.subr.bf16.mxu0 %v4035_v57 }
  0x6a   : > { %3627 = vmatmul.mubr.msk.bf16.vlgmr.msra.gmra.mrb[0].mxu1 %vm254_vm1, %v2130_v11  ;;  %3755 = vmatmul.mubr.msk.bf16.vlgmr.msra.gmra.mrb[0].mxu0 %vm254_vm1, %v2131_v15  ;;  %v3391_v11 = vld [vmem:[%s4161_s8 + $0x34] sm:$0xff]  ;;  %v2733_v15 = vsel %vm261_vm0, %v4061_v2, 0 }
  0x6b   : > { %3631 = vmatpush3.bf16.msra.mxu1 %v4034_v12  ;;  %3759 = vmatpush3.bf16.msra.mxu0 %v4035_v57  ;;  %v2546_v31 = vpack.c.bf16 %v3391_v11, %v4377_v50  ;;  %v4058_v50 = vld [vmem:[%s4713_s1 + $0xa8] sm:$0xff]   ;;  %v2650_v12 = vsel %vm261_vm0, %v4057_v56, 0  ;;  %v2629_v57 = vpack.c.bf16 %v3402_v61, %v4421_v17  ;;  %v4062_v17 = vld [vmem:[%s4713_s1 + $0xb4] sm:$0xff]  }
  0x6c   : > { %3954 = vmatprep.subr.msk.bf16.mxu1 %vm261_vm0, %v4036_v16  ;;  %3970 = vmatprep.subr.msk.bf16.mxu0 %vm261_vm0, %v4037_v4  ;;  %v3413_v16 = vld [vmem:[%s4161_s8 + $0x36] sm:$0xff] }
  0x6d   : > { %3634 = vmatprep.mubr.msk.bf16.mxu1 %vm254_vm1, %v885_v28  ;;  %3762 = vmatprep.mubr.msk.bf16.mxu0 %vm254_vm1, %v4196_v25  ;;  %v4042_v28 = vld [vmem:[%s4713_s1 + $0x78] sm:$0xff]   ;;  %v2712_v4 = vpack.c.bf16 %v3413_v16, %v4449_v46  ;;  %v2816_v46 = vsel %vm261_vm0, %v4065_v26, 0 }
  0x6f   : > { %3633 = vmatpush3.bf16.msra.mxu1 %v907_v18  ;;  %3761 = vmatpush3.bf16.msra.mxu0 %v2235_v22 }
  0x70   : > { %3638 = vmatprep.subr.bf16.mxu1 %v4038_v60  ;;  %3766 = vmatprep.subr.bf16.mxu0 %v4039_v30 }
  0x76   : > { %3635 = vmatmul.mubr.msk.bf16.vlgmr.msra.gmra.mrb[0].mxu1 %vm254_vm1, %v4196_v25  ;;  %3763 = vmatmul.mubr.msk.bf16.vlgmr.msra.gmra.mrb[0].mxu0 %vm254_vm1, %v2214_v37  ;;  %v4043_v25 = vld [vmem:[%s4713_s1 + $0x138] sm:$0xff]   ;;  %v3433_v37 = vld [vmem:[%s4715_s3] ss:$0 sm:$0xff] }
  0x77   : > { %3639 = vmatpush3.bf16.msra.mxu1 %v4038_v60  ;;  %3767 = vmatpush3.bf16.msra.mxu0 %v4039_v30 }
  0x78   : > { %3955 = vmatprep.subr.msk.bf16.mxu1 %vm261_vm0, %v4040_v10  ;;  %3971 = vmatprep.subr.msk.bf16.mxu0 %vm261_vm0, %v4041_v24 }
  0x79   : > { %3642 = vmatprep.mubr.msk.bf16.mxu1 %vm254_vm1, %v968_v21  ;;  %3770 = vmatprep.mubr.msk.bf16.mxu0 %vm254_vm1, %v4205_v29  ;;  %v1073_v21 = vsel %vm261_vm0, %v4044_v9, 0 }
  0x7b   : > { %3641 = vmatpush3.bf16.msra.mxu1 %v990_v19  ;;  %3769 = vmatpush3.bf16.msra.mxu0 %v2318_v41 }
  0x7c   : > { %3646 = vmatprep.subr.bf16.mxu1 %v4042_v28  ;;  %3774 = vmatprep.subr.bf16.mxu0 %v4043_v25 }
  0x82   : > { %3643 = vmatmul.mubr.msk.bf16.vlgmr.msra.gmra.mrb[0].mxu1 %vm254_vm1, %v4205_v29  ;;  %3771 = vmatmul.mubr.msk.bf16.vlgmr.msra.gmra.mrb[0].mxu0 %vm254_vm1, %v2297_v42  ;;  %v4047_v29 = vld [vmem:[%s4713_s1 + $0x144] sm:$0xff]  }
  0x83   : > { %3647 = vmatpush3.bf16.msra.mxu1 %v4042_v28  ;;  %3775 = vmatpush3.bf16.msra.mxu0 %v4043_v25 }
  0x84   : > { %3956 = vmatprep.subr.msk.bf16.mxu1 %vm261_vm0, %v4044_v9  ;;  %3972 = vmatprep.subr.msk.bf16.mxu0 %vm261_vm0, %v4045_v14 }
  0x85   : > { %3650 = vmatprep.mubr.msk.bf16.mxu1 %vm254_vm1, %v1051_v38  ;;  %3778 = vmatprep.mubr.msk.bf16.mxu0 %vm254_vm1, %v4232_v40  ;;  %v1156_v38 = vsel %vm261_vm0, %v4048_v34, 0 }
  0x87   : > { %3649 = vmatpush3.bf16.msra.mxu1 %v1073_v21  ;;  %3777 = vmatpush3.bf16.msra.mxu0 %v2401_v43 }
  0x88   : > { %3654 = vmatprep.subr.bf16.mxu1 %v4046_v39  ;;  %3782 = vmatprep.subr.bf16.mxu0 %v4047_v29 }
  0x8e   : > { %3651 = vmatmul.mubr.msk.bf16.vlgmr.msra.gmra.mrb[0].mxu1 %vm254_vm1, %v4232_v40  ;;  %3779 = vmatmul.mubr.msk.bf16.vlgmr.msra.gmra.mrb[0].mxu0 %vm254_vm1, %v2380_v48  ;;  %v4051_v40 = vld [vmem:[%s4713_s1 + $0x150] sm:$0xff]  }
  0x8f   : > { %3655 = vmatpush3.bf16.msra.mxu1 %v4046_v39  ;;  %3783 = vmatpush3.bf16.msra.mxu0 %v4047_v29 }
  0x90   : > { %3957 = vmatprep.subr.msk.bf16.mxu1 %vm261_vm0, %v4048_v34  ;;  %3973 = vmatprep.subr.msk.bf16.mxu0 %vm261_vm0, %v4049_v35 }
  0x91   : > { %3658 = vmatprep.mubr.msk.bf16.mxu1 %vm254_vm1, %v1134_v47  ;;  %3786 = vmatprep.mubr.msk.bf16.mxu0 %vm254_vm1, %v4258_v52  ;;  %v1239_v47 = vsel %vm261_vm0, %v4052_v44, 0 }
  0x93   : > { %3657 = vmatpush3.bf16.msra.mxu1 %v1156_v38  ;;  %3785 = vmatpush3.bf16.msra.mxu0 %v2484_v49 }
  0x94   : > { %3662 = vmatprep.subr.bf16.mxu1 %v4050_v63  ;;  %3790 = vmatprep.subr.bf16.mxu0 %v4051_v40 }
  0x9a   : > { %3659 = vmatmul.mubr.msk.bf16.vlgmr.msra.gmra.mrb[0].mxu1 %vm254_vm1, %v4258_v52  ;;  %3787 = vmatmul.mubr.msk.bf16.vlgmr.msra.gmra.mrb[0].mxu0 %vm254_vm1, %v2463_v58  ;;  %v4055_v52 = vld [vmem:[%s4713_s1 + $0x15c] sm:$0xff]  }
  0x9b   : > { %3663 = vmatpush3.bf16.msra.mxu1 %v4050_v63  ;;  %3791 = vmatpush3.bf16.msra.mxu0 %v4051_v40 }
  0x9c   : > { %3958 = vmatprep.subr.msk.bf16.mxu1 %vm261_vm0, %v4052_v44  ;;  %3974 = vmatprep.subr.msk.bf16.mxu0 %vm261_vm0, %v4053_v45 }
  0x9d   : > { %3666 = vmatprep.mubr.msk.bf16.mxu1 %vm254_vm1, %v1217_v59  ;;  %3794 = vmatprep.mubr.msk.bf16.mxu0 %vm254_vm1, %v4286_v62  ;;  %v1322_v59 = vsel %vm261_vm0, %v4056_v55, 0 }
  0x9f   : > { %3665 = vmatpush3.bf16.msra.mxu1 %v1239_v47  ;;  %3793 = vmatpush3.bf16.msra.mxu0 %v2567_v0 }
  0xa0   : > { %3670 = vmatprep.subr.bf16.mxu1 %v4054_v20  ;;  %3798 = vmatprep.subr.bf16.mxu0 %v4055_v52 }
  0xa6   : > { %3667 = vmatmul.mubr.msk.bf16.vlgmr.msra.gmra.mrb[0].mxu1 %vm254_vm1, %v4286_v62  ;;  %3795 = vmatmul.mubr.msk.bf16.vlgmr.msra.gmra.mrb[0].mxu0 %vm254_vm1, %v2546_v31  ;;  %v4059_v62 = vld [vmem:[%s4713_s1 + $0x168] sm:$0xff]  }
  0xa7   : > { %3671 = vmatpush3.bf16.msra.mxu1 %v4054_v20  ;;  %3799 = vmatpush3.bf16.msra.mxu0 %v4055_v52 }
  0xa8   : > { %3959 = vmatprep.subr.msk.bf16.mxu1 %vm261_vm0, %v4056_v55  ;;  %3975 = vmatprep.subr.msk.bf16.mxu0 %vm261_vm0, %v4057_v56 }
  0xa9   : > { %3674 = vmatprep.mubr.msk.bf16.mxu1 %vm254_vm1, %v1300_v7  ;;  %3802 = vmatprep.mubr.msk.bf16.mxu0 %vm254_vm1, %v4312_v8  ;;  %v1405_v7 = vsel %vm261_vm0, %v4060_v1, 0 }
  0xab   : > { %3673 = vmatpush3.bf16.msra.mxu1 %v1322_v59  ;;  %3801 = vmatpush3.bf16.msra.mxu0 %v2650_v12 }
  0xac   : > { %3678 = vmatprep.subr.bf16.mxu1 %v4058_v50  ;;  %3806 = vmatprep.subr.bf16.mxu0 %v4059_v62 }
  0xb2   : > { %3675 = vmatmul.mubr.msk.bf16.vlgmr.msra.gmra.mrb[0].mxu1 %vm254_vm1, %v4312_v8  ;;  %3803 = vmatmul.mubr.msk.bf16.vlgmr.msra.gmra.mrb[0].mxu0 %vm254_vm1, %v2629_v57  ;;  %v4063_v8 = vld [vmem:[%s4713_s1 + $0x174] sm:$0xff]  }
  0xb3   : > { %3679 = vmatpush3.bf16.msra.mxu1 %v4058_v50  ;;  %3807 = vmatpush3.bf16.msra.mxu0 %v4059_v62 }
  0xb4   : > { %3960 = vmatprep.subr.msk.bf16.mxu1 %vm261_vm0, %v4060_v1  ;;  %3976 = vmatprep.subr.msk.bf16.mxu0 %vm261_vm0, %v4061_v2 }
  0xb5   : > { %3682 = vmatprep.mubr.msk.bf16.mxu1 %vm254_vm1, %v1383_v33  ;;  %3810 = vmatprep.mubr.msk.bf16.mxu0 %vm254_vm1, %v4355_v36  ;;  %v1488_v33 = vsel %vm261_vm0, %v4064_v23, 0 }
  0xb7   : > { %3681 = vmatpush3.bf16.msra.mxu1 %v1405_v7  ;;  %3809 = vmatpush3.bf16.msra.mxu0 %v2733_v15 }
  0xb8   : > { %3686 = vmatprep.subr.bf16.mxu1 %v4062_v17  ;;  %3814 = vmatprep.subr.bf16.mxu0 %v4063_v8 }
  0xbe   : > { %3683 = vmatmul.mubr.msk.bf16.vlgmr.msra.gmra.mrb[0].mxu1 %vm254_vm1, %v4355_v36  ;;  %3811 = vmatmul.mubr.msk.bf16.vlgmr.msra.gmra.mrb[0].mxu0 %vm254_vm1, %v2712_v4  ;;  %v3424_v36 = vld [vmem:[%s4161_s8 + $0x37] sm:$0xff]  ;;  %s3437_s8 = sshll.u32 %s4722_s15, 5 }
  0xbf   : > { %3687 = vmatpush3.bf16.msra.mxu1 %v4062_v17  ;;  %3815 = vmatpush3.bf16.msra.mxu0 %v4063_v8  ;;  %v2795_v18 = vpack.c.bf16 %v3424_v36, %v4477_v13  ;;  %s219_s30 = scalar_lea.vmem %s4716_s4, %s3437_s8 }
  0xc0   : > { %3961 = vmatprep.subr.msk.bf16.mxu1 %vm261_vm0, %v4064_v23  ;;  %3977 = vmatprep.subr.msk.bf16.mxu0 %vm261_vm0, %v4065_v26 }
  0xc1   : > { %3690 = vmatprep.mubr.msk.bf16.mxu1 %vm254_vm1, %v1466_v3  ;;  %3818 = vmatprep.mubr.msk.bf16.mxu0 %vm254_vm1, %v4398_v6 }
  0xc3   : > { %3689 = vmatpush3.bf16.msra.mxu1 %v1488_v33  ;;  %3817 = vmatpush3.bf16.msra.mxu0 %v2816_v46 }
  0xca   : > { %3691 = vmatmul.mubr.msk.bf16.vlgmr.msra.gmra.mrb[0].mxu1 %vm254_vm1, %v4398_v6  ;;  %3819 = vmatmul.mubr.msk.bf16.vlgmr.msra.gmra.mrb[0].mxu0 %vm254_vm1, %v2795_v18 }
 0x19d   : > { %v3692_v60 = vpop.f32.mrb[0].mxu1  ;;  %v3820_v22 = vpop.f32.mrb[0].mxu0 }
 0x19e   : > { %v1524_v54 = vpop.f32.mrb[1].mxu1  ;;  %v3822_v3 = vadd.f32 %v3820_v22, %v3692_v60  ;;  %v2852_v30 = vpop.f32.mrb[1].mxu0 }
 0x19f   : > { %v3693_v32 = vpop.f32.mrb[2].mxu1  ;;  %v3823_v13 = vadd.f32 %v2852_v30, %v1524_v54  ;;  %v3821_v10 = vpop.f32.mrb[2].mxu0 }
 0x1a0   : > { %v1527_v24 = vpop.f32.mrb[3].mxu1  ;;  %v2880_v6 = vmul.f32 %v3822_v3, %v3432_v53  ;;  %v3824_v19 = vadd.f32 %v3821_v10, %v3693_v32  ;;  %v2855_v28 = vpop.f32.mrb[3].mxu0 }
 0x1a1   : > { %v2878_v41 = vmul.f32 %v3823_v13, %v3432_v53  ;;  %v3825_v25 = vadd.f32 %v2855_v28, %v1527_v24 }
 0x1a2   : > { %v2891_v5 = vadd.f32 %v3433_v37, %v2880_v6  ;;  %v2881_v42 = vmul.f32 %v3824_v19, %v3432_v53 }
 0x1a3   : > { %v2889_v9 = vadd.f32 %v3433_v37, %v2878_v41  ;;  %v2879_v14 = vmul.f32 %v3825_v25, %v3432_v53 }
 0x1a4   : > { %v2895_v21 = vmax.f32 %v2891_v5, 0.0  ;;  %v2892_v39 = vadd.f32 %v3433_v37, %v2881_v42 }
 0x1a5   : > { %v2893_v43 = vmax.f32 %v2889_v9, 0.0  ;;  %v2890_v29 = vadd.f32 %v3433_v37, %v2879_v14 }
 0x1a6   : > { %2900 = vst.msk [vmem:[%s219_s30 + $0x10] sm:$0xff] %vm2897_vm2, %v2895_v21  ;;  %v2896_v27 = vmax.f32 %v2892_v39, 0.0 }
 0x1a7   : > { %2898 = vst.msk [vmem:[%s219_s30] sm:$0xff] %vm2897_vm2, %v2893_v43  ;;  %v2894_v48 = vmax.f32 %v2890_v29, 0.0 }
 0x1a8   : > { %2901 = vst.msk [vmem:[%s219_s30 + $0x18] sm:$0xff] %vm2897_vm2, %v2896_v27 }
 0x1a9   : > { %2899 = vst.msk [vmem:[%s219_s30 + $0x8] sm:$0xff] %vm2897_vm2, %v2894_v48 }
 0x1aa PF: > { %s14_s17 = sadd.s32 1, %s4088_s17   ;;  %s4717_s15 = smov %s4084_s16 }
 0x1ab   : > { %p11_p5 = scmp.ge.s32.totalorder %s14_s17, 4   ;;  %s4718_s16 = smov %s4720_s18 }
 0x1ad   :  { %13 = sbr.rel (!%p11_p5) target bundleno = 2 (0x2), region = 129 }

</bundles_post_ra>
